<compile_context>
chip_gen: v7x
topology: tpu7x:2x2x1
jax: 0.10.0
libtpu: 0.0.40
codegen_flags: <defaults>
</compile_context>

<pallas_src>
import functools

import jax
import jax.numpy as jnp
from jax.experimental import pallas as pl
from jax.experimental.pallas import tpu as pltpu

BN_EPS = 1e-5
_VMEM_LIMIT = 64 * 1024 * 1024


def _choose_tm(m):
    """Single full-extent block for small/medium M; 512-row tiles for large M."""
    if m <= 1024:
        return m
    return 512


# ---------------------------------------------------------------------------
# Kernel A: out = maybe_relu(x @ w + bias)
# x/w are bf16, dot accumulates in f32, epilogue in f32, store in out_dtype.
# K and N are full-extent blocks -> single dot per grid step, no K axis.
# ---------------------------------------------------------------------------
def _mm_kernel(x_ref, w_ref, b_ref, o_ref, *, relu):
    acc = jnp.dot(x_ref[...], w_ref[...], preferred_element_type=jnp.float32)
    out = acc + b_ref[...]
    if relu:
        out = jnp.maximum(out, 0.0)
    # TODO(synk): N<128 stores are lane-sparse (masked vst); an in-kernel
    # (tm,N)->(tm*N/128,128) relayout would make them lane-dense.
    o_ref[...] = out.astype(o_ref.dtype)


@functools.lru_cache(maxsize=None)
def _build_matmul(m, k, n, tm, relu, out_dtype_name):
    out_dtype = jnp.dtype(out_dtype_name)
    kernel = functools.partial(_mm_kernel, relu=relu)
    cost = pl.CostEstimate(
        flops=2 * m * k * n, transcendentals=0,
        bytes_accessed=2 * m * k + 2 * k * n + 4 * n + out_dtype.itemsize * m * n)
    return pl.pallas_call(
        kernel,
        out_shape=jax.ShapeDtypeStruct((m, n), out_dtype),
        grid=(pl.cdiv(m, tm),),
        in_specs=[
            pl.BlockSpec((tm, k), lambda i: (i, 0)),   # x tile (bf16)
            pl.BlockSpec((k, n), lambda i: (0, 0)),    # full weight slab (bf16)
            pl.BlockSpec((1, n), lambda i: (0, 0)),    # folded BN/conv bias (f32)
        ],
        out_specs=pl.BlockSpec((tm, n), lambda i: (i, 0)),
        compiler_params=pltpu.CompilerParams(
            dimension_semantics=("parallel",),
            vmem_limit_bytes=_VMEM_LIMIT),
        cost_estimate=cost,
    )


def matmul_fused(x, w, bias, relu=False, out_dtype=jnp.float32):
    m, k = x.shape
    n = w.shape[1]
    tm = _choose_tm(m)
    fn = _build_matmul(m, k, n, tm, bool(relu), jnp.dtype(out_dtype).name)
    return fn(x.astype(jnp.bfloat16), w.astype(jnp.bfloat16),
              bias.reshape(1, n).astype(jnp.float32))


# ---------------------------------------------------------------------------
# Kernel B: fused deform_conv(matmul) + bn2 + relu + conv3 + bn3 + residual
# + relu.  The (tm, width) intermediate stays in vregs/VMEM, never hits HBM.
# ---------------------------------------------------------------------------
def _deform_conv3_kernel(c_ref, w2_ref, b2_ref, w3_ref, b3_ref, r_ref, o_ref):
    h = jnp.dot(c_ref[...], w2_ref[...], preferred_element_type=jnp.float32)
    h = jnp.maximum(h + b2_ref[...], 0.0)                       # bn2 + relu
    acc = jnp.dot(h.astype(jnp.bfloat16), w3_ref[...],
                  preferred_element_type=jnp.float32)
    out = acc + b3_ref[...] + r_ref[...]                        # bn3 + residual
    o_ref[...] = jnp.maximum(out, 0.0).astype(o_ref.dtype)      # relu


@functools.lru_cache(maxsize=None)
def _build_deform_conv3(m, k, n1, n2, tm):
    cost = pl.CostEstimate(
        flops=2 * m * k * n1 + 2 * m * n1 * n2, transcendentals=0,
        bytes_accessed=2 * m * k + 2 * k * n1 + 2 * n1 * n2 + 8 * m * n2)
    return pl.pallas_call(
        _deform_conv3_kernel,
        out_shape=jax.ShapeDtypeStruct((m, n2), jnp.float32),
        grid=(pl.cdiv(m, tm),),
        in_specs=[
            pl.BlockSpec((tm, k), lambda i: (i, 0)),   # deform columns (bf16)
            pl.BlockSpec((k, n1), lambda i: (0, 0)),   # bn2-folded w2 (bf16)
            pl.BlockSpec((1, n1), lambda i: (0, 0)),   # bn2 shift (f32)
            pl.BlockSpec((n1, n2), lambda i: (0, 0)),  # bn3-folded w3 (bf16)
            pl.BlockSpec((1, n2), lambda i: (0, 0)),   # bn3 shift (f32)
            pl.BlockSpec((tm, n2), lambda i: (i, 0)),  # residual (f32)
        ],
        out_specs=pl.BlockSpec((tm, n2), lambda i: (i, 0)),
        compiler_params=pltpu.CompilerParams(
            dimension_semantics=("parallel",),
            vmem_limit_bytes=_VMEM_LIMIT),
        cost_estimate=cost,
    )


def deform_conv3_fused(cols, w2, b2, w3, b3, residual):
    m, k = cols.shape
    n1, n2 = w2.shape[1], w3.shape[1]
    tm = _choose_tm(m)
    fn = _build_deform_conv3(m, k, n1, n2, tm)
    return fn(cols.astype(jnp.bfloat16), w2.astype(jnp.bfloat16),
              b2.reshape(1, n1).astype(jnp.float32),
              w3.astype(jnp.bfloat16),
              b3.reshape(1, n2).astype(jnp.float32),
              residual.astype(jnp.float32))


# ---------------------------------------------------------------------------
# Conv wrappers (im2col / BN folding in fused JAX glue, matmuls in Pallas)
# ---------------------------------------------------------------------------
def _fold_bn(bn, conv_bias, cout):
    cb = conv_bias if conv_bias is not None else jnp.zeros((cout,), jnp.float32)
    if bn is None:
        return jnp.ones((cout,), jnp.float32), cb
    gamma, beta, rmean, rvar = bn
    scale = gamma / jnp.sqrt(rvar + BN_EPS)
    shift = beta + (cb - rmean) * scale
    return scale, shift


def conv1x1_bn_act(x, w, bn, relu, stride=1, out_dtype=jnp.float32):
    cout, cin = w.shape[0], w.shape[1]
    if stride != 1:
        x = x[:, ::stride, ::stride, :]
    n, h, wsp, _ = x.shape
    scale, shift = _fold_bn(bn, None, cout)
    w2 = w.reshape(cout, cin).T * scale[None, :]
    y = matmul_fused(x.reshape(n * h * wsp, cin), w2, shift, relu=relu,
                     out_dtype=out_dtype)
    return y.reshape(n, h, wsp, cout)


def _im2col(x, kh, kw, stride, pad):
    # TODO(synk): the 9x tap expansion is still materialized in HBM (now bf16);
    # a per-tap Element-indexed K grid axis would remove it entirely.
    n, h, w, c = x.shape
    ho = (h + 2 * pad - kh) // stride + 1
    wo = (w + 2 * pad - kw) // stride + 1
    xp = jnp.pad(x, ((0, 0), (pad, pad), (pad, pad), (0, 0)))
    taps = []
    for i in range(kh):
        for j in range(kw):
            taps.append(xp[:, i:i + stride * (ho - 1) + 1:stride,
                           j:j + stride * (wo - 1) + 1:stride, :])
    cols = jnp.stack(taps, axis=3)          # (n, ho, wo, kh*kw, c), bf16
    return cols.reshape(n, ho, wo, kh * kw * c), ho, wo


def conv3x3_bias(x, w, conv_bias, stride):
    """offset_conv: plain 3x3 conv, padding=1, bias=True, no BN, no ReLU."""
    cout, cin, kh, kw = w.shape
    cols, ho, wo = _im2col(x, kh, kw, stride, 1)
    n = x.shape[0]
    w2 = jnp.transpose(w, (2, 3, 1, 0)).reshape(kh * kw * cin, cout)
    # Offsets stay f32: tiny tensor, sampling-position sensitive.
    y = matmul_fused(cols.reshape(n * ho * wo, kh * kw * cin), w2, conv_bias,
                     relu=False, out_dtype=jnp.float32)
    return y.reshape(n, ho, wo, cout)


def deform_im2col(x, offsets, stride, pad, kh=3, kw=3, out_dtype=jnp.bfloat16):
    """Bilinear sampling columns matching torchvision DeformConv2d semantics."""
    # TODO(synk): bilinear gather is fused XLA glue (one gather) feeding the
    # Pallas matmul; an in-kernel DMA-gather (P2/P4 style) is not implemented.
    n, h, w, c = x.shape
    ho, wo = offsets.shape[1], offsets.shape[2]
    kk = kh * kw
    off = offsets.astype(jnp.float32).reshape(n, ho, wo, kk, 2)  # (dy, dx)/tap
    dy, dx = off[..., 0], off[..., 1]
    base_h = jnp.arange(ho, dtype=jnp.float32) * stride - pad
    base_w = jnp.arange(wo, dtype=jnp.float32) * stride - pad
    tap_h = jnp.repeat(jnp.arange(kh, dtype=jnp.float32), kw)
    tap_w = jnp.tile(jnp.arange(kw, dtype=jnp.float32), kh)
    ph = base_h[None, :, None, None] + tap_h[None, None, None, :] + dy
    pw = base_w[None, None, :, None] + tap_w[None, None, None, :] + dx
    h0 = jnp.floor(ph)
    w0 = jnp.floor(pw)
    lh = ph - h0
    lw = pw - w0

    # 4 bilinear corners, ONE gather over concatenated indices.
    ch = jnp.stack([h0, h0, h0 + 1, h0 + 1], axis=0)        # (4,n,ho,wo,kk)
    cw = jnp.stack([w0, w0 + 1, w0, w0 + 1], axis=0)
    valid = (ch >= 0) & (ch <= h - 1) & (cw >= 0) & (cw <= w - 1)
    hi = jnp.clip(ch, 0, h - 1).astype(jnp.int32)
    wi = jnp.clip(cw, 0, w - 1).astype(jnp.int32)
    idx = (hi * w + wi).transpose(1, 0, 2, 3, 4).reshape(n, 4 * ho * wo * kk)
    flat = x.reshape(n, h * w, c)
    g = flat[jnp.arange(n)[:, None], idx].reshape(n, 4, ho, wo, kk, c)
    g = g * valid.transpose(1, 0, 2, 3, 4)[..., None].astype(x.dtype)
    wts = jnp.stack([(1 - lh) * (1 - lw), (1 - lh) * lw,
                     lh * (1 - lw), lh * lw], axis=1)        # (n,4,ho,wo,kk) f32
    samp = jnp.sum(g * wts[..., None], axis=1)               # f32 weighting
    return samp.reshape(n, ho, wo, kk * c).astype(out_dtype)


# ---------------------------------------------------------------------------
# DeformableBottleneck forward
# ---------------------------------------------------------------------------
def forward(params, x_nchw, stride):
    x = jnp.transpose(x_nchw, (0, 2, 3, 1)).astype(jnp.float32)   # NCHW -> NHWC
    n = x.shape[0]

    # conv1 (1x1, no bias) + bn1 + relu  -> bf16 activation
    act = conv1x1_bn_act(x, params['w1'], params['bn1'], relu=True,
                         out_dtype=jnp.bfloat16)

    # offset_conv (3x3, stride, pad=1, bias=True)  -> f32 offsets
    offset = conv3x3_bias(act, params['w_off'], params['b_off'], stride)

    # deformable sampling columns (bf16)
    cols = deform_im2col(act, offset, stride, 1)
    _, ho, wo, kc = cols.shape

    # identity path (optional 1x1 downsample + BN)
    cout3 = params['w3'].shape[0]
    if params['down'] is not None:
        identity = conv1x1_bn_act(x, params['down']['w'], params['down']['bn'],
                                  relu=False, stride=stride,
                                  out_dtype=jnp.float32)
    else:
        identity = x
    res = identity.reshape(n * ho * wo, cout3)

    # fused: deform_conv + bn2 + relu + conv3 + bn3 + residual + relu
    width = params['w2'].shape[0]
    scale2, shift2 = _fold_bn(params['bn2'], None, width)
    w2 = jnp.transpose(params['w2'], (2, 3, 1, 0)).reshape(kc, width)
    scale3, shift3 = _fold_bn(params['bn3'], None, cout3)
    w3 = params['w3'].reshape(cout3, width).T
    out = deform_conv3_fused(cols.reshape(n * ho * wo, kc),
                             w2 * scale2[None, :], shift2,
                             w3 * scale3[None, :], shift3, res)
    out = out.reshape(n, ho, wo, cout3)
    return jnp.transpose(out, (0, 3, 1, 2))                       # NHWC -> NCHW


# ---------------------------------------------------------------------------
# Parameters (deterministic; BN buffers / offset conv exactly as in __init__)
# ---------------------------------------------------------------------------
def _conv_w(key, cout, cin, kh, kw):
    fan_in = cin * kh * kw
    return jax.random.normal(key, (cout, cin, kh, kw),
                             jnp.float32) * (2.0 / fan_in) ** 0.5


def _bn_params(c):
    # (gamma, beta, running_mean, running_var) at __init__ values.
    return (jnp.ones((c,), jnp.float32), jnp.zeros((c,), jnp.float32),
            jnp.zeros((c,), jnp.float32), jnp.ones((c,), jnp.float32))


def init_params(key, inplanes, planes, with_downsample=False):
    width = planes
    k1, k2, k3, k4 = jax.random.split(key, 4)
    return {
        'w1': _conv_w(k1, width, inplanes, 1, 1),
        'bn1': _bn_params(width),
        # offset_conv weights and bias are constant zero, exactly as in __init__.
        'w_off': jnp.zeros((2 * 3 * 3, width, 3, 3), jnp.float32),
        'b_off': jnp.zeros((2 * 3 * 3,), jnp.float32),
        'w2': _conv_w(k2, width, width, 3, 3),
        'bn2': _bn_params(width),
        'w3': _conv_w(k3, planes * 4, width, 1, 1),
        'bn3': _bn_params(planes * 4),
        'down': ({'w': _conv_w(k4, planes * 4, inplanes, 1, 1),
                  'bn': _bn_params(planes * 4)} if with_downsample else None),
    }


if __name__ == "__main__":
    key = jax.random.PRNGKey(0)
    kp, kx = jax.random.split(key)
    batch, inplanes, planes, hw, stride = 2, 64, 16, 16, 1   # inplanes=planes*4
    params = init_params(kp, inplanes, planes, with_downsample=False)
    x = jax.random.normal(kx, (batch, inplanes, hw, hw), jnp.float32)  # NCHW
    fwd = jax.jit(forward, static_argnames=("stride",))
    out = jax.block_until_ready(fwd(params, x, stride=stride))
    assert out.shape == (batch, planes * 4, hw, hw), out.shape
    assert bool(jnp.all(jnp.isfinite(out)))
    print("KERNEL_OK")
</pallas_src>

<mosaic_0001>
module attributes {stable_mosaic.version = 11 : i64} {
  func.func @_mm_kernel(%arg0: i32, %arg1: memref<512x64xbf16, #tpu.memory_space<vmem>>, %arg2: memref<64x16xbf16, #tpu.memory_space<vmem>>, %arg3: memref<1x16xf32, #tpu.memory_space<vmem>>, %arg4: memref<512x16xbf16, #tpu.memory_space<vmem>>) attributes {dimension_semantics = [#tpu.dimension_semantics<parallel>], iteration_bounds = array<i64: 1>, scalar_prefetch = 0 : i64, scratch_operands = 0 : i64, tpu.core_type = #tpu.core_type<tc>, window_params = [{transform_indices = @transform_0, window_bounds = array<i64: 512, 64>}, {pipeline_mode = #tpu.pipeline_mode<synchronous>, transform_indices = @transform_1, window_bounds = array<i64: 64, 16>}, {pipeline_mode = #tpu.pipeline_mode<synchronous>, transform_indices = @transform_2, window_bounds = array<i64: 1, 16>}, {transform_indices = @transform_3, window_bounds = array<i64: 512, 16>}]} {
    %c0 = arith.constant 0 : index
    %c0_0 = arith.constant 0 : index
    %0 = vector.load %arg1[%c0, %c0_0] : memref<512x64xbf16, #tpu.memory_space<vmem>>, vector<512x64xbf16>
    %c0_1 = arith.constant 0 : index
    %c0_2 = arith.constant 0 : index
    %1 = vector.load %arg2[%c0_1, %c0_2] : memref<64x16xbf16, #tpu.memory_space<vmem>>, vector<64x16xbf16>
    %cst = arith.constant dense<0.000000e+00> : vector<512x16xf32>
    %2 = tpu.matmul %0, %1, %cst {dimension_numbers = #tpu.dot_dimension_numbers<[1], [0], [0], [1], [0, 0, 1, 1], [], []>} : vector<512x64xbf16>, vector<64x16xbf16>, vector<512x16xf32> -> vector<512x16xf32>
    %c0_3 = arith.constant 0 : index
    %c0_4 = arith.constant 0 : index
    %3 = vector.load %arg3[%c0_3, %c0_4] : memref<1x16xf32, #tpu.memory_space<vmem>>, vector<1x16xf32>
    %4 = vector.broadcast %3 : vector<1x16xf32> to vector<512x16xf32>
    %5 = arith.addf %2, %4 : vector<512x16xf32>
    %cst_5 = arith.constant 0.000000e+00 : f32
    %6 = vector.broadcast %cst_5 : f32 to vector<512x16xf32>
    %7 = arith.maximumf %5, %6 : vector<512x16xf32>
    %8 = arith.truncf %7 : vector<512x16xf32> to vector<512x16xbf16>
    %c0_6 = arith.constant 0 : index
    %c0_7 = arith.constant 0 : index
    %9 = vector.load %arg4[%c0_6, %c0_7] : memref<512x16xbf16, #tpu.memory_space<vmem>>, vector<512x16xbf16>
    tpu.vector_store %arg4[%c0_6, %c0_7], %8 {strides = array<i32>} : memref<512x16xbf16, #tpu.memory_space<vmem>>, vector<512x16xbf16>,
    return
  }
  func.func @transform_0(%arg0: i32) -> (i32, i32) {
    %c0_i32 = arith.constant 0 : i32
    %c0_i32_0 = arith.constant 0 : i32
    return %arg0, %c0_i32 : i32, i32
  }
  func.func @transform_1(%arg0: i32) -> (i32, i32) {
    %c0_i32 = arith.constant 0 : i32
    %c0_i32_0 = arith.constant 0 : i32
    %c0_i32_1 = arith.constant 0 : i32
    return %c0_i32, %c0_i32_0 : i32, i32
  }
  func.func @transform_2(%arg0: i32) -> (i32, i32) {
    %c0_i32 = arith.constant 0 : i32
    %c0_i32_0 = arith.constant 0 : i32
    %c0_i32_1 = arith.constant 0 : i32
    return %c0_i32, %c0_i32_0 : i32, i32
  }
  func.func @transform_3(%arg0: i32) -> (i32, i32) {
    %c0_i32 = arith.constant 0 : i32
    %c0_i32_0 = arith.constant 0 : i32
    return %arg0, %c0_i32 : i32, i32
  }
}

module attributes {stable_mosaic.version = 11 : i64} {
  func.func @_mm_kernel(%arg0: i32, %arg1: memref<512x144xbf16, #tpu.memory_space<vmem>>, %arg2: memref<144x18xbf16, #tpu.memory_space<vmem>>, %arg3: memref<1x18xf32, #tpu.memory_space<vmem>>, %arg4: memref<512x18xf32, #tpu.memory_space<vmem>>) attributes {dimension_semantics = [#tpu.dimension_semantics<parallel>], iteration_bounds = array<i64: 1>, scalar_prefetch = 0 : i64, scratch_operands = 0 : i64, tpu.core_type = #tpu.core_type<tc>, window_params = [{transform_indices = @transform_0, window_bounds = array<i64: 512, 144>}, {pipeline_mode = #tpu.pipeline_mode<synchronous>, transform_indices = @transform_1, window_bounds = array<i64: 144, 18>}, {pipeline_mode = #tpu.pipeline_mode<synchronous>, transform_indices = @transform_2, window_bounds = array<i64: 1, 18>}, {transform_indices = @transform_3, window_bounds = array<i64: 512, 18>}]} {
    %c0 = arith.constant 0 : index
    %c0_0 = arith.constant 0 : index
    %0 = vector.load %arg1[%c0, %c0_0] : memref<512x144xbf16, #tpu.memory_space<vmem>>, vector<512x144xbf16>
    %c0_1 = arith.constant 0 : index
    %c0_2 = arith.constant 0 : index
    %1 = vector.load %arg2[%c0_1, %c0_2] : memref<144x18xbf16, #tpu.memory_space<vmem>>, vector<144x18xbf16>
    %cst = arith.constant dense<0.000000e+00> : vector<512x18xf32>
    %2 = tpu.matmul %0, %1, %cst {dimension_numbers = #tpu.dot_dimension_numbers<[1], [0], [0], [1], [0, 0, 1, 1], [], []>} : vector<512x144xbf16>, vector<144x18xbf16>, vector<512x18xf32> -> vector<512x18xf32>
    %c0_3 = arith.constant 0 : index
    %c0_4 = arith.constant 0 : index
    %3 = vector.load %arg3[%c0_3, %c0_4] : memref<1x18xf32, #tpu.memory_space<vmem>>, vector<1x18xf32>
    %4 = vector.broadcast %3 : vector<1x18xf32> to vector<512x18xf32>
    %5 = arith.addf %2, %4 : vector<512x18xf32>
    %c0_5 = arith.constant 0 : index
    %c0_6 = arith.constant 0 : index
    %6 = vector.load %arg4[%c0_5, %c0_6] : memref<512x18xf32, #tpu.memory_space<vmem>>, vector<512x18xf32>
    tpu.vector_store %arg4[%c0_5, %c0_6], %5 {strides = array<i32>} : memref<512x18xf32, #tpu.memory_space<vmem>>, vector<512x18xf32>,
    return
  }
  func.func @transform_0(%arg0: i32) -> (i32, i32) {
    %c0_i32 = arith.constant 0 : i32
    %c0_i32_0 = arith.constant 0 : i32
    return %arg0, %c0_i32 : i32, i32
  }
  func.func @transform_1(%arg0: i32) -> (i32, i32) {
    %c0_i32 = arith.constant 0 : i32
    %c0_i32_0 = arith.constant 0 : i32
    %c0_i32_1 = arith.constant 0 : i32
    return %c0_i32, %c0_i32_0 : i32, i32
  }
  func.func @transform_2(%arg0: i32) -> (i32, i32) {
    %c0_i32 = arith.constant 0 : i32
    %c0_i32_0 = arith.constant 0 : i32
    %c0_i32_1 = arith.constant 0 : i32
    return %c0_i32, %c0_i32_0 : i32, i32
  }
  func.func @transform_3(%arg0: i32) -> (i32, i32) {
    %c0_i32 = arith.constant 0 : i32
    %c0_i32_0 = arith.constant 0 : i32
    return %arg0, %c0_i32 : i32, i32
  }
}

module attributes {stable_mosaic.version = 11 : i64} {
  func.func @_deform_conv3_kernel(%arg0: i32, %arg1: memref<512x144xbf16, #tpu.memory_space<vmem>>, %arg2: memref<144x16xbf16, #tpu.memory_space<vmem>>, %arg3: memref<1x16xf32, #tpu.memory_space<vmem>>, %arg4: memref<16x64xbf16, #tpu.memory_space<vmem>>, %arg5: memref<1x64xf32, #tpu.memory_space<vmem>>, %arg6: memref<512x64xf32, #tpu.memory_space<vmem>>, %arg7: memref<512x64xf32, #tpu.memory_space<vmem>>) attributes {dimension_semantics = [#tpu.dimension_semantics<parallel>], iteration_bounds = array<i64: 1>, scalar_prefetch = 0 : i64, scratch_operands = 0 : i64, tpu.core_type = #tpu.core_type<tc>, window_params = [{transform_indices = @transform_0, window_bounds = array<i64: 512, 144>}, {pipeline_mode = #tpu.pipeline_mode<synchronous>, transform_indices = @transform_1, window_bounds = array<i64: 144, 16>}, {pipeline_mode = #tpu.pipeline_mode<synchronous>, transform_indices = @transform_2, window_bounds = array<i64: 1, 16>}, {pipeline_mode = #tpu.pipeline_mode<synchronous>, transform_indices = @transform_3, window_bounds = array<i64: 16, 64>}, {pipeline_mode = #tpu.pipeline_mode<synchronous>, transform_indices = @transform_4, window_bounds = array<i64: 1, 64>}, {transform_indices = @transform_5, window_bounds = array<i64: 512, 64>}, {transform_indices = @transform_6, window_bounds = array<i64: 512, 64>}]} {
    %c0 = arith.constant 0 : index
    %c0_0 = arith.constant 0 : index
    %0 = vector.load %arg1[%c0, %c0_0] : memref<512x144xbf16, #tpu.memory_space<vmem>>, vector<512x144xbf16>
    %c0_1 = arith.constant 0 : index
    %c0_2 = arith.constant 0 : index
    %1 = vector.load %arg2[%c0_1, %c0_2] : memref<144x16xbf16, #tpu.memory_space<vmem>>, vector<144x16xbf16>
    %cst = arith.constant dense<0.000000e+00> : vector<512x16xf32>
    %2 = tpu.matmul %0, %1, %cst {dimension_numbers = #tpu.dot_dimension_numbers<[1], [0], [0], [1], [0, 0, 1, 1], [], []>} : vector<512x144xbf16>, vector<144x16xbf16>, vector<512x16xf32> -> vector<512x16xf32>
    %c0_3 = arith.constant 0 : index
    %c0_4 = arith.constant 0 : index
    %3 = vector.load %arg3[%c0_3, %c0_4] : memref<1x16xf32, #tpu.memory_space<vmem>>, vector<1x16xf32>
    %4 = vector.broadcast %3 : vector<1x16xf32> to vector<512x16xf32>
    %5 = arith.addf %2, %4 : vector<512x16xf32>
    %cst_5 = arith.constant 0.000000e+00 : f32
    %6 = vector.broadcast %cst_5 : f32 to vector<512x16xf32>
    %7 = arith.maximumf %5, %6 : vector<512x16xf32>
    %8 = arith.truncf %7 : vector<512x16xf32> to vector<512x16xbf16>
    %c0_6 = arith.constant 0 : index
    %c0_7 = arith.constant 0 : index
    %9 = vector.load %arg4[%c0_6, %c0_7] : memref<16x64xbf16, #tpu.memory_space<vmem>>, vector<16x64xbf16>
    %cst_8 = arith.constant dense<0.000000e+00> : vector<512x64xf32>
    %10 = tpu.matmul %8, %9, %cst_8 {dimension_numbers = #tpu.dot_dimension_numbers<[1], [0], [0], [1], [0, 0, 1, 1], [], []>} : vector<512x16xbf16>, vector<16x64xbf16>, vector<512x64xf32> -> vector<512x64xf32>
    %c0_9 = arith.constant 0 : index
    %c0_10 = arith.constant 0 : index
    %11 = vector.load %arg5[%c0_9, %c0_10] : memref<1x64xf32, #tpu.memory_space<vmem>>, vector<1x64xf32>
    %12 = vector.broadcast %11 : vector<1x64xf32> to vector<512x64xf32>
    %13 = arith.addf %10, %12 : vector<512x64xf32>
    %c0_11 = arith.constant 0 : index
    %c0_12 = arith.constant 0 : index
    %14 = vector.load %arg6[%c0_11, %c0_12] : memref<512x64xf32, #tpu.memory_space<vmem>>, vector<512x64xf32>
    %15 = arith.addf %13, %14 : vector<512x64xf32>
    %cst_13 = arith.constant 0.000000e+00 : f32
    %16 = vector.broadcast %cst_13 : f32 to vector<512x64xf32>
    %17 = arith.maximumf %15, %16 : vector<512x64xf32>
    %c0_14 = arith.constant 0 : index
    %c0_15 = arith.constant 0 : index
    %18 = vector.load %arg7[%c0_14, %c0_15] : memref<512x64xf32, #tpu.memory_space<vmem>>, vector<512x64xf32>
    tpu.vector_store %arg7[%c0_14, %c0_15], %17 {strides = array<i32>} : memref<512x64xf32, #tpu.memory_space<vmem>>, vector<512x64xf32>,
    return
  }
  func.func @transform_0(%arg0: i32) -> (i32, i32) {
    %c0_i32 = arith.constant 0 : i32
    %c0_i32_0 = arith.constant 0 : i32
    return %arg0, %c0_i32 : i32, i32
  }
  func.func @transform_1(%arg0: i32) -> (i32, i32) {
    %c0_i32 = arith.constant 0 : i32
    %c0_i32_0 = arith.constant 0 : i32
    %c0_i32_1 = arith.constant 0 : i32
    return %c0_i32, %c0_i32_0 : i32, i32
  }
  func.func @transform_2(%arg0: i32) -> (i32, i32) {
    %c0_i32 = arith.constant 0 : i32
    %c0_i32_0 = arith.constant 0 : i32
    %c0_i32_1 = arith.constant 0 : i32
    return %c0_i32, %c0_i32_0 : i32, i32
  }
  func.func @transform_3(%arg0: i32) -> (i32, i32) {
    %c0_i32 = arith.constant 0 : i32
    %c0_i32_0 = arith.constant 0 : i32
    %c0_i32_1 = arith.constant 0 : i32
    return %c0_i32, %c0_i32_0 : i32, i32
  }
  func.func @transform_4(%arg0: i32) -> (i32, i32) {
    %c0_i32 = arith.constant 0 : i32
    %c0_i32_0 = arith.constant 0 : i32
    %c0_i32_1 = arith.constant 0 : i32
    return %c0_i32, %c0_i32_0 : i32, i32
  }
  func.func @transform_5(%arg0: i32) -> (i32, i32) {
    %c0_i32 = arith.constant 0 : i32
    %c0_i32_0 = arith.constant 0 : i32
    return %arg0, %c0_i32 : i32, i32
  }
  func.func @transform_6(%arg0: i32) -> (i32, i32) {
    %c0_i32 = arith.constant 0 : i32
    %c0_i32_0 = arith.constant 0 : i32
    return %arg0, %c0_i32 : i32, i32
  }
}

</mosaic_0001>

<bundles_post_ra>
// kernel: forward.3
= control target key start
LH: loop header
LB: loop body
LE: loop exit
PB: predicated region body
PF: predicated region fallthrough
CT: control target
= control target key end

     0   :  { %8 = vsyncpa [#allocation3], 0  ;;  %s1808_s0 = inlined_call_operand.hbm [shape: bf16[512,64], index: 0, kind: input, shape index: {}]   ;;  %s1809_s1 = inlined_call_operand.hbm [shape: bf16[64,16], index: 1, kind: input, shape index: {}]   ;;  %s1810_s2 = inlined_call_operand.hbm [shape: f32[1,16], index: 2, kind: input, shape index: {}]   ;;  %s1811_s3 = inlined_call_operand.hbm [shape: bf16[512,16], index: 3, kind: output, shape index: {}]  }
   0x1   :  { %9 = vsyncpa [#allocation6], 0 }
   0x2   :  { %10 = vsyncpa [#allocation4], 0  ;;  %s1556_s12 = smov [#allocation5]   ;;  %s1557_s14 = smov [#allocation2]  }
   0x3   :  { %s28_s13 = sshll.u32 %s1556_s12, 4  ;;  %s16_s15 = sshll.u32 %s1557_s14, 4  ;;  %s29_s13 = int_to_ptr.vmem [resolvable:$true] %s28_s13  ;;  %s1582_s15 = int_to_ptr.vmem [resolvable:$true] %s16_s15 }
   0x4   :  { %s1462_s18 = scalar_lea.hbm %s1809_s1, 512 }
   0x5   :  { %p1463_p0 = scmp.ne.s32.totalorder %s1809_s1, %s1462_s18  ;;  %p1466_p1 = scmp.lt.u32.totalorder %s1462_s18, %s1809_s1 }
   0x7   :  { %p1468_p2 = pnand %p1466_p1, %p1463_p0 }
   0x9   :  { %1471 = shalt.err (!%p1468_p2)
}
   0xa   :  { %s1472_s23 = scalar_lea.vmem %s29_s13, 512  ;;  %p1477_p4 = scmp.lt.s32.totalorder %s29_s13, %s29_s13 }
   0xb   :  { %p1473_p3 = scmp.ne.s32.totalorder %s29_s13, %s1472_s23  ;;  %p1478_p5 = scmp.lt.s32.totalorder %s1472_s23, %s1472_s23 }
   0xd   :  { %p1479_p6 = por %p1478_p5, %p1477_p4 }
   0xf   :  { %p1480_p7 = pnand %p1479_p6, %p1473_p3 }
  0x11   :  { %1483 = shalt.err (!%p1480_p7)
}
  0x12   :  { %s1558_s24 = smov 64   ;;  %s1559_s25 = smov 4  }
  0x13   :  { %34 = dma.hbm_to_vmem [thread:$0]  %s1809_s1, 512, %s29_s13, [#allocation6], %s1558_s24, %s1558_s24, %s1559_s25  }
  0x14   :  { %s1484_s30 = scalar_lea.hbm %s1808_s0, 4096 }
  0x15   :  { %p1485_p8 = scmp.ne.s32.totalorder %s1808_s0, %s1484_s30  ;;  %p1488_p9 = scmp.lt.u32.totalorder %s1484_s30, %s1808_s0 }
  0x17   :  { %p1490_p10 = pnand %p1488_p9, %p1485_p8 }
  0x19   :  { %1493 = shalt.err (!%p1490_p10)
}
  0x1a   :  { %s1494_s8 = scalar_lea.vmem %s1582_s15, 4096  ;;  %p1499_p12 = scmp.lt.s32.totalorder %s1582_s15, %s1582_s15 }
  0x1b   :  { %p1495_p11 = scmp.ne.s32.totalorder %s1582_s15, %s1494_s8  ;;  %p1500_p13 = scmp.lt.s32.totalorder %s1494_s8, %s1494_s8 }
  0x1d   :  { %p1501_p0 = por %p1500_p13, %p1499_p12 }
  0x1f   :  { %p1502_p1 = pnand %p1501_p0, %p1495_p11 }
  0x21   :  { %1505 = shalt.err (!%p1502_p1)
}
  0x22   :  { %22 = dma.hbm_to_vmem [thread:$0]  %s1808_s0, 4096, %s1582_s15, [#allocation3], %s1558_s24, %s1558_s24, %s1559_s25  }
  0x23   :  { %s1560_s10 = smov [#allocation7]   ;;  %s1506_s14 = scalar_lea.hbm %s1810_s2, 16 }
  0x24   :  { %s41_s11 = sshll.u32 %s1560_s10, 4  ;;  %p1507_p2 = scmp.ne.s32.totalorder %s1810_s2, %s1506_s14  ;;  %s42_s11 = int_to_ptr.vmem [resolvable:$true] %s41_s11 }
  0x25   :  { %p1510_p3 = scmp.lt.u32.totalorder %s1506_s14, %s1810_s2 }
  0x27   :  { %p1512_p4 = pnand %p1510_p3, %p1507_p2 }
  0x29   :  { %1515 = shalt.err (!%p1512_p4)
}
  0x2a   :  { %s1516_s20 = scalar_lea.vmem %s42_s11, 16  ;;  %s1520_s0 = scalar_lea.vmem %s42_s11, 32 }
  0x2b   :  { %p1517_p5 = scmp.ne.s32.totalorder %s42_s11, %s1516_s20  ;;  %p1521_p6 = scmp.lt.s32.totalorder %s42_s11, %s42_s11 }
  0x2c   :  { %p1522_p7 = scmp.lt.s32.totalorder %s1520_s0, %s1516_s20 }
  0x2e   :  { %p1523_p8 = por %p1522_p7, %p1521_p6 }
  0x30   :  { %p1524_p9 = pnand %p1523_p8, %p1517_p5 }
  0x32   :  { %1527 = shalt.err (!%p1524_p9)
}
  0x33   :  { %44 = dma.hbm_to_vmem [thread:$0]  %s1810_s2, 16, %s42_s11, [#allocation6]  }
  0x34   :  { %1550 = dma.done.wait [#allocation3], 4096  }
  0x35   :  { %1551 = vsyncadd [#allocation3], 4294963200 }
  0x36   :  { %1552 = dma.done.wait [#allocation6], 528  }
  0x37   :  { %1553 = vsyncadd [#allocation6], 4294966768  ;;  %v1426_v0 = vld [vmem:[#allocation5] sm:$0xff]   ;;  %v1427_v1 = vld [vmem:[#allocation5 + $0x8] sm:$0xff]   ;;  %vm318_vm0 = vcmask 523264   ;;  %vm1024_vm1 = vcmask 125952  }
  0x38   :  { %1340 = vmatprep.subr.bf16.mxu0 %v1426_v0  ;;  %1412 = vmatprep.subr.bf16.mxu1 %v1426_v0  ;;  %v1428_v2 = vld [vmem:[#allocation5 + $0x10] sm:$0xff]   ;;  %v1430_v3 = vld [vmem:[#allocation2] sm:$0xff]   ;;  %v1429_v5 = vld [vmem:[#allocation5 + $0x18] sm:$0xff]   ;;  %s1561_s2 = smov [#allocation8]  }
  0x39   :  { %1341 = vmatpush3.bf16.msra.mxu0 %v1426_v0  ;;  %1416 = vmatpush3.bf16.msra.mxu1 %v1426_v0  ;;  %v1431_v4 = vld [vmem:[#allocation2 + $0x80] sm:$0xff]   ;;  %v1432_v6 = vld [vmem:[#allocation2 + $0x8] sm:$0xff]   ;;  %v1434_v8 = vld [vmem:[#allocation2 + $0x10] sm:$0xff]   ;;  %s1094_s22 = sshll.u32 %s1561_s2, 4  ;;  %s1095_s22 = int_to_ptr.vmem [resolvable:$true] %s1094_s22 }
  0x3a   :  { %1342 = vmatprep.subr.bf16.mxu0 %v1427_v1  ;;  %1413 = vmatprep.subr.bf16.mxu1 %v1427_v1  ;;  %v1433_v7 = vld [vmem:[#allocation2 + $0x88] sm:$0xff]   ;;  %v1435_v9 = vld [vmem:[#allocation2 + $0x90] sm:$0xff]   ;;  %v1436_v10 = vld [vmem:[#allocation2 + $0x18] sm:$0xff]   ;;  %s1528_s23 = scalar_lea.vmem %s1095_s22, 4096  ;;  %p1533_p11 = scmp.lt.s32.totalorder %s1095_s22, %s1095_s22 }
  0x3b   :  { %1348 = vmatprep.mubr.msk.bf16.mxu0 %vm318_vm0, %v1430_v3  ;;  %1380 = vmatprep.mubr.msk.bf16.mxu1 %vm318_vm0, %v1431_v4  ;;  %v1437_v11 = vld [vmem:[#allocation2 + $0x98] sm:$0xff]   ;;  %v1438_v12 = vld [vmem:[#allocation2 + $0x20] sm:$0xff]   ;;  %v1440_v14 = vld [vmem:[#allocation2 + $0x28] sm:$0xff]   ;;  %p1529_p10 = scmp.ne.s32.totalorder %s1095_s22, %s1528_s23  ;;  %p1534_p12 = scmp.lt.s32.totalorder %s1528_s23, %s1528_s23 }
  0x3c   :  { %v1439_v13 = vld [vmem:[#allocation2 + $0xa0] sm:$0xff]   ;;  %v1441_v15 = vld [vmem:[#allocation2 + $0xa8] sm:$0xff]   ;;  %v1442_v16 = vld [vmem:[#allocation2 + $0x30] sm:$0xff]  }
  0x3d   :  { %1343 = vmatpush3.bf16.msra.mxu0 %v1427_v1  ;;  %1417 = vmatpush3.bf16.msra.mxu1 %v1427_v1  ;;  %v1443_v17 = vld [vmem:[#allocation2 + $0xb0] sm:$0xff]   ;;  %v1444_v18 = vld [vmem:[#allocation2 + $0x38] sm:$0xff]   ;;  %v1446_v20 = vld [vmem:[#allocation2 + $0x40] sm:$0xff]   ;;  %p1535_p13 = por %p1534_p12, %p1533_p11 }
  0x3e   :  { %1344 = vmatprep.subr.bf16.mxu0 %v1428_v2  ;;  %1414 = vmatprep.subr.bf16.mxu1 %v1428_v2  ;;  %v1445_v19 = vld [vmem:[#allocation2 + $0xb8] sm:$0xff]   ;;  %v1447_v21 = vld [vmem:[#allocation2 + $0xc0] sm:$0xff]   ;;  %v1448_v22 = vld [vmem:[#allocation2 + $0x48] sm:$0xff]  }
  0x3f   :  { %v1449_v23 = vld [vmem:[#allocation2 + $0xc8] sm:$0xff]   ;;  %v1450_v24 = vld [vmem:[#allocation2 + $0x50] sm:$0xff]   ;;  %v1452_v26 = vld [vmem:[#allocation2 + $0x58] sm:$0xff]   ;;  %p1536_p0 = pnand %p1535_p13, %p1529_p10 }
  0x40   :  { %v1451_v25 = vld [vmem:[#allocation2 + $0xd0] sm:$0xff]   ;;  %v1453_v27 = vld [vmem:[#allocation2 + $0xd8] sm:$0xff]   ;;  %v1454_v28 = vld [vmem:[#allocation2 + $0x60] sm:$0xff]  }
  0x41   :  { %1345 = vmatpush3.bf16.msra.mxu0 %v1428_v2  ;;  %1418 = vmatpush3.bf16.msra.mxu1 %v1428_v2  ;;  %v1455_v29 = vld [vmem:[#allocation2 + $0xe0] sm:$0xff]   ;;  %v1456_v30 = vld [vmem:[#allocation2 + $0x68] sm:$0xff]   ;;  %v1458_v32 = vld [vmem:[#allocation2 + $0x70] sm:$0xff]  }
  0x42   :  { %1346 = vmatprep.subr.bf16.mxu0 %v1429_v5  ;;  %1415 = vmatprep.subr.bf16.mxu1 %v1429_v5  ;;  %v1457_v31 = vld [vmem:[#allocation2 + $0xe8] sm:$0xff]   ;;  %v1459_v33 = vld [vmem:[#allocation2 + $0xf0] sm:$0xff]   ;;  %v1460_v34 = vld [vmem:[#allocation2 + $0x78] sm:$0xff]  }
  0x43   :  { %v1461_v35 = vld [vmem:[#allocation2 + $0xf8] sm:$0xff]   ;;  %v1663_v36 = vld [vmem:[#allocation7] ss:$0 sm:$0xff] }
  0x45   :  { %1347 = vmatpush3.bf16.msra.mxu0 %v1429_v5  ;;  %1419 = vmatpush3.bf16.msra.mxu1 %v1429_v5 }
  0x48   :  { %1349 = vmatmul.mubr.msk.bf16.vlgmr.msra.gmra.mrb[0].mxu0 %vm318_vm0, %v1432_v6  ;;  %1381 = vmatmul.mubr.msk.bf16.vlgmr.msra.gmra.mrb[0].mxu1 %vm318_vm0, %v1433_v7 }
  0x49   :  { %1352 = vmatprep.mubr.msk.bf16.mxu0 %vm318_vm0, %v1434_v8  ;;  %1384 = vmatprep.mubr.msk.bf16.mxu1 %vm318_vm0, %v1435_v9 }
  0x50   :  { %1353 = vmatmul.mubr.msk.bf16.gmra.mrb[4].mxu0 %vm318_vm0, %v1436_v10  ;;  %1385 = vmatmul.mubr.msk.bf16.gmra.mrb[4].mxu1 %vm318_vm0, %v1437_v11 }
  0x51   :  { %1356 = vmatprep.mubr.msk.bf16.mxu0 %vm318_vm0, %v1438_v12  ;;  %1388 = vmatprep.mubr.msk.bf16.mxu1 %vm318_vm0, %v1439_v13 }
  0x58   :  { %1357 = vmatmul.mubr.msk.bf16.gmra.mrb[8].mxu0 %vm318_vm0, %v1440_v14  ;;  %1389 = vmatmul.mubr.msk.bf16.gmra.mrb[8].mxu1 %vm318_vm0, %v1441_v15 }
  0x59   :  { %1360 = vmatprep.mubr.msk.bf16.mxu0 %vm318_vm0, %v1442_v16  ;;  %1392 = vmatprep.mubr.msk.bf16.mxu1 %vm318_vm0, %v1443_v17 }
  0x60   :  { %1361 = vmatmul.mubr.msk.bf16.gmra.mrb[12].mxu0 %vm318_vm0, %v1444_v18  ;;  %1393 = vmatmul.mubr.msk.bf16.gmra.mrb[12].mxu1 %vm318_vm0, %v1445_v19 }
  0x61   :  { %1364 = vmatprep.mubr.msk.bf16.mxu0 %vm318_vm0, %v1446_v20  ;;  %1396 = vmatprep.mubr.msk.bf16.mxu1 %vm318_vm0, %v1447_v21 }
  0x68   :  { %1365 = vmatmul.mubr.msk.bf16.gmra.mrb[16].mxu0 %vm318_vm0, %v1448_v22  ;;  %1397 = vmatmul.mubr.msk.bf16.gmra.mrb[16].mxu1 %vm318_vm0, %v1449_v23 }
  0x69   :  { %1368 = vmatprep.mubr.msk.bf16.mxu0 %vm318_vm0, %v1450_v24  ;;  %1400 = vmatprep.mubr.msk.bf16.mxu1 %vm318_vm0, %v1451_v25 }
  0x70   :  { %1369 = vmatmul.mubr.msk.bf16.gmra.mrb[20].mxu0 %vm318_vm0, %v1452_v26  ;;  %1401 = vmatmul.mubr.msk.bf16.gmra.mrb[20].mxu1 %vm318_vm0, %v1453_v27 }
  0x71   :  { %1372 = vmatprep.mubr.msk.bf16.mxu0 %vm318_vm0, %v1454_v28  ;;  %1404 = vmatprep.mubr.msk.bf16.mxu1 %vm318_vm0, %v1455_v29 }
  0x78   :  { %1373 = vmatmul.mubr.msk.bf16.gmra.mrb[24].mxu0 %vm318_vm0, %v1456_v30  ;;  %1405 = vmatmul.mubr.msk.bf16.gmra.mrb[24].mxu1 %vm318_vm0, %v1457_v31 }
  0x79   :  { %1376 = vmatprep.mubr.msk.bf16.mxu0 %vm318_vm0, %v1458_v32  ;;  %1408 = vmatprep.mubr.msk.bf16.mxu1 %vm318_vm0, %v1459_v33 }
  0x80   :  { %1377 = vmatmul.mubr.msk.bf16.gmra.mrb[28].mxu0 %vm318_vm0, %v1460_v34  ;;  %1409 = vmatmul.mubr.msk.bf16.gmra.mrb[28].mxu1 %vm318_vm0, %v1461_v35 }
 0x11b   :  { %v1350_v37 = vpop.f32.mrb[0].mxu0  ;;  %v1382_v38 = vpop.f32.mrb[0].mxu1 }
 0x11c   :  { %v458_v39 = vadd.f32 %v1350_v37, %v1663_v36  ;;  %v586_v40 = vadd.f32 %v1382_v38, %v1663_v36  ;;  %v449_v41 = vpop.f32.mrb[1].mxu0  ;;  %v577_v42 = vpop.f32.mrb[1].mxu1 }
 0x11d   :  { %v450_v43 = vadd.f32 %v1663_v36, %v449_v41  ;;  %v578_v44 = vadd.f32 %v1663_v36, %v577_v42  ;;  %v1351_v45 = vpop.f32.mrb[2].mxu0  ;;  %v1383_v46 = vpop.f32.mrb[2].mxu1 }
 0x11e   :  { %v706_v47 = vmax.f32 %v458_v39, 0.0  ;;  %v738_v48 = vmax.f32 %v586_v40, 0.0  ;;  %v461_v49 = vadd.f32 %v1351_v45, %v1663_v36  ;;  %v589_v50 = vadd.f32 %v1383_v46, %v1663_v36  ;;  %v452_v51 = vpop.f32.mrb[3].mxu0  ;;  %v580_v52 = vpop.f32.mrb[3].mxu1 }
 0x11f   :  { %v704_v53 = vmax.f32 %v450_v43, 0.0  ;;  %v736_v54 = vmax.f32 %v578_v44, 0.0  ;;  %v453_v55 = vadd.f32 %v1663_v36, %v452_v51  ;;  %v581_v56 = vadd.f32 %v1663_v36, %v580_v52 }
 0x120   :  { %v1242_v57 = vpack.c.bf16 %v706_v47, %v706_v47  ;;  %v1274_v58 = vpack.c.bf16 %v738_v48, %v738_v48  ;;  %v707_v59 = vmax.f32 %v461_v49, 0.0  ;;  %v739_v60 = vmax.f32 %v589_v50, 0.0 }
 0x121   :  { %v1240_v61 = vpack.c.bf16 %v704_v53, %v704_v53  ;;  %v1272_v62 = vpack.c.bf16 %v736_v54, %v736_v54  ;;  %v705_v63 = vmax.f32 %v453_v55, 0.0  ;;  %v737_v0 = vmax.f32 %v581_v56, 0.0 }
 0x122   :  { %1027 = vst.msk [vmem:[#allocation8 + $0x8] sm:$0xf] %vm1024_vm1, %v1242_v57  ;;  %1059 = vst.msk [vmem:[#allocation8 + $0x88] sm:$0xf] %vm1024_vm1, %v1274_v58  ;;  %v1243_v1 = vpack.c.bf16 %v707_v59, %v707_v59  ;;  %v1275_v2 = vpack.c.bf16 %v739_v60, %v739_v60 }
 0x123   :  { %1025 = vst.msk [vmem:[#allocation8] sm:$0xf] %vm1024_vm1, %v1240_v61  ;;  %1057 = vst.msk [vmem:[#allocation8 + $0x80] sm:$0xf] %vm1024_vm1, %v1272_v62  ;;  %v1241_v3 = vpack.c.bf16 %v705_v63, %v705_v63  ;;  %v1273_v4 = vpack.c.bf16 %v737_v0, %v737_v0  ;;  %v1354_v5 = vpop.f32.mrb[4].mxu0  ;;  %v1386_v6 = vpop.f32.mrb[4].mxu1 }
 0x124   :  { %1028 = vst.msk [vmem:[#allocation8 + $0xc] sm:$0xf] %vm1024_vm1, %v1243_v1  ;;  %1060 = vst.msk [vmem:[#allocation8 + $0x8c] sm:$0xf] %vm1024_vm1, %v1275_v2  ;;  %v474_v7 = vadd.f32 %v1354_v5, %v1663_v36  ;;  %v602_v8 = vadd.f32 %v1386_v6, %v1663_v36  ;;  %v465_v9 = vpop.f32.mrb[5].mxu0  ;;  %v593_v10 = vpop.f32.mrb[5].mxu1 }
 0x125   :  { %1026 = vst.msk [vmem:[#allocation8 + $0x4] sm:$0xf] %vm1024_vm1, %v1241_v3  ;;  %1058 = vst.msk [vmem:[#allocation8 + $0x84] sm:$0xf] %vm1024_vm1, %v1273_v4  ;;  %v466_v11 = vadd.f32 %v1663_v36, %v465_v9  ;;  %v594_v12 = vadd.f32 %v1663_v36, %v593_v10  ;;  %v1355_v13 = vpop.f32.mrb[6].mxu0  ;;  %v1387_v14 = vpop.f32.mrb[6].mxu1 }
 0x126   :  { %v710_v15 = vmax.f32 %v474_v7, 0.0  ;;  %v742_v16 = vmax.f32 %v602_v8, 0.0  ;;  %v477_v17 = vadd.f32 %v1355_v13, %v1663_v36  ;;  %v605_v18 = vadd.f32 %v1387_v14, %v1663_v36  ;;  %v468_v19 = vpop.f32.mrb[7].mxu0  ;;  %v596_v20 = vpop.f32.mrb[7].mxu1 }
 0x127   :  { %v708_v21 = vmax.f32 %v466_v11, 0.0  ;;  %v740_v22 = vmax.f32 %v594_v12, 0.0  ;;  %v469_v23 = vadd.f32 %v1663_v36, %v468_v19  ;;  %v597_v24 = vadd.f32 %v1663_v36, %v596_v20 }
 0x128   :  { %v1246_v25 = vpack.c.bf16 %v710_v15, %v710_v15  ;;  %v1278_v26 = vpack.c.bf16 %v742_v16, %v742_v16  ;;  %v711_v27 = vmax.f32 %v477_v17, 0.0  ;;  %v743_v28 = vmax.f32 %v605_v18, 0.0 }
 0x129   :  { %v1244_v29 = vpack.c.bf16 %v708_v21, %v708_v21  ;;  %v1276_v30 = vpack.c.bf16 %v740_v22, %v740_v22  ;;  %v709_v31 = vmax.f32 %v469_v23, 0.0  ;;  %v741_v32 = vmax.f32 %v597_v24, 0.0 }
 0x12a   :  { %1031 = vst.msk [vmem:[#allocation8 + $0x18] sm:$0xf] %vm1024_vm1, %v1246_v25  ;;  %1063 = vst.msk [vmem:[#allocation8 + $0x98] sm:$0xf] %vm1024_vm1, %v1278_v26  ;;  %v1247_v33 = vpack.c.bf16 %v711_v27, %v711_v27  ;;  %v1279_v34 = vpack.c.bf16 %v743_v28, %v743_v28 }
 0x12b   :  { %1029 = vst.msk [vmem:[#allocation8 + $0x10] sm:$0xf] %vm1024_vm1, %v1244_v29  ;;  %1061 = vst.msk [vmem:[#allocation8 + $0x90] sm:$0xf] %vm1024_vm1, %v1276_v30  ;;  %v1245_v35 = vpack.c.bf16 %v709_v31, %v709_v31  ;;  %v1277_v37 = vpack.c.bf16 %v741_v32, %v741_v32  ;;  %v1358_v38 = vpop.f32.mrb[8].mxu0  ;;  %v1390_v39 = vpop.f32.mrb[8].mxu1 }
 0x12c   :  { %1032 = vst.msk [vmem:[#allocation8 + $0x1c] sm:$0xf] %vm1024_vm1, %v1247_v33  ;;  %1064 = vst.msk [vmem:[#allocation8 + $0x9c] sm:$0xf] %vm1024_vm1, %v1279_v34  ;;  %v490_v40 = vadd.f32 %v1358_v38, %v1663_v36  ;;  %v618_v41 = vadd.f32 %v1390_v39, %v1663_v36  ;;  %v481_v42 = vpop.f32.mrb[9].mxu0  ;;  %v609_v43 = vpop.f32.mrb[9].mxu1 }
 0x12d   :  { %1030 = vst.msk [vmem:[#allocation8 + $0x14] sm:$0xf] %vm1024_vm1, %v1245_v35  ;;  %1062 = vst.msk [vmem:[#allocation8 + $0x94] sm:$0xf] %vm1024_vm1, %v1277_v37  ;;  %v482_v44 = vadd.f32 %v1663_v36, %v481_v42  ;;  %v610_v45 = vadd.f32 %v1663_v36, %v609_v43  ;;  %v1359_v46 = vpop.f32.mrb[10].mxu0  ;;  %v1391_v47 = vpop.f32.mrb[10].mxu1 }
 0x12e   :  { %v714_v48 = vmax.f32 %v490_v40, 0.0  ;;  %v746_v49 = vmax.f32 %v618_v41, 0.0  ;;  %v493_v50 = vadd.f32 %v1359_v46, %v1663_v36  ;;  %v621_v51 = vadd.f32 %v1391_v47, %v1663_v36  ;;  %v484_v52 = vpop.f32.mrb[11].mxu0  ;;  %v612_v53 = vpop.f32.mrb[11].mxu1 }
 0x12f   :  { %v712_v54 = vmax.f32 %v482_v44, 0.0  ;;  %v744_v55 = vmax.f32 %v610_v45, 0.0  ;;  %v485_v56 = vadd.f32 %v1663_v36, %v484_v52  ;;  %v613_v57 = vadd.f32 %v1663_v36, %v612_v53 }
 0x130   :  { %v1250_v58 = vpack.c.bf16 %v714_v48, %v714_v48  ;;  %v1282_v59 = vpack.c.bf16 %v746_v49, %v746_v49  ;;  %v715_v60 = vmax.f32 %v493_v50, 0.0  ;;  %v747_v61 = vmax.f32 %v621_v51, 0.0 }
 0x131   :  { %v1248_v62 = vpack.c.bf16 %v712_v54, %v712_v54  ;;  %v1280_v63 = vpack.c.bf16 %v744_v55, %v744_v55  ;;  %v713_v0 = vmax.f32 %v485_v56, 0.0  ;;  %v745_v1 = vmax.f32 %v613_v57, 0.0 }
 0x132   :  { %1035 = vst.msk [vmem:[#allocation8 + $0x28] sm:$0xf] %vm1024_vm1, %v1250_v58  ;;  %1067 = vst.msk [vmem:[#allocation8 + $0xa8] sm:$0xf] %vm1024_vm1, %v1282_v59  ;;  %v1251_v2 = vpack.c.bf16 %v715_v60, %v715_v60  ;;  %v1283_v3 = vpack.c.bf16 %v747_v61, %v747_v61 }
 0x133   :  { %1033 = vst.msk [vmem:[#allocation8 + $0x20] sm:$0xf] %vm1024_vm1, %v1248_v62  ;;  %1065 = vst.msk [vmem:[#allocation8 + $0xa0] sm:$0xf] %vm1024_vm1, %v1280_v63  ;;  %v1249_v4 = vpack.c.bf16 %v713_v0, %v713_v0  ;;  %v1281_v5 = vpack.c.bf16 %v745_v1, %v745_v1  ;;  %v1362_v6 = vpop.f32.mrb[12].mxu0  ;;  %v1394_v7 = vpop.f32.mrb[12].mxu1 }
 0x134   :  { %1036 = vst.msk [vmem:[#allocation8 + $0x2c] sm:$0xf] %vm1024_vm1, %v1251_v2  ;;  %1068 = vst.msk [vmem:[#allocation8 + $0xac] sm:$0xf] %vm1024_vm1, %v1283_v3  ;;  %v506_v8 = vadd.f32 %v1362_v6, %v1663_v36  ;;  %v634_v9 = vadd.f32 %v1394_v7, %v1663_v36  ;;  %v497_v10 = vpop.f32.mrb[13].mxu0  ;;  %v625_v11 = vpop.f32.mrb[13].mxu1 }
 0x135   :  { %1034 = vst.msk [vmem:[#allocation8 + $0x24] sm:$0xf] %vm1024_vm1, %v1249_v4  ;;  %1066 = vst.msk [vmem:[#allocation8 + $0xa4] sm:$0xf] %vm1024_vm1, %v1281_v5  ;;  %v498_v12 = vadd.f32 %v1663_v36, %v497_v10  ;;  %v626_v13 = vadd.f32 %v1663_v36, %v625_v11  ;;  %v1363_v14 = vpop.f32.mrb[14].mxu0  ;;  %v1395_v15 = vpop.f32.mrb[14].mxu1 }
 0x136   :  { %v718_v16 = vmax.f32 %v506_v8, 0.0  ;;  %v750_v17 = vmax.f32 %v634_v9, 0.0  ;;  %v509_v18 = vadd.f32 %v1363_v14, %v1663_v36  ;;  %v637_v19 = vadd.f32 %v1395_v15, %v1663_v36  ;;  %v500_v20 = vpop.f32.mrb[15].mxu0  ;;  %v628_v21 = vpop.f32.mrb[15].mxu1 }
 0x137   :  { %v716_v22 = vmax.f32 %v498_v12, 0.0  ;;  %v748_v23 = vmax.f32 %v626_v13, 0.0  ;;  %v501_v24 = vadd.f32 %v1663_v36, %v500_v20  ;;  %v629_v25 = vadd.f32 %v1663_v36, %v628_v21 }
 0x138   :  { %v1254_v26 = vpack.c.bf16 %v718_v16, %v718_v16  ;;  %v1286_v27 = vpack.c.bf16 %v750_v17, %v750_v17  ;;  %v719_v28 = vmax.f32 %v509_v18, 0.0  ;;  %v751_v29 = vmax.f32 %v637_v19, 0.0 }
 0x139   :  { %v1252_v30 = vpack.c.bf16 %v716_v22, %v716_v22  ;;  %v1284_v31 = vpack.c.bf16 %v748_v23, %v748_v23  ;;  %v717_v32 = vmax.f32 %v501_v24, 0.0  ;;  %v749_v33 = vmax.f32 %v629_v25, 0.0 }
 0x13a   :  { %1039 = vst.msk [vmem:[#allocation8 + $0x38] sm:$0xf] %vm1024_vm1, %v1254_v26  ;;  %1071 = vst.msk [vmem:[#allocation8 + $0xb8] sm:$0xf] %vm1024_vm1, %v1286_v27  ;;  %v1255_v34 = vpack.c.bf16 %v719_v28, %v719_v28  ;;  %v1287_v35 = vpack.c.bf16 %v751_v29, %v751_v29 }
 0x13b   :  { %1037 = vst.msk [vmem:[#allocation8 + $0x30] sm:$0xf] %vm1024_vm1, %v1252_v30  ;;  %1069 = vst.msk [vmem:[#allocation8 + $0xb0] sm:$0xf] %vm1024_vm1, %v1284_v31  ;;  %v1253_v37 = vpack.c.bf16 %v717_v32, %v717_v32  ;;  %v1285_v38 = vpack.c.bf16 %v749_v33, %v749_v33  ;;  %v1366_v39 = vpop.f32.mrb[16].mxu0  ;;  %v1398_v40 = vpop.f32.mrb[16].mxu1 }
 0x13c   :  { %1040 = vst.msk [vmem:[#allocation8 + $0x3c] sm:$0xf] %vm1024_vm1, %v1255_v34  ;;  %1072 = vst.msk [vmem:[#allocation8 + $0xbc] sm:$0xf] %vm1024_vm1, %v1287_v35  ;;  %v522_v41 = vadd.f32 %v1366_v39, %v1663_v36  ;;  %v650_v42 = vadd.f32 %v1398_v40, %v1663_v36  ;;  %v513_v43 = vpop.f32.mrb[17].mxu0  ;;  %v641_v44 = vpop.f32.mrb[17].mxu1 }
 0x13d   :  { %1038 = vst.msk [vmem:[#allocation8 + $0x34] sm:$0xf] %vm1024_vm1, %v1253_v37  ;;  %1070 = vst.msk [vmem:[#allocation8 + $0xb4] sm:$0xf] %vm1024_vm1, %v1285_v38  ;;  %v514_v45 = vadd.f32 %v1663_v36, %v513_v43  ;;  %v642_v46 = vadd.f32 %v1663_v36, %v641_v44  ;;  %v1367_v47 = vpop.f32.mrb[18].mxu0  ;;  %v1399_v48 = vpop.f32.mrb[18].mxu1 }
 0x13e   :  { %v722_v49 = vmax.f32 %v522_v41, 0.0  ;;  %v754_v50 = vmax.f32 %v650_v42, 0.0  ;;  %v525_v51 = vadd.f32 %v1367_v47, %v1663_v36  ;;  %v653_v52 = vadd.f32 %v1399_v48, %v1663_v36  ;;  %v516_v53 = vpop.f32.mrb[19].mxu0  ;;  %v644_v54 = vpop.f32.mrb[19].mxu1 }
 0x13f   :  { %v720_v55 = vmax.f32 %v514_v45, 0.0  ;;  %v752_v56 = vmax.f32 %v642_v46, 0.0  ;;  %v517_v57 = vadd.f32 %v1663_v36, %v516_v53  ;;  %v645_v58 = vadd.f32 %v1663_v36, %v644_v54 }
 0x140   :  { %v1258_v59 = vpack.c.bf16 %v722_v49, %v722_v49  ;;  %v1290_v60 = vpack.c.bf16 %v754_v50, %v754_v50  ;;  %v723_v61 = vmax.f32 %v525_v51, 0.0  ;;  %v755_v62 = vmax.f32 %v653_v52, 0.0 }
 0x141   :  { %v1256_v63 = vpack.c.bf16 %v720_v55, %v720_v55  ;;  %v1288_v0 = vpack.c.bf16 %v752_v56, %v752_v56  ;;  %v721_v1 = vmax.f32 %v517_v57, 0.0  ;;  %v753_v2 = vmax.f32 %v645_v58, 0.0 }
 0x142   :  { %1043 = vst.msk [vmem:[#allocation8 + $0x48] sm:$0xf] %vm1024_vm1, %v1258_v59  ;;  %1075 = vst.msk [vmem:[#allocation8 + $0xc8] sm:$0xf] %vm1024_vm1, %v1290_v60  ;;  %v1259_v3 = vpack.c.bf16 %v723_v61, %v723_v61  ;;  %v1291_v4 = vpack.c.bf16 %v755_v62, %v755_v62 }
 0x143   :  { %1041 = vst.msk [vmem:[#allocation8 + $0x40] sm:$0xf] %vm1024_vm1, %v1256_v63  ;;  %1073 = vst.msk [vmem:[#allocation8 + $0xc0] sm:$0xf] %vm1024_vm1, %v1288_v0  ;;  %v1257_v5 = vpack.c.bf16 %v721_v1, %v721_v1  ;;  %v1289_v6 = vpack.c.bf16 %v753_v2, %v753_v2  ;;  %v1370_v7 = vpop.f32.mrb[20].mxu0  ;;  %v1402_v8 = vpop.f32.mrb[20].mxu1 }
 0x144   :  { %1044 = vst.msk [vmem:[#allocation8 + $0x4c] sm:$0xf] %vm1024_vm1, %v1259_v3  ;;  %1076 = vst.msk [vmem:[#allocation8 + $0xcc] sm:$0xf] %vm1024_vm1, %v1291_v4  ;;  %v538_v9 = vadd.f32 %v1370_v7, %v1663_v36  ;;  %v666_v10 = vadd.f32 %v1402_v8, %v1663_v36  ;;  %v529_v11 = vpop.f32.mrb[21].mxu0  ;;  %v657_v12 = vpop.f32.mrb[21].mxu1 }
 0x145   :  { %1042 = vst.msk [vmem:[#allocation8 + $0x44] sm:$0xf] %vm1024_vm1, %v1257_v5  ;;  %1074 = vst.msk [vmem:[#allocation8 + $0xc4] sm:$0xf] %vm1024_vm1, %v1289_v6  ;;  %v530_v13 = vadd.f32 %v1663_v36, %v529_v11  ;;  %v658_v14 = vadd.f32 %v1663_v36, %v657_v12  ;;  %v1371_v15 = vpop.f32.mrb[22].mxu0  ;;  %v1403_v16 = vpop.f32.mrb[22].mxu1 }
 0x146   :  { %v726_v17 = vmax.f32 %v538_v9, 0.0  ;;  %v758_v18 = vmax.f32 %v666_v10, 0.0  ;;  %v541_v19 = vadd.f32 %v1371_v15, %v1663_v36  ;;  %v669_v20 = vadd.f32 %v1403_v16, %v1663_v36  ;;  %v532_v21 = vpop.f32.mrb[23].mxu0  ;;  %v660_v22 = vpop.f32.mrb[23].mxu1 }
 0x147   :  { %v724_v23 = vmax.f32 %v530_v13, 0.0  ;;  %v756_v24 = vmax.f32 %v658_v14, 0.0  ;;  %v533_v25 = vadd.f32 %v1663_v36, %v532_v21  ;;  %v661_v26 = vadd.f32 %v1663_v36, %v660_v22 }
 0x148   :  { %v1262_v27 = vpack.c.bf16 %v726_v17, %v726_v17  ;;  %v1294_v28 = vpack.c.bf16 %v758_v18, %v758_v18  ;;  %v727_v29 = vmax.f32 %v541_v19, 0.0  ;;  %v759_v30 = vmax.f32 %v669_v20, 0.0 }
 0x149   :  { %v1260_v31 = vpack.c.bf16 %v724_v23, %v724_v23  ;;  %v1292_v32 = vpack.c.bf16 %v756_v24, %v756_v24  ;;  %v725_v33 = vmax.f32 %v533_v25, 0.0  ;;  %v757_v34 = vmax.f32 %v661_v26, 0.0 }
 0x14a   :  { %1047 = vst.msk [vmem:[#allocation8 + $0x58] sm:$0xf] %vm1024_vm1, %v1262_v27  ;;  %1079 = vst.msk [vmem:[#allocation8 + $0xd8] sm:$0xf] %vm1024_vm1, %v1294_v28  ;;  %v1263_v35 = vpack.c.bf16 %v727_v29, %v727_v29  ;;  %v1295_v37 = vpack.c.bf16 %v759_v30, %v759_v30 }
 0x14b   :  { %1045 = vst.msk [vmem:[#allocation8 + $0x50] sm:$0xf] %vm1024_vm1, %v1260_v31  ;;  %1077 = vst.msk [vmem:[#allocation8 + $0xd0] sm:$0xf] %vm1024_vm1, %v1292_v32  ;;  %v1261_v38 = vpack.c.bf16 %v725_v33, %v725_v33  ;;  %v1293_v39 = vpack.c.bf16 %v757_v34, %v757_v34  ;;  %v1374_v40 = vpop.f32.mrb[24].mxu0  ;;  %v1406_v41 = vpop.f32.mrb[24].mxu1 }
 0x14c   :  { %1048 = vst.msk [vmem:[#allocation8 + $0x5c] sm:$0xf] %vm1024_vm1, %v1263_v35  ;;  %1080 = vst.msk [vmem:[#allocation8 + $0xdc] sm:$0xf] %vm1024_vm1, %v1295_v37  ;;  %v554_v42 = vadd.f32 %v1374_v40, %v1663_v36  ;;  %v682_v43 = vadd.f32 %v1406_v41, %v1663_v36  ;;  %v545_v44 = vpop.f32.mrb[25].mxu0  ;;  %v673_v45 = vpop.f32.mrb[25].mxu1 }
 0x14d   :  { %1046 = vst.msk [vmem:[#allocation8 + $0x54] sm:$0xf] %vm1024_vm1, %v1261_v38  ;;  %1078 = vst.msk [vmem:[#allocation8 + $0xd4] sm:$0xf] %vm1024_vm1, %v1293_v39  ;;  %v546_v46 = vadd.f32 %v1663_v36, %v545_v44  ;;  %v674_v47 = vadd.f32 %v1663_v36, %v673_v45  ;;  %v1375_v48 = vpop.f32.mrb[26].mxu0  ;;  %v1407_v49 = vpop.f32.mrb[26].mxu1 }
 0x14e   :  { %v730_v50 = vmax.f32 %v554_v42, 0.0  ;;  %v762_v51 = vmax.f32 %v682_v43, 0.0  ;;  %v557_v52 = vadd.f32 %v1375_v48, %v1663_v36  ;;  %v685_v53 = vadd.f32 %v1407_v49, %v1663_v36  ;;  %v548_v54 = vpop.f32.mrb[27].mxu0  ;;  %v676_v55 = vpop.f32.mrb[27].mxu1 }
 0x14f   :  { %v728_v56 = vmax.f32 %v546_v46, 0.0  ;;  %v760_v57 = vmax.f32 %v674_v47, 0.0  ;;  %v549_v58 = vadd.f32 %v1663_v36, %v548_v54  ;;  %v677_v59 = vadd.f32 %v1663_v36, %v676_v55 }
 0x150   :  { %v1266_v60 = vpack.c.bf16 %v730_v50, %v730_v50  ;;  %v1298_v61 = vpack.c.bf16 %v762_v51, %v762_v51  ;;  %v731_v62 = vmax.f32 %v557_v52, 0.0  ;;  %v763_v63 = vmax.f32 %v685_v53, 0.0 }
 0x151   :  { %v1264_v0 = vpack.c.bf16 %v728_v56, %v728_v56  ;;  %v1296_v1 = vpack.c.bf16 %v760_v57, %v760_v57  ;;  %v729_v2 = vmax.f32 %v549_v58, 0.0  ;;  %v761_v3 = vmax.f32 %v677_v59, 0.0 }
 0x152   :  { %1051 = vst.msk [vmem:[#allocation8 + $0x68] sm:$0xf] %vm1024_vm1, %v1266_v60  ;;  %1083 = vst.msk [vmem:[#allocation8 + $0xe8] sm:$0xf] %vm1024_vm1, %v1298_v61  ;;  %v1267_v4 = vpack.c.bf16 %v731_v62, %v731_v62  ;;  %v1299_v5 = vpack.c.bf16 %v763_v63, %v763_v63 }
 0x153   :  { %1049 = vst.msk [vmem:[#allocation8 + $0x60] sm:$0xf] %vm1024_vm1, %v1264_v0  ;;  %1081 = vst.msk [vmem:[#allocation8 + $0xe0] sm:$0xf] %vm1024_vm1, %v1296_v1  ;;  %v1265_v6 = vpack.c.bf16 %v729_v2, %v729_v2  ;;  %v1297_v7 = vpack.c.bf16 %v761_v3, %v761_v3  ;;  %v1378_v8 = vpop.f32.mrb[28].mxu0  ;;  %v1410_v9 = vpop.f32.mrb[28].mxu1 }
 0x154   :  { %1052 = vst.msk [vmem:[#allocation8 + $0x6c] sm:$0xf] %vm1024_vm1, %v1267_v4  ;;  %1084 = vst.msk [vmem:[#allocation8 + $0xec] sm:$0xf] %vm1024_vm1, %v1299_v5  ;;  %v570_v10 = vadd.f32 %v1378_v8, %v1663_v36  ;;  %v698_v11 = vadd.f32 %v1410_v9, %v1663_v36  ;;  %v561_v12 = vpop.f32.mrb[29].mxu0  ;;  %v689_v13 = vpop.f32.mrb[29].mxu1 }
 0x155   :  { %1050 = vst.msk [vmem:[#allocation8 + $0x64] sm:$0xf] %vm1024_vm1, %v1265_v6  ;;  %1082 = vst.msk [vmem:[#allocation8 + $0xe4] sm:$0xf] %vm1024_vm1, %v1297_v7  ;;  %v562_v14 = vadd.f32 %v1663_v36, %v561_v12  ;;  %v690_v15 = vadd.f32 %v1663_v36, %v689_v13  ;;  %v1379_v16 = vpop.f32.mrb[30].mxu0  ;;  %v1411_v17 = vpop.f32.mrb[30].mxu1 }
 0x156   :  { %v734_v18 = vmax.f32 %v570_v10, 0.0  ;;  %v766_v19 = vmax.f32 %v698_v11, 0.0  ;;  %v573_v20 = vadd.f32 %v1379_v16, %v1663_v36  ;;  %v701_v21 = vadd.f32 %v1411_v17, %v1663_v36  ;;  %v564_v22 = vpop.f32.mrb[31].mxu0  ;;  %v692_v23 = vpop.f32.mrb[31].mxu1 }
 0x157   :  { %v732_v24 = vmax.f32 %v562_v14, 0.0  ;;  %v764_v25 = vmax.f32 %v690_v15, 0.0  ;;  %v565_v26 = vadd.f32 %v1663_v36, %v564_v22  ;;  %v693_v27 = vadd.f32 %v1663_v36, %v692_v23 }
 0x158   :  { %v1270_v28 = vpack.c.bf16 %v734_v18, %v734_v18  ;;  %v1302_v29 = vpack.c.bf16 %v766_v19, %v766_v19  ;;  %v735_v30 = vmax.f32 %v573_v20, 0.0  ;;  %v767_v31 = vmax.f32 %v701_v21, 0.0 }
 0x159   :  { %v1268_v32 = vpack.c.bf16 %v732_v24, %v732_v24  ;;  %v1300_v33 = vpack.c.bf16 %v764_v25, %v764_v25  ;;  %v733_v34 = vmax.f32 %v565_v26, 0.0  ;;  %v765_v35 = vmax.f32 %v693_v27, 0.0 }
 0x15a   :  { %1055 = vst.msk [vmem:[#allocation8 + $0x78] sm:$0xf] %vm1024_vm1, %v1270_v28  ;;  %1087 = vst.msk [vmem:[#allocation8 + $0xf8] sm:$0xf] %vm1024_vm1, %v1302_v29  ;;  %v1271_v37 = vpack.c.bf16 %v735_v30, %v735_v30  ;;  %v1303_v38 = vpack.c.bf16 %v767_v31, %v767_v31 }
 0x15b   :  { %1053 = vst.msk [vmem:[#allocation8 + $0x70] sm:$0xf] %vm1024_vm1, %v1268_v32  ;;  %1085 = vst.msk [vmem:[#allocation8 + $0xf0] sm:$0xf] %vm1024_vm1, %v1300_v33  ;;  %v1269_v36 = vpack.c.bf16 %v733_v34, %v733_v34  ;;  %v1301_v39 = vpack.c.bf16 %v765_v35, %v765_v35 }
 0x15c   :  { %1056 = vst.msk [vmem:[#allocation8 + $0x7c] sm:$0xf] %vm1024_vm1, %v1271_v37  ;;  %1088 = vst.msk [vmem:[#allocation8 + $0xfc] sm:$0xf] %vm1024_vm1, %v1303_v38 }
 0x15d   :  { %1054 = vst.msk [vmem:[#allocation8 + $0x74] sm:$0xf] %vm1024_vm1, %v1269_v36  ;;  %1086 = vst.msk [vmem:[#allocation8 + $0xf4] sm:$0xf] %vm1024_vm1, %v1301_v39 }
 0x15e   :  { %1539 = shalt.err (!%p1536_p0)
}
 0x15f   :  { %s1540_s28 = scalar_lea.hbm %s1811_s3, 4096 }
 0x160   :  { %p1541_p1 = scmp.ne.s32.totalorder %s1811_s3, %s1540_s28  ;;  %p1544_p2 = scmp.lt.u32.totalorder %s1540_s28, %s1811_s3 }
 0x162   :  { %p1546_p3 = pnand %p1544_p2, %p1541_p1 }
 0x164   :  { %1549 = shalt.err (!%p1546_p3)
}
 0x165   :  { %1100 = dma.vmem_to_hbm [thread:$0]  %s1095_s22, 4096, %s1811_s3, [#allocation4], %s1558_s24, %s1558_s24, %s1559_s25  }
 0x166   :  { %1554 = dma.done.wait [#allocation4], 4096  }
 0x167   :  { %1555 = vsyncadd [#allocation4], 4294963200 }
 0x168   :  { %1104 = vsyncpa [#allocation3], 1 }
 0x169   :  { %1105 = vsyncpa [#allocation6], 1 }
 0x16a   :  { %1106 = vsyncpa [#allocation4], 1 }

// kernel: forward.4
= control target key start
LH: loop header
LB: loop body
LE: loop exit
PB: predicated region body
PF: predicated region fallthrough
CT: control target
= control target key end

     0   :  { %8 = vsyncpa [#allocation3], 0  ;;  %s1532_s0 = inlined_call_operand.hbm [shape: bf16[512,144], index: 0, kind: input, shape index: {}]   ;;  %s1533_s1 = inlined_call_operand.hbm [shape: bf16[144,18], index: 1, kind: input, shape index: {}]   ;;  %s1534_s2 = inlined_call_operand.hbm [shape: f32[1,18], index: 2, kind: input, shape index: {}]   ;;  %s1535_s3 = inlined_call_operand.hbm [shape: f32[512,18], index: 3, kind: output, shape index: {}]  }
   0x1   :  { %9 = vsyncpa [#allocation6], 0 }
   0x2   :  { %10 = vsyncpa [#allocation4], 0  ;;  %s1287_s12 = smov [#allocation5]   ;;  %s1193_s16 = scalar_lea.hbm %s1533_s1, 1152 }
   0x3   :  { %s28_s13 = sshll.u32 %s1287_s12, 4  ;;  %p1194_p0 = scmp.ne.s32.totalorder %s1533_s1, %s1193_s16  ;;  %s29_s13 = int_to_ptr.vmem [resolvable:$true] %s28_s13 }
   0x4   :  { %p1197_p1 = scmp.lt.u32.totalorder %s1193_s16, %s1533_s1 }
   0x6   :  { %p1199_p2 = pnand %p1197_p1, %p1194_p0 }
   0x8   :  { %1202 = shalt.err (!%p1199_p2)
}
   0x9   :  { %s1203_s21 = scalar_lea.vmem %s29_s13, 1152  ;;  %p1208_p4 = scmp.lt.s32.totalorder %s29_s13, %s29_s13 }
   0xa   :  { %p1204_p3 = scmp.ne.s32.totalorder %s29_s13, %s1203_s21  ;;  %p1209_p5 = scmp.lt.s32.totalorder %s1203_s21, %s1203_s21 }
   0xc   :  { %p1210_p6 = por %p1209_p5, %p1208_p4 }
   0xe   :  { %p1211_p7 = pnand %p1210_p6, %p1204_p3 }
  0x10   :  { %1214 = shalt.err (!%p1211_p7)
}
  0x11   :  { %s1288_s22 = smov 64   ;;  %s1289_s23 = smov 4  }
  0x12   :  { %34 = dma.hbm_to_vmem [thread:$0]  %s1533_s1, 1152, %s29_s13, [#allocation6], %s1288_s22, %s1288_s22, %s1289_s23  }
  0x13   :  { %s1290_s26 = smov [#allocation2]   ;;  %s1215_s30 = scalar_lea.hbm %s1532_s0, 8192 }
  0x14   :  { %s16_s27 = sshll.u32 %s1290_s26, 4  ;;  %p1216_p8 = scmp.ne.s32.totalorder %s1532_s0, %s1215_s30  ;;  %s17_s27 = int_to_ptr.vmem [resolvable:$true] %s16_s27 }
  0x15   :  { %p1219_p9 = scmp.lt.u32.totalorder %s1215_s30, %s1532_s0 }
  0x17   :  { %p1221_p10 = pnand %p1219_p9, %p1216_p8 }
  0x19   :  { %1224 = shalt.err (!%p1221_p10)
}
  0x1a   :  { %s1225_s8 = scalar_lea.vmem %s17_s27, 8192  ;;  %p1230_p12 = scmp.lt.s32.totalorder %s17_s27, %s17_s27 }
  0x1b   :  { %p1226_p11 = scmp.ne.s32.totalorder %s17_s27, %s1225_s8  ;;  %p1231_p13 = scmp.lt.s32.totalorder %s1225_s8, %s1225_s8 }
  0x1d   :  { %p1232_p0 = por %p1231_p13, %p1230_p12 }
  0x1f   :  { %p1233_p1 = pnand %p1232_p0, %p1226_p11 }
  0x21   :  { %1236 = shalt.err (!%p1233_p1)
}
  0x22   :  { %s1291_s1 = smov 128   ;;  %s1292_s9 = smov 8  }
  0x23   :  { %22 = dma.hbm_to_vmem [thread:$0]  %s1532_s0, 8192, %s17_s27, [#allocation3], %s1291_s1, %s1291_s1, %s1292_s9  }
  0x24   :  { %s1293_s12 = smov [#allocation7]   ;;  %s1237_s16 = scalar_lea.hbm %s1534_s2, 16 }
  0x25   :  { %s41_s13 = sshll.u32 %s1293_s12, 4  ;;  %p1238_p2 = scmp.ne.s32.totalorder %s1534_s2, %s1237_s16  ;;  %s42_s13 = int_to_ptr.vmem [resolvable:$true] %s41_s13 }
  0x26   :  { %p1241_p3 = scmp.lt.u32.totalorder %s1237_s16, %s1534_s2 }
  0x28   :  { %p1243_p4 = pnand %p1241_p3, %p1238_p2 }
  0x2a   :  { %1246 = shalt.err (!%p1243_p4)
}
  0x2b   :  { %s1247_s21 = scalar_lea.vmem %s42_s13, 16  ;;  %s1251_s0 = scalar_lea.vmem %s42_s13, 32 }
  0x2c   :  { %p1248_p5 = scmp.ne.s32.totalorder %s42_s13, %s1247_s21  ;;  %p1252_p6 = scmp.lt.s32.totalorder %s42_s13, %s42_s13 }
  0x2d   :  { %p1253_p7 = scmp.lt.s32.totalorder %s1251_s0, %s1247_s21 }
  0x2f   :  { %p1254_p8 = por %p1253_p7, %p1252_p6 }
  0x31   :  { %p1255_p9 = pnand %p1254_p8, %p1248_p5 }
  0x33   :  { %1258 = shalt.err (!%p1255_p9)
}
  0x34   :  { %44 = dma.hbm_to_vmem [thread:$0]  %s1534_s2, 16, %s42_s13, [#allocation6]  }
  0x35   :  { %1281 = dma.done.wait [#allocation3], 8192  }
  0x36   :  { %1282 = vsyncadd [#allocation3], 4294959104 }
  0x37   :  { %1283 = dma.done.wait [#allocation6], 1168  }
  0x38   :  { %1284 = vsyncadd [#allocation6], 4294966128  ;;  %v1294_v0 = vmov 0   ;;  %v1088_v1 = vld [vmem:[#allocation5] sm:$0xff]   ;;  %v1089_v2 = vld [vmem:[#allocation5 + $0x8] sm:$0xff]   ;;  %vm486_vm0 = vcmask 130048  }
  0x39   :  { %583 = vmatprep.subr.bf16.mxu0 %v1294_v0  ;;  %1061 = vmatprep.subr.bf16.mxu1 %v1294_v0  ;;  %v1090_v3 = vld [vmem:[#allocation5 + $0x10] sm:$0xff]   ;;  %v1091_v4 = vld [vmem:[#allocation5 + $0x18] sm:$0xff]   ;;  %v1099_v5 = vld [vmem:[#allocation2 + $0x4] ss:$8 sps:$4 sm:$0xff]   ;;  %vm872_vm1 = vcmask 146432   ;;  %s1295_s2 = smov [#allocation8]  }
  0x3a   :  { %584 = vmatpush1.bf16.msra.mxu0 %v1088_v1  ;;  %1070 = vmatpush1.bf16.msra.mxu1 %v1088_v1  ;;  %v1102_v6 = vld [vmem:[#allocation2 + $0x104] ss:$8 sps:$4 sm:$0xff]   ;;  %v1094_v9 = vld [vmem:[#allocation5 + $0x30] sm:$0xff]   ;;  %v1095_v10 = vld [vmem:[#allocation5 + $0x38] sm:$0xff]   ;;  %s942_s24 = sshll.u32 %s1295_s2, 4  ;;  %s943_s24 = int_to_ptr.vmem [resolvable:$true] %s942_s24 }
  0x3b   :  { %585 = vmatprep.subr.bf16.mxu0 %v1294_v0  ;;  %1062 = vmatprep.subr.bf16.mxu1 %v1294_v0  ;;  %v1092_v7 = vld [vmem:[#allocation5 + $0x20] sm:$0xff]   ;;  %v1093_v8 = vld [vmem:[#allocation5 + $0x28] sm:$0xff]   ;;  %v1103_v14 = vld [vmem:[#allocation2 + $0x14] ss:$8 sps:$4 sm:$0xff]   ;;  %s1259_s25 = scalar_lea.vmem %s943_s24, 8192  ;;  %p1264_p11 = scmp.lt.s32.totalorder %s943_s24, %s943_s24 }
  0x3c   :  { %1029 = vmatprep.mubr.msk.bf16.mxu0 %vm486_vm0, %v1099_v5  ;;  %1045 = vmatprep.mubr.msk.bf16.mxu1 %vm486_vm0, %v1102_v6  ;;  %v1096_v11 = vld [vmem:[#allocation5 + $0x40] sm:$0xff]   ;;  %v1105_v15 = vld [vmem:[#allocation2 + $0x114] ss:$8 sps:$4 sm:$0xff]   ;;  %v1107_v16 = vld [vmem:[#allocation2 + $0x10] ss:$8 sps:$4 sm:$0xff]   ;;  %p1260_p10 = scmp.ne.s32.totalorder %s943_s24, %s1259_s25  ;;  %p1265_p12 = scmp.lt.s32.totalorder %s1259_s25, %s1259_s25 }
  0x3d   :  { %v1097_v12 = vld [vmem:[#allocation2] ss:$8 sps:$4 sm:$0xff]   ;;  %v1108_v17 = vld [vmem:[#allocation2 + $0x110] ss:$8 sps:$4 sm:$0xff]   ;;  %v1109_v18 = vld [vmem:[#allocation2 + $0x24] ss:$8 sps:$4 sm:$0xff]  }
  0x3e   :  { %586 = vmatpush1.bf16.msra.mxu0 %v1089_v2  ;;  %1071 = vmatpush1.bf16.msra.mxu1 %v1089_v2  ;;  %v1100_v13 = vld [vmem:[#allocation2 + $0x100] ss:$8 sps:$4 sm:$0xff]   ;;  %v1111_v19 = vld [vmem:[#allocation2 + $0x124] ss:$8 sps:$4 sm:$0xff]   ;;  %v1115_v22 = vld [vmem:[#allocation2 + $0x34] ss:$8 sps:$4 sm:$0xff]   ;;  %p1266_p13 = por %p1265_p12, %p1264_p11 }
  0x3f   :  { %587 = vmatprep.subr.bf16.mxu0 %v1294_v0  ;;  %1063 = vmatprep.subr.bf16.mxu1 %v1294_v0  ;;  %v1113_v20 = vld [vmem:[#allocation2 + $0x20] ss:$8 sps:$4 sm:$0xff]   ;;  %v1117_v23 = vld [vmem:[#allocation2 + $0x134] ss:$8 sps:$4 sm:$0xff]   ;;  %v1119_v24 = vld [vmem:[#allocation2 + $0x30] ss:$8 sps:$4 sm:$0xff]  }
  0x40   :  { %v1114_v21 = vld [vmem:[#allocation2 + $0x120] ss:$8 sps:$4 sm:$0xff]   ;;  %v1120_v25 = vld [vmem:[#allocation2 + $0x130] ss:$8 sps:$4 sm:$0xff]   ;;  %v1121_v26 = vld [vmem:[#allocation2 + $0x44] ss:$8 sps:$4 sm:$0xff]   ;;  %p1267_p0 = pnand %p1266_p13, %p1260_p10 }
  0x41   :  { %v1123_v27 = vld [vmem:[#allocation2 + $0x144] ss:$8 sps:$4 sm:$0xff]   ;;  %v1125_v28 = vld [vmem:[#allocation2 + $0x40] ss:$8 sps:$4 sm:$0xff]   ;;  %v1127_v30 = vld [vmem:[#allocation2 + $0x54] ss:$8 sps:$4 sm:$0xff]  }
  0x42   :  { %588 = vmatpush1.bf16.msra.mxu0 %v1090_v3  ;;  %1072 = vmatpush1.bf16.msra.mxu1 %v1090_v3  ;;  %v1126_v29 = vld [vmem:[#allocation2 + $0x140] ss:$8 sps:$4 sm:$0xff]   ;;  %v1129_v31 = vld [vmem:[#allocation2 + $0x154] ss:$8 sps:$4 sm:$0xff]   ;;  %v1131_v32 = vld [vmem:[#allocation2 + $0x50] ss:$8 sps:$4 sm:$0xff]  }
  0x43   :  { %589 = vmatprep.subr.bf16.mxu0 %v1294_v0  ;;  %1064 = vmatprep.subr.bf16.mxu1 %v1294_v0  ;;  %v1132_v33 = vld [vmem:[#allocation2 + $0x150] ss:$8 sps:$4 sm:$0xff]   ;;  %v1133_v34 = vld [vmem:[#allocation2 + $0x64] ss:$8 sps:$4 sm:$0xff]   ;;  %v1137_v36 = vld [vmem:[#allocation2 + $0x60] ss:$8 sps:$4 sm:$0xff]  }
  0x44   :  { %v1135_v35 = vld [vmem:[#allocation2 + $0x164] ss:$8 sps:$4 sm:$0xff]   ;;  %v1138_v37 = vld [vmem:[#allocation2 + $0x160] ss:$8 sps:$4 sm:$0xff]   ;;  %v1139_v38 = vld [vmem:[#allocation2 + $0x74] ss:$8 sps:$4 sm:$0xff]  }
  0x45   :  { %v1141_v39 = vld [vmem:[#allocation2 + $0x174] ss:$8 sps:$4 sm:$0xff]   ;;  %v1143_v40 = vld [vmem:[#allocation2 + $0x70] ss:$8 sps:$4 sm:$0xff]   ;;  %v1145_v42 = vld [vmem:[#allocation2 + $0x84] ss:$8 sps:$4 sm:$0xff]  }
  0x46   :  { %590 = vmatpush1.bf16.msra.mxu0 %v1091_v4  ;;  %1073 = vmatpush1.bf16.msra.mxu1 %v1091_v4  ;;  %v1144_v41 = vld [vmem:[#allocation2 + $0x170] ss:$8 sps:$4 sm:$0xff]   ;;  %v1147_v43 = vld [vmem:[#allocation2 + $0x184] ss:$8 sps:$4 sm:$0xff]   ;;  %v1149_v44 = vld [vmem:[#allocation2 + $0x80] ss:$8 sps:$4 sm:$0xff]  }
  0x47   :  { %591 = vmatprep.subr.bf16.mxu0 %v1294_v0  ;;  %1065 = vmatprep.subr.bf16.mxu1 %v1294_v0  ;;  %v1150_v45 = vld [vmem:[#allocation2 + $0x180] ss:$8 sps:$4 sm:$0xff]   ;;  %v1151_v46 = vld [vmem:[#allocation2 + $0x94] ss:$8 sps:$4 sm:$0xff]   ;;  %v1155_v48 = vld [vmem:[#allocation2 + $0x90] ss:$8 sps:$4 sm:$0xff]  }
  0x48   :  { %v1153_v47 = vld [vmem:[#allocation2 + $0x194] ss:$8 sps:$4 sm:$0xff]   ;;  %v1156_v49 = vld [vmem:[#allocation2 + $0x190] ss:$8 sps:$4 sm:$0xff]   ;;  %v1157_v50 = vld [vmem:[#allocation2 + $0xa4] ss:$8 sps:$4 sm:$0xff]  }
  0x49   :  { %v1159_v51 = vld [vmem:[#allocation2 + $0x1a4] ss:$8 sps:$4 sm:$0xff]   ;;  %v1161_v52 = vld [vmem:[#allocation2 + $0xa0] ss:$8 sps:$4 sm:$0xff]   ;;  %v1163_v54 = vld [vmem:[#allocation2 + $0xb4] ss:$8 sps:$4 sm:$0xff]  }
  0x4a   :  { %592 = vmatpush1.bf16.msra.mxu0 %v1092_v7  ;;  %1074 = vmatpush1.bf16.msra.mxu1 %v1092_v7  ;;  %v1162_v53 = vld [vmem:[#allocation2 + $0x1a0] ss:$8 sps:$4 sm:$0xff]   ;;  %v1165_v55 = vld [vmem:[#allocation2 + $0x1b4] ss:$8 sps:$4 sm:$0xff]   ;;  %v1167_v56 = vld [vmem:[#allocation2 + $0xb0] ss:$8 sps:$4 sm:$0xff]  }
  0x4b   :  { %593 = vmatprep.subr.bf16.mxu0 %v1294_v0  ;;  %1066 = vmatprep.subr.bf16.mxu1 %v1294_v0  ;;  %v1168_v57 = vld [vmem:[#allocation2 + $0x1b0] ss:$8 sps:$4 sm:$0xff]   ;;  %v1169_v58 = vld [vmem:[#allocation2 + $0xc4] ss:$8 sps:$4 sm:$0xff]   ;;  %v1173_v60 = vld [vmem:[#allocation2 + $0xc0] ss:$8 sps:$4 sm:$0xff]  }
  0x4c   :  { %v1171_v59 = vld [vmem:[#allocation2 + $0x1c4] ss:$8 sps:$4 sm:$0xff]   ;;  %v1174_v61 = vld [vmem:[#allocation2 + $0x1c0] ss:$8 sps:$4 sm:$0xff]   ;;  %v1175_v62 = vld [vmem:[#allocation2 + $0xd4] ss:$8 sps:$4 sm:$0xff]  }
  0x4d   :  { %v1177_v63 = vld [vmem:[#allocation2 + $0x1d4] ss:$8 sps:$4 sm:$0xff]   ;;  %v1180_v1 = vld [vmem:[#allocation2 + $0x1d0] ss:$8 sps:$4 sm:$0xff]   ;;  %v1181_v2 = vld [vmem:[#allocation2 + $0xe4] ss:$8 sps:$4 sm:$0xff]  }
  0x4e   :  { %594 = vmatpush1.bf16.msra.mxu0 %v1093_v8  ;;  %1075 = vmatpush1.bf16.msra.mxu1 %v1093_v8  ;;  %v1183_v3 = vld [vmem:[#allocation2 + $0x1e4] ss:$8 sps:$4 sm:$0xff]   ;;  %v1185_v4 = vld [vmem:[#allocation2 + $0xe0] ss:$8 sps:$4 sm:$0xff]   ;;  %v1187_v6 = vld [vmem:[#allocation2 + $0xf4] ss:$8 sps:$4 sm:$0xff]  }
  0x4f   :  { %595 = vmatprep.subr.bf16.mxu0 %v1294_v0  ;;  %1067 = vmatprep.subr.bf16.mxu1 %v1294_v0  ;;  %v1186_v5 = vld [vmem:[#allocation2 + $0x1e0] ss:$8 sps:$4 sm:$0xff]   ;;  %v1189_v7 = vld [vmem:[#allocation2 + $0x1f4] ss:$8 sps:$4 sm:$0xff]   ;;  %v1191_v8 = vld [vmem:[#allocation2 + $0xf0] ss:$8 sps:$4 sm:$0xff]  }
  0x52   :  { %596 = vmatpush1.bf16.msra.mxu0 %v1094_v9  ;;  %1076 = vmatpush1.bf16.msra.mxu1 %v1094_v9  ;;  %v1192_v9 = vld [vmem:[#allocation2 + $0x1f0] ss:$8 sps:$4 sm:$0xff]  }
  0x53   :  { %597 = vmatprep.subr.bf16.mxu0 %v1294_v0  ;;  %1068 = vmatprep.subr.bf16.mxu1 %v1294_v0 }
  0x56   :  { %598 = vmatpush1.bf16.msra.mxu0 %v1095_v10  ;;  %1077 = vmatpush1.bf16.msra.mxu1 %v1095_v10  ;;  %v1387_v10 = vld [vmem:[#allocation7] ss:$0 sm:$0xff] }
  0x57   :  { %599 = vmatprep.subr.bf16.mxu0 %v1294_v0  ;;  %1069 = vmatprep.subr.bf16.mxu1 %v1294_v0  ;;  %v1179_v0 = vld [vmem:[#allocation2 + $0xd0] ss:$8 sps:$4 sm:$0xff]  }
  0x5a   :  { %600 = vmatpush1.bf16.msra.mxu0 %v1096_v11  ;;  %1078 = vmatpush1.bf16.msra.mxu1 %v1096_v11 }
  0x5d   :  { %616 = vmatmul.mubr.bf16.vlgmr.msra.gmra.mrb[0].mxu0 %v1097_v12  ;;  %744 = vmatmul.mubr.bf16.vlgmr.msra.gmra.mrb[0].mxu1 %v1100_v13 }
  0x5e   :  { %1030 = vmatprep.mubr.msk.bf16.mxu0 %vm486_vm0, %v1103_v14  ;;  %1046 = vmatprep.mubr.msk.bf16.mxu1 %vm486_vm0, %v1105_v15 }
  0x65   :  { %624 = vmatmul.mubr.bf16.gmra.mrb[4].mxu0 %v1107_v16  ;;  %752 = vmatmul.mubr.bf16.gmra.mrb[4].mxu1 %v1108_v17 }
  0x66   :  { %1031 = vmatprep.mubr.msk.bf16.mxu0 %vm486_vm0, %v1109_v18  ;;  %1047 = vmatprep.mubr.msk.bf16.mxu1 %vm486_vm0, %v1111_v19 }
  0x6d   :  { %632 = vmatmul.mubr.bf16.gmra.mrb[8].mxu0 %v1113_v20  ;;  %760 = vmatmul.mubr.bf16.gmra.mrb[8].mxu1 %v1114_v21 }
  0x6e   :  { %1032 = vmatprep.mubr.msk.bf16.mxu0 %vm486_vm0, %v1115_v22  ;;  %1048 = vmatprep.mubr.msk.bf16.mxu1 %vm486_vm0, %v1117_v23 }
  0x75   :  { %640 = vmatmul.mubr.bf16.gmra.mrb[12].mxu0 %v1119_v24  ;;  %768 = vmatmul.mubr.bf16.gmra.mrb[12].mxu1 %v1120_v25 }
  0x76   :  { %1033 = vmatprep.mubr.msk.bf16.mxu0 %vm486_vm0, %v1121_v26  ;;  %1049 = vmatprep.mubr.msk.bf16.mxu1 %vm486_vm0, %v1123_v27 }
  0x7d   :  { %648 = vmatmul.mubr.bf16.gmra.mrb[16].mxu0 %v1125_v28  ;;  %776 = vmatmul.mubr.bf16.gmra.mrb[16].mxu1 %v1126_v29 }
  0x7e   :  { %1034 = vmatprep.mubr.msk.bf16.mxu0 %vm486_vm0, %v1127_v30  ;;  %1050 = vmatprep.mubr.msk.bf16.mxu1 %vm486_vm0, %v1129_v31 }
  0x85   :  { %656 = vmatmul.mubr.bf16.gmra.mrb[20].mxu0 %v1131_v32  ;;  %784 = vmatmul.mubr.bf16.gmra.mrb[20].mxu1 %v1132_v33 }
  0x86   :  { %1035 = vmatprep.mubr.msk.bf16.mxu0 %vm486_vm0, %v1133_v34  ;;  %1051 = vmatprep.mubr.msk.bf16.mxu1 %vm486_vm0, %v1135_v35 }
  0x8d   :  { %664 = vmatmul.mubr.bf16.gmra.mrb[24].mxu0 %v1137_v36  ;;  %792 = vmatmul.mubr.bf16.gmra.mrb[24].mxu1 %v1138_v37 }
  0x8e   :  { %1036 = vmatprep.mubr.msk.bf16.mxu0 %vm486_vm0, %v1139_v38  ;;  %1052 = vmatprep.mubr.msk.bf16.mxu1 %vm486_vm0, %v1141_v39 }
  0x95   :  { %672 = vmatmul.mubr.bf16.gmra.mrb[28].mxu0 %v1143_v40  ;;  %800 = vmatmul.mubr.bf16.gmra.mrb[28].mxu1 %v1144_v41 }
  0x96   :  { %1037 = vmatprep.mubr.msk.bf16.mxu0 %vm486_vm0, %v1145_v42  ;;  %1053 = vmatprep.mubr.msk.bf16.mxu1 %vm486_vm0, %v1147_v43 }
  0x9d   :  { %680 = vmatmul.mubr.bf16.gmra.mrb[32].mxu0 %v1149_v44  ;;  %808 = vmatmul.mubr.bf16.gmra.mrb[32].mxu1 %v1150_v45 }
  0x9e   :  { %1038 = vmatprep.mubr.msk.bf16.mxu0 %vm486_vm0, %v1151_v46  ;;  %1054 = vmatprep.mubr.msk.bf16.mxu1 %vm486_vm0, %v1153_v47 }
  0xa5   :  { %688 = vmatmul.mubr.bf16.gmra.mrb[36].mxu0 %v1155_v48  ;;  %816 = vmatmul.mubr.bf16.gmra.mrb[36].mxu1 %v1156_v49 }
  0xa6   :  { %1039 = vmatprep.mubr.msk.bf16.mxu0 %vm486_vm0, %v1157_v50  ;;  %1055 = vmatprep.mubr.msk.bf16.mxu1 %vm486_vm0, %v1159_v51 }
  0xad   :  { %696 = vmatmul.mubr.bf16.gmra.mrb[40].mxu0 %v1161_v52  ;;  %824 = vmatmul.mubr.bf16.gmra.mrb[40].mxu1 %v1162_v53 }
  0xae   :  { %1040 = vmatprep.mubr.msk.bf16.mxu0 %vm486_vm0, %v1163_v54  ;;  %1056 = vmatprep.mubr.msk.bf16.mxu1 %vm486_vm0, %v1165_v55 }
  0xb5   :  { %704 = vmatmul.mubr.bf16.gmra.mrb[44].mxu0 %v1167_v56  ;;  %832 = vmatmul.mubr.bf16.gmra.mrb[44].mxu1 %v1168_v57 }
  0xb6   :  { %1041 = vmatprep.mubr.msk.bf16.mxu0 %vm486_vm0, %v1169_v58  ;;  %1057 = vmatprep.mubr.msk.bf16.mxu1 %vm486_vm0, %v1171_v59 }
  0xbd   :  { %712 = vmatmul.mubr.bf16.gmra.mrb[48].mxu0 %v1173_v60  ;;  %840 = vmatmul.mubr.bf16.gmra.mrb[48].mxu1 %v1174_v61 }
  0xbe   :  { %1042 = vmatprep.mubr.msk.bf16.mxu0 %vm486_vm0, %v1175_v62  ;;  %1058 = vmatprep.mubr.msk.bf16.mxu1 %vm486_vm0, %v1177_v63 }
  0xc5   :  { %720 = vmatmul.mubr.bf16.gmra.mrb[52].mxu0 %v1179_v0  ;;  %848 = vmatmul.mubr.bf16.gmra.mrb[52].mxu1 %v1180_v1 }
  0xc6   :  { %1043 = vmatprep.mubr.msk.bf16.mxu0 %vm486_vm0, %v1181_v2  ;;  %1059 = vmatprep.mubr.msk.bf16.mxu1 %vm486_vm0, %v1183_v3 }
  0xcd   :  { %728 = vmatmul.mubr.bf16.gmra.mrb[56].mxu0 %v1185_v4  ;;  %856 = vmatmul.mubr.bf16.gmra.mrb[56].mxu1 %v1186_v5 }
  0xce   :  { %1044 = vmatprep.mubr.msk.bf16.mxu0 %vm486_vm0, %v1187_v6  ;;  %1060 = vmatprep.mubr.msk.bf16.mxu1 %vm486_vm0, %v1189_v7 }
  0xd5   :  { %736 = vmatmul.mubr.bf16.gmra.mrb[60].mxu0 %v1191_v8  ;;  %864 = vmatmul.mubr.bf16.gmra.mrb[60].mxu1 %v1192_v9 }
 0x130   :  { %v617_v11 = vpop.f32.mrb[0].mxu0  ;;  %v745_v12 = vpop.f32.mrb[0].mxu1 }
 0x131   :  { %v618_v13 = vadd.f32 %v1387_v10, %v617_v11  ;;  %v746_v14 = vadd.f32 %v1387_v10, %v745_v12  ;;  %v619_v15 = vpop.f32.mrb[1].mxu0  ;;  %v747_v16 = vpop.f32.mrb[1].mxu1 }
 0x132   :  { %v620_v17 = vpop.f32.mrb[2].mxu0  ;;  %v748_v18 = vpop.f32.mrb[2].mxu1 }
 0x133   :  { %873 = vst.msk [vmem:[#allocation8] sm:$0xff] %vm872_vm1, %v618_v13  ;;  %905 = vst.msk [vmem:[#allocation8 + $0x100] sm:$0xff] %vm872_vm1, %v746_v14  ;;  %v621_v19 = vadd.f32 %v1387_v10, %v620_v17  ;;  %v749_v20 = vadd.f32 %v1387_v10, %v748_v18  ;;  %v622_v21 = vpop.f32.mrb[3].mxu0  ;;  %v750_v22 = vpop.f32.mrb[3].mxu1 }
 0x135   :  { %874 = vst.msk [vmem:[#allocation8 + $0x8] sm:$0xff] %vm872_vm1, %v621_v19  ;;  %906 = vst.msk [vmem:[#allocation8 + $0x108] sm:$0xff] %vm872_vm1, %v749_v20 }
 0x138   :  { %v625_v23 = vpop.f32.mrb[4].mxu0  ;;  %v753_v24 = vpop.f32.mrb[4].mxu1 }
 0x139   :  { %v626_v25 = vadd.f32 %v1387_v10, %v625_v23  ;;  %v754_v26 = vadd.f32 %v1387_v10, %v753_v24  ;;  %v627_v27 = vpop.f32.mrb[5].mxu0  ;;  %v755_v28 = vpop.f32.mrb[5].mxu1 }
 0x13a   :  { %v628_v29 = vpop.f32.mrb[6].mxu0  ;;  %v756_v30 = vpop.f32.mrb[6].mxu1 }
 0x13b   :  { %875 = vst.msk [vmem:[#allocation8 + $0x10] sm:$0xff] %vm872_vm1, %v626_v25  ;;  %907 = vst.msk [vmem:[#allocation8 + $0x110] sm:$0xff] %vm872_vm1, %v754_v26  ;;  %v629_v31 = vadd.f32 %v1387_v10, %v628_v29  ;;  %v757_v32 = vadd.f32 %v1387_v10, %v756_v30  ;;  %v630_v33 = vpop.f32.mrb[7].mxu0  ;;  %v758_v34 = vpop.f32.mrb[7].mxu1 }
 0x13d   :  { %876 = vst.msk [vmem:[#allocation8 + $0x18] sm:$0xff] %vm872_vm1, %v629_v31  ;;  %908 = vst.msk [vmem:[#allocation8 + $0x118] sm:$0xff] %vm872_vm1, %v757_v32 }
 0x140   :  { %v633_v35 = vpop.f32.mrb[8].mxu0  ;;  %v761_v36 = vpop.f32.mrb[8].mxu1 }
 0x141   :  { %v634_v37 = vadd.f32 %v1387_v10, %v633_v35  ;;  %v762_v38 = vadd.f32 %v1387_v10, %v761_v36  ;;  %v635_v39 = vpop.f32.mrb[9].mxu0  ;;  %v763_v40 = vpop.f32.mrb[9].mxu1 }
 0x142   :  { %v636_v41 = vpop.f32.mrb[10].mxu0  ;;  %v764_v42 = vpop.f32.mrb[10].mxu1 }
 0x143   :  { %877 = vst.msk [vmem:[#allocation8 + $0x20] sm:$0xff] %vm872_vm1, %v634_v37  ;;  %909 = vst.msk [vmem:[#allocation8 + $0x120] sm:$0xff] %vm872_vm1, %v762_v38  ;;  %v637_v43 = vadd.f32 %v1387_v10, %v636_v41  ;;  %v765_v44 = vadd.f32 %v1387_v10, %v764_v42  ;;  %v638_v45 = vpop.f32.mrb[11].mxu0  ;;  %v766_v46 = vpop.f32.mrb[11].mxu1 }
 0x145   :  { %878 = vst.msk [vmem:[#allocation8 + $0x28] sm:$0xff] %vm872_vm1, %v637_v43  ;;  %910 = vst.msk [vmem:[#allocation8 + $0x128] sm:$0xff] %vm872_vm1, %v765_v44 }
 0x148   :  { %v641_v47 = vpop.f32.mrb[12].mxu0  ;;  %v769_v48 = vpop.f32.mrb[12].mxu1 }
 0x149   :  { %v642_v49 = vadd.f32 %v1387_v10, %v641_v47  ;;  %v770_v50 = vadd.f32 %v1387_v10, %v769_v48  ;;  %v643_v51 = vpop.f32.mrb[13].mxu0  ;;  %v771_v52 = vpop.f32.mrb[13].mxu1 }
 0x14a   :  { %v644_v53 = vpop.f32.mrb[14].mxu0  ;;  %v772_v54 = vpop.f32.mrb[14].mxu1 }
 0x14b   :  { %879 = vst.msk [vmem:[#allocation8 + $0x30] sm:$0xff] %vm872_vm1, %v642_v49  ;;  %911 = vst.msk [vmem:[#allocation8 + $0x130] sm:$0xff] %vm872_vm1, %v770_v50  ;;  %v645_v55 = vadd.f32 %v1387_v10, %v644_v53  ;;  %v773_v56 = vadd.f32 %v1387_v10, %v772_v54  ;;  %v646_v57 = vpop.f32.mrb[15].mxu0  ;;  %v774_v58 = vpop.f32.mrb[15].mxu1 }
 0x14d   :  { %880 = vst.msk [vmem:[#allocation8 + $0x38] sm:$0xff] %vm872_vm1, %v645_v55  ;;  %912 = vst.msk [vmem:[#allocation8 + $0x138] sm:$0xff] %vm872_vm1, %v773_v56 }
 0x150   :  { %v649_v59 = vpop.f32.mrb[16].mxu0  ;;  %v777_v60 = vpop.f32.mrb[16].mxu1 }
 0x151   :  { %v650_v61 = vadd.f32 %v1387_v10, %v649_v59  ;;  %v778_v62 = vadd.f32 %v1387_v10, %v777_v60  ;;  %v651_v63 = vpop.f32.mrb[17].mxu0  ;;  %v779_v0 = vpop.f32.mrb[17].mxu1 }
 0x152   :  { %v652_v1 = vpop.f32.mrb[18].mxu0  ;;  %v780_v2 = vpop.f32.mrb[18].mxu1 }
 0x153   :  { %881 = vst.msk [vmem:[#allocation8 + $0x40] sm:$0xff] %vm872_vm1, %v650_v61  ;;  %913 = vst.msk [vmem:[#allocation8 + $0x140] sm:$0xff] %vm872_vm1, %v778_v62  ;;  %v653_v3 = vadd.f32 %v1387_v10, %v652_v1  ;;  %v781_v4 = vadd.f32 %v1387_v10, %v780_v2  ;;  %v654_v5 = vpop.f32.mrb[19].mxu0  ;;  %v782_v6 = vpop.f32.mrb[19].mxu1 }
 0x155   :  { %882 = vst.msk [vmem:[#allocation8 + $0x48] sm:$0xff] %vm872_vm1, %v653_v3  ;;  %914 = vst.msk [vmem:[#allocation8 + $0x148] sm:$0xff] %vm872_vm1, %v781_v4 }
 0x158   :  { %v657_v7 = vpop.f32.mrb[20].mxu0  ;;  %v785_v8 = vpop.f32.mrb[20].mxu1 }
 0x159   :  { %v658_v9 = vadd.f32 %v1387_v10, %v657_v7  ;;  %v786_v11 = vadd.f32 %v1387_v10, %v785_v8  ;;  %v659_v12 = vpop.f32.mrb[21].mxu0  ;;  %v787_v13 = vpop.f32.mrb[21].mxu1 }
 0x15a   :  { %v660_v14 = vpop.f32.mrb[22].mxu0  ;;  %v788_v15 = vpop.f32.mrb[22].mxu1 }
 0x15b   :  { %883 = vst.msk [vmem:[#allocation8 + $0x50] sm:$0xff] %vm872_vm1, %v658_v9  ;;  %915 = vst.msk [vmem:[#allocation8 + $0x150] sm:$0xff] %vm872_vm1, %v786_v11  ;;  %v661_v16 = vadd.f32 %v1387_v10, %v660_v14  ;;  %v789_v17 = vadd.f32 %v1387_v10, %v788_v15  ;;  %v662_v18 = vpop.f32.mrb[23].mxu0  ;;  %v790_v19 = vpop.f32.mrb[23].mxu1 }
 0x15d   :  { %884 = vst.msk [vmem:[#allocation8 + $0x58] sm:$0xff] %vm872_vm1, %v661_v16  ;;  %916 = vst.msk [vmem:[#allocation8 + $0x158] sm:$0xff] %vm872_vm1, %v789_v17 }
 0x160   :  { %v665_v20 = vpop.f32.mrb[24].mxu0  ;;  %v793_v21 = vpop.f32.mrb[24].mxu1 }
 0x161   :  { %v666_v22 = vadd.f32 %v1387_v10, %v665_v20  ;;  %v794_v23 = vadd.f32 %v1387_v10, %v793_v21  ;;  %v667_v24 = vpop.f32.mrb[25].mxu0  ;;  %v795_v25 = vpop.f32.mrb[25].mxu1 }
 0x162   :  { %v668_v26 = vpop.f32.mrb[26].mxu0  ;;  %v796_v27 = vpop.f32.mrb[26].mxu1 }
 0x163   :  { %885 = vst.msk [vmem:[#allocation8 + $0x60] sm:$0xff] %vm872_vm1, %v666_v22  ;;  %917 = vst.msk [vmem:[#allocation8 + $0x160] sm:$0xff] %vm872_vm1, %v794_v23  ;;  %v669_v28 = vadd.f32 %v1387_v10, %v668_v26  ;;  %v797_v29 = vadd.f32 %v1387_v10, %v796_v27  ;;  %v670_v30 = vpop.f32.mrb[27].mxu0  ;;  %v798_v31 = vpop.f32.mrb[27].mxu1 }
 0x165   :  { %886 = vst.msk [vmem:[#allocation8 + $0x68] sm:$0xff] %vm872_vm1, %v669_v28  ;;  %918 = vst.msk [vmem:[#allocation8 + $0x168] sm:$0xff] %vm872_vm1, %v797_v29 }
 0x168   :  { %v673_v32 = vpop.f32.mrb[28].mxu0  ;;  %v801_v33 = vpop.f32.mrb[28].mxu1 }
 0x169   :  { %v674_v34 = vadd.f32 %v1387_v10, %v673_v32  ;;  %v802_v35 = vadd.f32 %v1387_v10, %v801_v33  ;;  %v675_v36 = vpop.f32.mrb[29].mxu0  ;;  %v803_v37 = vpop.f32.mrb[29].mxu1 }
 0x16a   :  { %v676_v38 = vpop.f32.mrb[30].mxu0  ;;  %v804_v39 = vpop.f32.mrb[30].mxu1 }
 0x16b   :  { %887 = vst.msk [vmem:[#allocation8 + $0x70] sm:$0xff] %vm872_vm1, %v674_v34  ;;  %919 = vst.msk [vmem:[#allocation8 + $0x170] sm:$0xff] %vm872_vm1, %v802_v35  ;;  %v677_v40 = vadd.f32 %v1387_v10, %v676_v38  ;;  %v805_v41 = vadd.f32 %v1387_v10, %v804_v39  ;;  %v678_v42 = vpop.f32.mrb[31].mxu0  ;;  %v806_v43 = vpop.f32.mrb[31].mxu1 }
 0x16d   :  { %888 = vst.msk [vmem:[#allocation8 + $0x78] sm:$0xff] %vm872_vm1, %v677_v40  ;;  %920 = vst.msk [vmem:[#allocation8 + $0x178] sm:$0xff] %vm872_vm1, %v805_v41 }
 0x170   :  { %v681_v44 = vpop.f32.mrb[32].mxu0  ;;  %v809_v45 = vpop.f32.mrb[32].mxu1 }
 0x171   :  { %v682_v46 = vadd.f32 %v1387_v10, %v681_v44  ;;  %v810_v47 = vadd.f32 %v1387_v10, %v809_v45  ;;  %v683_v48 = vpop.f32.mrb[33].mxu0  ;;  %v811_v49 = vpop.f32.mrb[33].mxu1 }
 0x172   :  { %v684_v50 = vpop.f32.mrb[34].mxu0  ;;  %v812_v51 = vpop.f32.mrb[34].mxu1 }
 0x173   :  { %889 = vst.msk [vmem:[#allocation8 + $0x80] sm:$0xff] %vm872_vm1, %v682_v46  ;;  %921 = vst.msk [vmem:[#allocation8 + $0x180] sm:$0xff] %vm872_vm1, %v810_v47  ;;  %v685_v52 = vadd.f32 %v1387_v10, %v684_v50  ;;  %v813_v53 = vadd.f32 %v1387_v10, %v812_v51  ;;  %v686_v54 = vpop.f32.mrb[35].mxu0  ;;  %v814_v55 = vpop.f32.mrb[35].mxu1 }
 0x175   :  { %890 = vst.msk [vmem:[#allocation8 + $0x88] sm:$0xff] %vm872_vm1, %v685_v52  ;;  %922 = vst.msk [vmem:[#allocation8 + $0x188] sm:$0xff] %vm872_vm1, %v813_v53 }
 0x178   :  { %v689_v56 = vpop.f32.mrb[36].mxu0  ;;  %v817_v57 = vpop.f32.mrb[36].mxu1 }
 0x179   :  { %v690_v58 = vadd.f32 %v1387_v10, %v689_v56  ;;  %v818_v59 = vadd.f32 %v1387_v10, %v817_v57  ;;  %v691_v60 = vpop.f32.mrb[37].mxu0  ;;  %v819_v61 = vpop.f32.mrb[37].mxu1 }
 0x17a   :  { %v692_v62 = vpop.f32.mrb[38].mxu0  ;;  %v820_v63 = vpop.f32.mrb[38].mxu1 }
 0x17b   :  { %891 = vst.msk [vmem:[#allocation8 + $0x90] sm:$0xff] %vm872_vm1, %v690_v58  ;;  %923 = vst.msk [vmem:[#allocation8 + $0x190] sm:$0xff] %vm872_vm1, %v818_v59  ;;  %v693_v0 = vadd.f32 %v1387_v10, %v692_v62  ;;  %v821_v1 = vadd.f32 %v1387_v10, %v820_v63  ;;  %v694_v2 = vpop.f32.mrb[39].mxu0  ;;  %v822_v3 = vpop.f32.mrb[39].mxu1 }
 0x17d   :  { %892 = vst.msk [vmem:[#allocation8 + $0x98] sm:$0xff] %vm872_vm1, %v693_v0  ;;  %924 = vst.msk [vmem:[#allocation8 + $0x198] sm:$0xff] %vm872_vm1, %v821_v1 }
 0x180   :  { %v697_v4 = vpop.f32.mrb[40].mxu0  ;;  %v825_v5 = vpop.f32.mrb[40].mxu1 }
 0x181   :  { %v698_v6 = vadd.f32 %v1387_v10, %v697_v4  ;;  %v826_v7 = vadd.f32 %v1387_v10, %v825_v5  ;;  %v699_v8 = vpop.f32.mrb[41].mxu0  ;;  %v827_v9 = vpop.f32.mrb[41].mxu1 }
 0x182   :  { %v700_v11 = vpop.f32.mrb[42].mxu0  ;;  %v828_v12 = vpop.f32.mrb[42].mxu1 }
 0x183   :  { %893 = vst.msk [vmem:[#allocation8 + $0xa0] sm:$0xff] %vm872_vm1, %v698_v6  ;;  %925 = vst.msk [vmem:[#allocation8 + $0x1a0] sm:$0xff] %vm872_vm1, %v826_v7  ;;  %v701_v13 = vadd.f32 %v1387_v10, %v700_v11  ;;  %v829_v14 = vadd.f32 %v1387_v10, %v828_v12  ;;  %v702_v15 = vpop.f32.mrb[43].mxu0  ;;  %v830_v16 = vpop.f32.mrb[43].mxu1 }
 0x185   :  { %894 = vst.msk [vmem:[#allocation8 + $0xa8] sm:$0xff] %vm872_vm1, %v701_v13  ;;  %926 = vst.msk [vmem:[#allocation8 + $0x1a8] sm:$0xff] %vm872_vm1, %v829_v14 }
 0x188   :  { %v705_v17 = vpop.f32.mrb[44].mxu0  ;;  %v833_v18 = vpop.f32.mrb[44].mxu1 }
 0x189   :  { %v706_v19 = vadd.f32 %v1387_v10, %v705_v17  ;;  %v834_v20 = vadd.f32 %v1387_v10, %v833_v18  ;;  %v707_v21 = vpop.f32.mrb[45].mxu0  ;;  %v835_v22 = vpop.f32.mrb[45].mxu1 }
 0x18a   :  { %v708_v23 = vpop.f32.mrb[46].mxu0  ;;  %v836_v24 = vpop.f32.mrb[46].mxu1 }
 0x18b   :  { %895 = vst.msk [vmem:[#allocation8 + $0xb0] sm:$0xff] %vm872_vm1, %v706_v19  ;;  %927 = vst.msk [vmem:[#allocation8 + $0x1b0] sm:$0xff] %vm872_vm1, %v834_v20  ;;  %v709_v25 = vadd.f32 %v1387_v10, %v708_v23  ;;  %v837_v26 = vadd.f32 %v1387_v10, %v836_v24  ;;  %v710_v27 = vpop.f32.mrb[47].mxu0  ;;  %v838_v28 = vpop.f32.mrb[47].mxu1 }
 0x18d   :  { %896 = vst.msk [vmem:[#allocation8 + $0xb8] sm:$0xff] %vm872_vm1, %v709_v25  ;;  %928 = vst.msk [vmem:[#allocation8 + $0x1b8] sm:$0xff] %vm872_vm1, %v837_v26 }
 0x190   :  { %v713_v29 = vpop.f32.mrb[48].mxu0  ;;  %v841_v30 = vpop.f32.mrb[48].mxu1 }
 0x191   :  { %v714_v31 = vadd.f32 %v1387_v10, %v713_v29  ;;  %v842_v32 = vadd.f32 %v1387_v10, %v841_v30  ;;  %v715_v33 = vpop.f32.mrb[49].mxu0  ;;  %v843_v34 = vpop.f32.mrb[49].mxu1 }
 0x192   :  { %v716_v35 = vpop.f32.mrb[50].mxu0  ;;  %v844_v36 = vpop.f32.mrb[50].mxu1 }
 0x193   :  { %897 = vst.msk [vmem:[#allocation8 + $0xc0] sm:$0xff] %vm872_vm1, %v714_v31  ;;  %929 = vst.msk [vmem:[#allocation8 + $0x1c0] sm:$0xff] %vm872_vm1, %v842_v32  ;;  %v717_v37 = vadd.f32 %v1387_v10, %v716_v35  ;;  %v845_v38 = vadd.f32 %v1387_v10, %v844_v36  ;;  %v718_v39 = vpop.f32.mrb[51].mxu0  ;;  %v846_v40 = vpop.f32.mrb[51].mxu1 }
 0x195   :  { %898 = vst.msk [vmem:[#allocation8 + $0xc8] sm:$0xff] %vm872_vm1, %v717_v37  ;;  %930 = vst.msk [vmem:[#allocation8 + $0x1c8] sm:$0xff] %vm872_vm1, %v845_v38 }
 0x198   :  { %v721_v41 = vpop.f32.mrb[52].mxu0  ;;  %v849_v42 = vpop.f32.mrb[52].mxu1 }
 0x199   :  { %v722_v43 = vadd.f32 %v1387_v10, %v721_v41  ;;  %v850_v44 = vadd.f32 %v1387_v10, %v849_v42  ;;  %v723_v45 = vpop.f32.mrb[53].mxu0  ;;  %v851_v46 = vpop.f32.mrb[53].mxu1 }
 0x19a   :  { %v724_v47 = vpop.f32.mrb[54].mxu0  ;;  %v852_v48 = vpop.f32.mrb[54].mxu1 }
 0x19b   :  { %899 = vst.msk [vmem:[#allocation8 + $0xd0] sm:$0xff] %vm872_vm1, %v722_v43  ;;  %931 = vst.msk [vmem:[#allocation8 + $0x1d0] sm:$0xff] %vm872_vm1, %v850_v44  ;;  %v725_v49 = vadd.f32 %v1387_v10, %v724_v47  ;;  %v853_v50 = vadd.f32 %v1387_v10, %v852_v48  ;;  %v726_v51 = vpop.f32.mrb[55].mxu0  ;;  %v854_v52 = vpop.f32.mrb[55].mxu1 }
 0x19d   :  { %900 = vst.msk [vmem:[#allocation8 + $0xd8] sm:$0xff] %vm872_vm1, %v725_v49  ;;  %932 = vst.msk [vmem:[#allocation8 + $0x1d8] sm:$0xff] %vm872_vm1, %v853_v50 }
 0x1a0   :  { %v729_v53 = vpop.f32.mrb[56].mxu0  ;;  %v857_v54 = vpop.f32.mrb[56].mxu1 }
 0x1a1   :  { %v730_v55 = vadd.f32 %v1387_v10, %v729_v53  ;;  %v858_v56 = vadd.f32 %v1387_v10, %v857_v54  ;;  %v731_v57 = vpop.f32.mrb[57].mxu0  ;;  %v859_v58 = vpop.f32.mrb[57].mxu1 }
 0x1a2   :  { %v732_v59 = vpop.f32.mrb[58].mxu0  ;;  %v860_v60 = vpop.f32.mrb[58].mxu1 }
 0x1a3   :  { %901 = vst.msk [vmem:[#allocation8 + $0xe0] sm:$0xff] %vm872_vm1, %v730_v55  ;;  %933 = vst.msk [vmem:[#allocation8 + $0x1e0] sm:$0xff] %vm872_vm1, %v858_v56  ;;  %v733_v61 = vadd.f32 %v1387_v10, %v732_v59  ;;  %v861_v62 = vadd.f32 %v1387_v10, %v860_v60  ;;  %v734_v63 = vpop.f32.mrb[59].mxu0  ;;  %v862_v0 = vpop.f32.mrb[59].mxu1 }
 0x1a5   :  { %902 = vst.msk [vmem:[#allocation8 + $0xe8] sm:$0xff] %vm872_vm1, %v733_v61  ;;  %934 = vst.msk [vmem:[#allocation8 + $0x1e8] sm:$0xff] %vm872_vm1, %v861_v62 }
 0x1a8   :  { %v737_v1 = vpop.f32.mrb[60].mxu0  ;;  %v865_v2 = vpop.f32.mrb[60].mxu1 }
 0x1a9   :  { %v738_v3 = vadd.f32 %v1387_v10, %v737_v1  ;;  %v866_v4 = vadd.f32 %v1387_v10, %v865_v2  ;;  %v739_v5 = vpop.f32.mrb[61].mxu0  ;;  %v867_v6 = vpop.f32.mrb[61].mxu1 }
 0x1aa   :  { %v740_v7 = vpop.f32.mrb[62].mxu0  ;;  %v868_v8 = vpop.f32.mrb[62].mxu1 }
 0x1ab   :  { %903 = vst.msk [vmem:[#allocation8 + $0xf0] sm:$0xff] %vm872_vm1, %v738_v3  ;;  %935 = vst.msk [vmem:[#allocation8 + $0x1f0] sm:$0xff] %vm872_vm1, %v866_v4  ;;  %v741_v9 = vadd.f32 %v1387_v10, %v740_v7  ;;  %v869_v11 = vadd.f32 %v1387_v10, %v868_v8  ;;  %v742_v12 = vpop.f32.mrb[63].mxu0  ;;  %v870_v13 = vpop.f32.mrb[63].mxu1 }
 0x1ad   :  { %904 = vst.msk [vmem:[#allocation8 + $0xf8] sm:$0xff] %vm872_vm1, %v741_v9  ;;  %936 = vst.msk [vmem:[#allocation8 + $0x1f8] sm:$0xff] %vm872_vm1, %v869_v11 }
 0x1ae   :  { %1270 = shalt.err (!%p1267_p0)
}
 0x1af   :  { %s1271_s28 = scalar_lea.hbm %s1535_s3, 8192 }
 0x1b0   :  { %p1272_p1 = scmp.ne.s32.totalorder %s1535_s3, %s1271_s28  ;;  %p1275_p2 = scmp.lt.u32.totalorder %s1271_s28, %s1535_s3 }
 0x1b2   :  { %p1277_p3 = pnand %p1275_p2, %p1272_p1 }
 0x1b4   :  { %1280 = shalt.err (!%p1277_p3)
}
 0x1b5   :  { %948 = dma.vmem_to_hbm [thread:$0]  %s943_s24, 8192, %s1535_s3, [#allocation4], %s1291_s1, %s1291_s1, %s1292_s9  }
 0x1b6   :  { %1285 = dma.done.wait [#allocation4], 8192  }
 0x1b7   :  { %1286 = vsyncadd [#allocation4], 4294959104 }
 0x1b8   :  { %952 = vsyncpa [#allocation3], 1 }
 0x1b9   :  { %953 = vsyncpa [#allocation6], 1 }
 0x1ba   :  { %954 = vsyncpa [#allocation4], 1 }

// kernel: forward.5
= control target key start
LH: loop header
LB: loop body
LE: loop exit
PB: predicated region body
PF: predicated region fallthrough
CT: control target
= control target key end

     0   :  { %11 = vsyncpa [#allocation3], 0  ;;  %s2656_s0 = inlined_call_operand.hbm [shape: bf16[512,144], index: 0, kind: input, shape index: {}]   ;;  %s2657_s1 = inlined_call_operand.hbm [shape: bf16[144,16], index: 1, kind: input, shape index: {}]   ;;  %s2658_s2 = inlined_call_operand.hbm [shape: f32[1,16], index: 2, kind: input, shape index: {}]   ;;  %s2659_s3 = inlined_call_operand.hbm [shape: bf16[16,64], index: 3, kind: input, shape index: {}]   ;;  %s2660_s4 = inlined_call_operand.hbm [shape: f32[1,64], index: 4, kind: input, shape index: {}]   ;;  %s2661_s5 = inlined_call_operand.hbm [shape: f32[512,64], index: 5, kind: input, shape index: {}]   ;;  %s2662_s6 = inlined_call_operand.hbm [shape: f32[512,64], index: 6, kind: output, shape index: {}]  }
   0x1   :  { %12 = vsyncpa [#allocation6], 0 }
   0x2   :  { %13 = vsyncpa [#allocation9], 0 }
   0x3   :  { %14 = vsyncpa [#allocation12], 0 }
   0x4   :  { %15 = vsyncpa [#allocation4], 0  ;;  %s2232_s21 = smov [#allocation5]   ;;  %s2068_s25 = scalar_lea.hbm %s2657_s1, 1152 }
   0x5   :  { %s33_s22 = sshll.u32 %s2232_s21, 4  ;;  %p2069_p0 = scmp.ne.s32.totalorder %s2657_s1, %s2068_s25  ;;  %s34_s22 = int_to_ptr.vmem [resolvable:$true] %s33_s22 }
   0x6   :  { %p2072_p1 = scmp.lt.u32.totalorder %s2068_s25, %s2657_s1 }
   0x8   :  { %p2074_p2 = pnand %p2072_p1, %p2069_p0 }
   0xa   :  { %2077 = shalt.err (!%p2074_p2)
}
   0xb   :  { %s2078_s30 = scalar_lea.vmem %s34_s22, 1152  ;;  %p2083_p4 = scmp.lt.s32.totalorder %s34_s22, %s34_s22 }
   0xc   :  { %p2079_p3 = scmp.ne.s32.totalorder %s34_s22, %s2078_s30  ;;  %p2084_p5 = scmp.lt.s32.totalorder %s2078_s30, %s2078_s30 }
   0xe   :  { %p2085_p6 = por %p2084_p5, %p2083_p4 }
  0x10   :  { %p2086_p7 = pnand %p2085_p6, %p2079_p3 }
  0x12   :  { %2089 = shalt.err (!%p2086_p7)
}
  0x13   :  { %s2233_s7 = smov 64   ;;  %s2234_s8 = smov 4  }
  0x14   :  { %39 = dma.hbm_to_vmem [thread:$0]  %s2657_s1, 1152, %s34_s22, [#allocation6], %s2233_s7, %s2233_s7, %s2234_s8  }
  0x15   :  { %s2235_s11 = smov [#allocation8]   ;;  %s2236_s13 = smov [#allocation2]  }
  0x16   :  { %s55_s12 = sshll.u32 %s2235_s11, 4  ;;  %s21_s14 = sshll.u32 %s2236_s13, 4  ;;  %s56_s12 = int_to_ptr.vmem [resolvable:$true] %s55_s12  ;;  %s22_s14 = int_to_ptr.vmem [resolvable:$true] %s21_s14 }
  0x17   :  { %s2090_s17 = scalar_lea.hbm %s2659_s3, 128 }
  0x18   :  { %p2091_p8 = scmp.ne.s32.totalorder %s2659_s3, %s2090_s17  ;;  %p2094_p9 = scmp.lt.u32.totalorder %s2090_s17, %s2659_s3 }
  0x1a   :  { %p2096_p10 = pnand %p2094_p9, %p2091_p8 }
  0x1c   :  { %2099 = shalt.err (!%p2096_p10)
}
  0x1d   :  { %s2100_s1 = scalar_lea.vmem %s56_s12, 128  ;;  %p2105_p12 = scmp.lt.s32.totalorder %s56_s12, %s56_s12 }
  0x1e   :  { %p2101_p11 = scmp.ne.s32.totalorder %s56_s12, %s2100_s1  ;;  %p2106_p13 = scmp.lt.s32.totalorder %s2100_s1, %s2100_s1 }
  0x20   :  { %p2107_p0 = por %p2106_p13, %p2105_p12 }
  0x22   :  { %p2108_p1 = pnand %p2107_p0, %p2101_p11 }
  0x24   :  { %2111 = shalt.err (!%p2108_p1)
}
  0x25   :  { %61 = dma.hbm_to_vmem [thread:$0]  %s2659_s3, 128, %s56_s12, [#allocation9], %s2233_s7, %s2233_s7, %s2234_s8  }
  0x26   :  { %s2112_s26 = scalar_lea.hbm %s2656_s0, 8192 }
  0x27   :  { %p2113_p2 = scmp.ne.s32.totalorder %s2656_s0, %s2112_s26  ;;  %p2116_p3 = scmp.lt.u32.totalorder %s2112_s26, %s2656_s0 }
  0x29   :  { %p2118_p4 = pnand %p2116_p3, %p2113_p2 }
  0x2b   :  { %2121 = shalt.err (!%p2118_p4)
}
  0x2c   :  { %s2122_s9 = scalar_lea.vmem %s22_s14, 8192  ;;  %p2127_p6 = scmp.lt.s32.totalorder %s22_s14, %s22_s14 }
  0x2d   :  { %p2123_p5 = scmp.ne.s32.totalorder %s22_s14, %s2122_s9  ;;  %p2128_p7 = scmp.lt.s32.totalorder %s2122_s9, %s2122_s9 }
  0x2f   :  { %p2129_p8 = por %p2128_p7, %p2127_p6 }
  0x31   :  { %p2130_p9 = pnand %p2129_p8, %p2123_p5 }
  0x33   :  { %2133 = shalt.err (!%p2130_p9)
}
  0x34   :  { %s2237_s3 = smov 128   ;;  %s2238_s7 = smov 8  }
  0x35   :  { %27 = dma.hbm_to_vmem [thread:$0]  %s2656_s0, 8192, %s22_s14, [#allocation3], %s2237_s3, %s2237_s3, %s2238_s7  }
  0x36   :  { %s2239_s11 = smov [#allocation7]   ;;  %s2240_s13 = smov [#allocation10]  }
  0x37   :  { %s46_s12 = sshll.u32 %s2239_s11, 4  ;;  %s68_s15 = sshll.u32 %s2240_s13, 4  ;;  %s47_s12 = int_to_ptr.vmem [resolvable:$true] %s46_s12  ;;  %s69_s15 = int_to_ptr.vmem [resolvable:$true] %s68_s15 }
  0x38   :  { %s2134_s18 = scalar_lea.hbm %s2658_s2, 16 }
  0x39   :  { %p2135_p10 = scmp.ne.s32.totalorder %s2658_s2, %s2134_s18  ;;  %p2138_p11 = scmp.lt.u32.totalorder %s2134_s18, %s2658_s2 }
  0x3b   :  { %p2140_p12 = pnand %p2138_p11, %p2135_p10 }
  0x3d   :  { %2143 = shalt.err (!%p2140_p12)
}
  0x3e   :  { %s2144_s0 = scalar_lea.vmem %s47_s12, 16  ;;  %s2148_s14 = scalar_lea.vmem %s47_s12, 32 }
  0x3f   :  { %p2145_p13 = scmp.ne.s32.totalorder %s47_s12, %s2144_s0  ;;  %p2149_p0 = scmp.lt.s32.totalorder %s47_s12, %s47_s12 }
  0x40   :  { %p2150_p1 = scmp.lt.s32.totalorder %s2148_s14, %s2144_s0 }
  0x42   :  { %p2151_p2 = por %p2150_p1, %p2149_p0 }
  0x44   :  { %p2152_p3 = pnand %p2151_p2, %p2145_p13 }
  0x46   :  { %2155 = shalt.err (!%p2152_p3)
}
  0x47   :  { %49 = dma.hbm_to_vmem [thread:$0]  %s2658_s2, 16, %s47_s12, [#allocation6]  }
  0x48   :  { %s2156_s26 = scalar_lea.hbm %s2660_s4, 16 }
  0x49   :  { %p2157_p4 = scmp.ne.s32.totalorder %s2660_s4, %s2156_s26  ;;  %p2160_p5 = scmp.lt.u32.totalorder %s2156_s26, %s2660_s4 }
  0x4b   :  { %p2162_p6 = pnand %p2160_p5, %p2157_p4 }
  0x4d   :  { %2165 = shalt.err (!%p2162_p6)
}
  0x4e   :  { %s2166_s9 = scalar_lea.vmem %s69_s15, 16  ;;  %s2170_s8 = scalar_lea.vmem %s69_s15, 32 }
  0x4f   :  { %p2167_p7 = scmp.ne.s32.totalorder %s69_s15, %s2166_s9  ;;  %p2171_p8 = scmp.lt.s32.totalorder %s69_s15, %s69_s15 }
  0x50   :  { %p2172_p9 = scmp.lt.s32.totalorder %s2170_s8, %s2166_s9 }
  0x52   :  { %p2173_p10 = por %p2172_p9, %p2171_p8 }
  0x54   :  { %p2174_p11 = pnand %p2173_p10, %p2167_p7 }
  0x56   :  { %2177 = shalt.err (!%p2174_p11)
}
  0x57   :  { %71 = dma.hbm_to_vmem [thread:$0]  %s2660_s4, 16, %s69_s15, [#allocation9]  }
  0x58   :  { %s2241_s11 = smov [#allocation11]   ;;  %s2178_s17 = scalar_lea.hbm %s2661_s5, 8192 }
  0x59   :  { %s77_s12 = sshll.u32 %s2241_s11, 4  ;;  %p2179_p12 = scmp.ne.s32.totalorder %s2661_s5, %s2178_s17  ;;  %s78_s12 = int_to_ptr.vmem [resolvable:$true] %s77_s12 }
  0x5a   :  { %p2182_p13 = scmp.lt.u32.totalorder %s2178_s17, %s2661_s5 }
  0x5c   :  { %p2184_p0 = pnand %p2182_p13, %p2179_p12 }
  0x5e   :  { %2187 = shalt.err (!%p2184_p0)
}
  0x5f   :  { %s2188_s1 = scalar_lea.vmem %s78_s12, 8192  ;;  %p2193_p2 = scmp.lt.s32.totalorder %s78_s12, %s78_s12 }
  0x60   :  { %p2189_p1 = scmp.ne.s32.totalorder %s78_s12, %s2188_s1  ;;  %p2194_p3 = scmp.lt.s32.totalorder %s2188_s1, %s2188_s1 }
  0x62   :  { %p2195_p4 = por %p2194_p3, %p2193_p2 }
  0x64   :  { %p2196_p5 = pnand %p2195_p4, %p2189_p1 }
  0x66   :  { %2199 = shalt.err (!%p2196_p5)
}
  0x67   :  { %83 = dma.hbm_to_vmem [thread:$0]  %s2661_s5, 8192, %s78_s12, [#allocation12], %s2237_s3, %s2237_s3, %s2238_s7  }
  0x68   :  { %2222 = dma.done.wait [#allocation3], 8192  }
  0x69   :  { %2223 = vsyncadd [#allocation3], 4294959104 }
  0x6a   :  { %2224 = dma.done.wait [#allocation6], 1168  }
  0x6b   :  { %2225 = vsyncadd [#allocation6], 4294966128 }
  0x6c   :  { %2226 = dma.done.wait [#allocation9], 144  }
  0x6d   :  { %2227 = vsyncadd [#allocation9], 4294967152 }
  0x6e   :  { %2228 = dma.done.wait [#allocation12], 8192  }
  0x6f   :  { %2229 = vsyncadd [#allocation12], 4294959104  ;;  %v2242_v0 = vmov 0   ;;  %v1962_v1 = vld [vmem:[#allocation5] sm:$0xff]   ;;  %v1963_v2 = vld [vmem:[#allocation5 + $0x8] sm:$0xff]   ;;  %vm534_vm0 = vcmask 130048  }
  0x70   :  { %631 = vmatprep.subr.bf16.mxu0 %v2242_v0  ;;  %1932 = vmatprep.subr.bf16.mxu1 %v2242_v0  ;;  %v1964_v3 = vld [vmem:[#allocation5 + $0x10] sm:$0xff]   ;;  %v1965_v4 = vld [vmem:[#allocation5 + $0x18] sm:$0xff]   ;;  %v1973_v5 = vld [vmem:[#allocation2 + $0x4] ss:$8 sps:$4 sm:$0xff]   ;;  %vm1608_vm1 = vcmask 523264   ;;  %s2243_s5 = smov [#allocation13]  }
  0x71   :  { %632 = vmatpush1.bf16.msra.mxu0 %v1962_v1  ;;  %1941 = vmatpush1.bf16.msra.mxu1 %v1962_v1  ;;  %v1966_v6 = vld [vmem:[#allocation5 + $0x20] sm:$0xff]   ;;  %v1967_v7 = vld [vmem:[#allocation5 + $0x28] sm:$0xff]   ;;  %v1968_v8 = vld [vmem:[#allocation5 + $0x30] sm:$0xff]   ;;  %s1678_s0 = sshll.u32 %s2243_s5, 4  ;;  %s1679_s0 = int_to_ptr.vmem [resolvable:$true] %s1678_s0 }
  0x72   :  { %633 = vmatprep.subr.bf16.mxu0 %v2242_v0  ;;  %1933 = vmatprep.subr.bf16.mxu1 %v2242_v0  ;;  %v1969_v9 = vld [vmem:[#allocation5 + $0x38] sm:$0xff]   ;;  %v1970_v10 = vld [vmem:[#allocation5 + $0x40] sm:$0xff]   ;;  %v2067_v53 = vld [vmem:[#allocation8] sm:$0xff]   ;;  %s2200_s14 = scalar_lea.vmem %s1679_s0, 8192  ;;  %p2205_p7 = scmp.lt.s32.totalorder %s1679_s0, %s1679_s0 }
  0x73   :  { %1767 = vmatprep.mubr.msk.bf16.mxu0 %vm534_vm0, %v1973_v5  ;;  %v1971_v11 = vld [vmem:[#allocation2] ss:$8 sps:$4 sm:$0xff]   ;;  %v1974_v12 = vld [vmem:[#allocation2 + $0x14] ss:$8 sps:$4 sm:$0xff]   ;;  %v1976_v13 = vld [vmem:[#allocation2 + $0x10] ss:$8 sps:$4 sm:$0xff]   ;;  %p2201_p6 = scmp.ne.s32.totalorder %s1679_s0, %s2200_s14  ;;  %p2206_p8 = scmp.lt.s32.totalorder %s2200_s14, %s2200_s14 }
  0x74   :  { %v1977_v14 = vld [vmem:[#allocation2 + $0x24] ss:$8 sps:$4 sm:$0xff]   ;;  %v1979_v15 = vld [vmem:[#allocation2 + $0x20] ss:$8 sps:$4 sm:$0xff]   ;;  %v1980_v16 = vld [vmem:[#allocation2 + $0x34] ss:$8 sps:$4 sm:$0xff]  }
  0x75   :  { %634 = vmatpush1.bf16.msra.mxu0 %v1963_v2  ;;  %1942 = vmatpush1.bf16.msra.mxu1 %v1963_v2  ;;  %v1982_v17 = vld [vmem:[#allocation2 + $0x30] ss:$8 sps:$4 sm:$0xff]   ;;  %v1983_v18 = vld [vmem:[#allocation2 + $0x44] ss:$8 sps:$4 sm:$0xff]   ;;  %v2031_v19 = vld [vmem:[#allocation2 + $0x180] ss:$8 sps:$4 sm:$0xff]   ;;  %p2207_p9 = por %p2206_p8, %p2205_p7 }
  0x76   :  { %635 = vmatprep.subr.bf16.mxu0 %v2242_v0  ;;  %1934 = vmatprep.subr.bf16.mxu1 %v2242_v0  ;;  %v2033_v20 = vld [vmem:[#allocation2 + $0x184] ss:$8 sps:$4 sm:$0xff]   ;;  %v1985_v21 = vld [vmem:[#allocation2 + $0x40] ss:$8 sps:$4 sm:$0xff]   ;;  %v1986_v22 = vld [vmem:[#allocation2 + $0x54] ss:$8 sps:$4 sm:$0xff]  }
  0x77   :  { %1791 = vmatprep.mubr.msk.bf16.mxu1 %vm534_vm0, %v2033_v20  ;;  %v2037_v23 = vld [vmem:[#allocation2 + $0x194] ss:$8 sps:$4 sm:$0xff]   ;;  %v2039_v24 = vld [vmem:[#allocation2 + $0x190] ss:$8 sps:$4 sm:$0xff]   ;;  %v1989_v26 = vld [vmem:[#allocation2 + $0x64] ss:$8 sps:$4 sm:$0xff]   ;;  %p2208_p10 = pnand %p2207_p9, %p2201_p6 }
  0x78   :  { %v1988_v25 = vld [vmem:[#allocation2 + $0x50] ss:$8 sps:$4 sm:$0xff]   ;;  %v2043_v27 = vld [vmem:[#allocation2 + $0x1a4] ss:$8 sps:$4 sm:$0xff]   ;;  %v2045_v28 = vld [vmem:[#allocation2 + $0x1a0] ss:$8 sps:$4 sm:$0xff]  }
  0x79   :  { %636 = vmatpush1.bf16.msra.mxu0 %v1964_v3  ;;  %1943 = vmatpush1.bf16.msra.mxu1 %v1964_v3  ;;  %v1991_v29 = vld [vmem:[#allocation2 + $0x60] ss:$8 sps:$4 sm:$0xff]   ;;  %v1992_v30 = vld [vmem:[#allocation2 + $0x74] ss:$8 sps:$4 sm:$0xff]   ;;  %v2051_v32 = vld [vmem:[#allocation2 + $0x1b0] ss:$8 sps:$4 sm:$0xff]  }
  0x7a   :  { %637 = vmatprep.subr.bf16.mxu0 %v2242_v0  ;;  %1935 = vmatprep.subr.bf16.mxu1 %v2242_v0  ;;  %v2049_v31 = vld [vmem:[#allocation2 + $0x1b4] ss:$8 sps:$4 sm:$0xff]   ;;  %v1994_v33 = vld [vmem:[#allocation2 + $0x70] ss:$8 sps:$4 sm:$0xff]   ;;  %v1995_v34 = vld [vmem:[#allocation2 + $0x84] ss:$8 sps:$4 sm:$0xff]  }
  0x7b   :  { %v2055_v35 = vld [vmem:[#allocation2 + $0x1c4] ss:$8 sps:$4 sm:$0xff]   ;;  %v2057_v36 = vld [vmem:[#allocation2 + $0x1c0] ss:$8 sps:$4 sm:$0xff]   ;;  %v2058_v37 = vld [vmem:[#allocation2 + $0x1d4] ss:$8 sps:$4 sm:$0xff]  }
  0x7c   :  { %v1997_v38 = vld [vmem:[#allocation2 + $0x80] ss:$8 sps:$4 sm:$0xff]   ;;  %v1998_v39 = vld [vmem:[#allocation2 + $0x94] ss:$8 sps:$4 sm:$0xff]   ;;  %v2060_v40 = vld [vmem:[#allocation2 + $0x1d0] ss:$8 sps:$4 sm:$0xff]  }
  0x7d   :  { %638 = vmatpush1.bf16.msra.mxu0 %v1965_v4  ;;  %1944 = vmatpush1.bf16.msra.mxu1 %v1965_v4  ;;  %v2061_v41 = vld [vmem:[#allocation2 + $0x1e4] ss:$8 sps:$4 sm:$0xff]   ;;  %v2000_v42 = vld [vmem:[#allocation2 + $0x90] ss:$8 sps:$4 sm:$0xff]   ;;  %v2063_v44 = vld [vmem:[#allocation2 + $0x1e0] ss:$8 sps:$4 sm:$0xff]  }
  0x7e   :  { %639 = vmatprep.subr.bf16.mxu0 %v2242_v0  ;;  %1936 = vmatprep.subr.bf16.mxu1 %v2242_v0  ;;  %v2001_v43 = vld [vmem:[#allocation2 + $0xa4] ss:$8 sps:$4 sm:$0xff]   ;;  %v2003_v45 = vld [vmem:[#allocation2 + $0xa0] ss:$8 sps:$4 sm:$0xff]   ;;  %v2004_v46 = vld [vmem:[#allocation2 + $0xb4] ss:$8 sps:$4 sm:$0xff]  }
  0x7f   :  { %v2064_v47 = vld [vmem:[#allocation2 + $0x1f4] ss:$8 sps:$4 sm:$0xff]   ;;  %v2066_v48 = vld [vmem:[#allocation2 + $0x1f0] ss:$8 sps:$4 sm:$0xff]   ;;  %v2007_v50 = vld [vmem:[#allocation2 + $0xc4] ss:$8 sps:$4 sm:$0xff]  }
  0x80   :  { %v2006_v49 = vld [vmem:[#allocation2 + $0xb0] ss:$8 sps:$4 sm:$0xff]   ;;  %v2009_v51 = vld [vmem:[#allocation2 + $0xc0] ss:$8 sps:$4 sm:$0xff]   ;;  %v2010_v52 = vld [vmem:[#allocation2 + $0xd4] ss:$8 sps:$4 sm:$0xff]  }
  0x81   :  { %640 = vmatpush1.bf16.msra.mxu0 %v1966_v6  ;;  %1945 = vmatpush1.bf16.msra.mxu1 %v1966_v6  ;;  %v2012_v54 = vld [vmem:[#allocation2 + $0xd0] ss:$8 sps:$4 sm:$0xff]   ;;  %v2013_v55 = vld [vmem:[#allocation2 + $0xe4] ss:$8 sps:$4 sm:$0xff]   ;;  %v2015_v56 = vld [vmem:[#allocation2 + $0xe0] ss:$8 sps:$4 sm:$0xff]  }
  0x82   :  { %641 = vmatprep.subr.bf16.mxu0 %v2242_v0  ;;  %1937 = vmatprep.subr.bf16.mxu1 %v2242_v0  ;;  %v2016_v57 = vld [vmem:[#allocation2 + $0xf4] ss:$8 sps:$4 sm:$0xff]   ;;  %v2018_v58 = vld [vmem:[#allocation2 + $0xf0] ss:$8 sps:$4 sm:$0xff]   ;;  %v2019_v59 = vld [vmem:[#allocation2 + $0x104] ss:$8 sps:$4 sm:$0xff]  }
  0x83   :  { %v2021_v60 = vld [vmem:[#allocation2 + $0x100] ss:$8 sps:$4 sm:$0xff]   ;;  %v2022_v61 = vld [vmem:[#allocation2 + $0x114] ss:$8 sps:$4 sm:$0xff]   ;;  %v2024_v62 = vld [vmem:[#allocation2 + $0x110] ss:$8 sps:$4 sm:$0xff]  }
  0x84   :  { %v2025_v63 = vld [vmem:[#allocation2 + $0x124] ss:$8 sps:$4 sm:$0xff]   ;;  %v2028_v1 = vld [vmem:[#allocation2 + $0x134] ss:$8 sps:$4 sm:$0xff]   ;;  %v2030_v2 = vld [vmem:[#allocation2 + $0x130] ss:$8 sps:$4 sm:$0xff]  }
  0x85   :  { %642 = vmatpush1.bf16.msra.mxu0 %v1967_v7  ;;  %1946 = vmatpush1.bf16.msra.mxu1 %v1967_v7  ;;  %v2034_v3 = vld [vmem:[#allocation2 + $0x144] ss:$8 sps:$4 sm:$0xff]   ;;  %v2036_v4 = vld [vmem:[#allocation2 + $0x140] ss:$8 sps:$4 sm:$0xff]   ;;  %v2040_v5 = vld [vmem:[#allocation2 + $0x154] ss:$8 sps:$4 sm:$0xff]  }
  0x86   :  { %643 = vmatprep.subr.bf16.mxu0 %v2242_v0  ;;  %1938 = vmatprep.subr.bf16.mxu1 %v2242_v0  ;;  %v2042_v6 = vld [vmem:[#allocation2 + $0x150] ss:$8 sps:$4 sm:$0xff]   ;;  %v2046_v7 = vld [vmem:[#allocation2 + $0x164] ss:$8 sps:$4 sm:$0xff]  }
  0x89   :  { %644 = vmatpush1.bf16.msra.mxu0 %v1968_v8  ;;  %1947 = vmatpush1.bf16.msra.mxu1 %v1968_v8  ;;  %v2048_v8 = vld [vmem:[#allocation2 + $0x160] ss:$8 sps:$4 sm:$0xff]  }
  0x8a   :  { %645 = vmatprep.subr.bf16.mxu0 %v2242_v0  ;;  %1939 = vmatprep.subr.bf16.mxu1 %v2242_v0 }
  0x8d   :  { %646 = vmatpush1.bf16.msra.mxu0 %v1969_v9  ;;  %1948 = vmatpush1.bf16.msra.mxu1 %v1969_v9  ;;  %v2052_v9 = vld [vmem:[#allocation2 + $0x174] ss:$8 sps:$4 sm:$0xff]  }
  0x8e   :  { %647 = vmatprep.subr.bf16.mxu0 %v2242_v0  ;;  %1940 = vmatprep.subr.bf16.mxu1 %v2242_v0  ;;  %v2027_v0 = vld [vmem:[#allocation2 + $0x120] ss:$8 sps:$4 sm:$0xff]  }
  0x91   :  { %648 = vmatpush1.bf16.msra.mxu0 %v1970_v10  ;;  %1949 = vmatpush1.bf16.msra.mxu1 %v1970_v10  ;;  %v2054_v10 = vld [vmem:[#allocation2 + $0x170] ss:$8 sps:$4 sm:$0xff]  }
  0x92   :  { %1866 = vmatprep.subr.bf16.mxu1 %v2067_v53 }
  0x94   :  { %664 = vmatmul.mubr.bf16.vlgmr.msra.gmra.mrb[0].mxu0 %v1971_v11  ;;  %856 = vmatmul.mubr.bf16.vlgmr.msra.gmra.mrb[0].mxu1 %v2031_v19  ;;  %v2389_v11 = vld [vmem:[#allocation7] ss:$0 sm:$0xff] }
  0x95   :  { %1768 = vmatprep.mubr.msk.bf16.mxu0 %vm534_vm0, %v1974_v12  ;;  %1792 = vmatprep.mubr.msk.bf16.mxu1 %vm534_vm0, %v2037_v23 }
  0x96   :  { %1867 = vmatpush3.bf16.msra.mxu1 %v2067_v53 }
  0x9c   :  { %672 = vmatmul.mubr.bf16.gmra.mrb[4].mxu0 %v1976_v13  ;;  %864 = vmatmul.mubr.bf16.gmra.mrb[4].mxu1 %v2039_v24 }
  0x9d   :  { %1769 = vmatprep.mubr.msk.bf16.mxu0 %vm534_vm0, %v1977_v14  ;;  %1793 = vmatprep.mubr.msk.bf16.mxu1 %vm534_vm0, %v2043_v27 }
  0xa4   :  { %680 = vmatmul.mubr.bf16.gmra.mrb[8].mxu0 %v1979_v15  ;;  %872 = vmatmul.mubr.bf16.gmra.mrb[8].mxu1 %v2045_v28 }
  0xa5   :  { %1770 = vmatprep.mubr.msk.bf16.mxu0 %vm534_vm0, %v1980_v16  ;;  %1794 = vmatprep.mubr.msk.bf16.mxu1 %vm534_vm0, %v2049_v31 }
  0xac   :  { %688 = vmatmul.mubr.bf16.gmra.mrb[12].mxu0 %v1982_v17  ;;  %880 = vmatmul.mubr.bf16.gmra.mrb[12].mxu1 %v2051_v32 }
  0xad   :  { %1771 = vmatprep.mubr.msk.bf16.mxu0 %vm534_vm0, %v1983_v18  ;;  %1795 = vmatprep.mubr.msk.bf16.mxu1 %vm534_vm0, %v2055_v35 }
  0xb4   :  { %696 = vmatmul.mubr.bf16.gmra.mrb[16].mxu0 %v1985_v21  ;;  %888 = vmatmul.mubr.bf16.gmra.mrb[16].mxu1 %v2057_v36 }
  0xb5   :  { %1772 = vmatprep.mubr.msk.bf16.mxu0 %vm534_vm0, %v1986_v22  ;;  %1796 = vmatprep.mubr.msk.bf16.mxu1 %vm534_vm0, %v2058_v37 }
  0xbc   :  { %704 = vmatmul.mubr.bf16.gmra.mrb[20].mxu0 %v1988_v25  ;;  %896 = vmatmul.mubr.bf16.gmra.mrb[20].mxu1 %v2060_v40 }
  0xbd   :  { %1773 = vmatprep.mubr.msk.bf16.mxu0 %vm534_vm0, %v1989_v26  ;;  %1797 = vmatprep.mubr.msk.bf16.mxu1 %vm534_vm0, %v2061_v41 }
  0xc4   :  { %712 = vmatmul.mubr.bf16.gmra.mrb[24].mxu0 %v1991_v29  ;;  %904 = vmatmul.mubr.bf16.gmra.mrb[24].mxu1 %v2063_v44 }
  0xc5   :  { %1774 = vmatprep.mubr.msk.bf16.mxu0 %vm534_vm0, %v1992_v30  ;;  %1798 = vmatprep.mubr.msk.bf16.mxu1 %vm534_vm0, %v2064_v47 }
  0xcc   :  { %720 = vmatmul.mubr.bf16.gmra.mrb[28].mxu0 %v1994_v33  ;;  %912 = vmatmul.mubr.bf16.gmra.mrb[28].mxu1 %v2066_v48 }
  0xcd   :  { %1775 = vmatprep.mubr.msk.bf16.mxu0 %vm534_vm0, %v1995_v34 }
  0xd4   :  { %728 = vmatmul.mubr.bf16.gmra.mrb[32].mxu0 %v1997_v38 }
  0xd5   :  { %1776 = vmatprep.mubr.msk.bf16.mxu0 %vm534_vm0, %v1998_v39 }
  0xdc   :  { %736 = vmatmul.mubr.bf16.gmra.mrb[36].mxu0 %v2000_v42 }
  0xdd   :  { %1777 = vmatprep.mubr.msk.bf16.mxu0 %vm534_vm0, %v2001_v43 }
  0xe4   :  { %744 = vmatmul.mubr.bf16.gmra.mrb[40].mxu0 %v2003_v45 }
  0xe5   :  { %1778 = vmatprep.mubr.msk.bf16.mxu0 %vm534_vm0, %v2004_v46 }
  0xec   :  { %752 = vmatmul.mubr.bf16.gmra.mrb[44].mxu0 %v2006_v49 }
  0xed   :  { %1779 = vmatprep.mubr.msk.bf16.mxu0 %vm534_vm0, %v2007_v50 }
  0xf4   :  { %760 = vmatmul.mubr.bf16.gmra.mrb[48].mxu0 %v2009_v51 }
  0xf5   :  { %1780 = vmatprep.mubr.msk.bf16.mxu0 %vm534_vm0, %v2010_v52 }
  0xfc   :  { %768 = vmatmul.mubr.bf16.gmra.mrb[52].mxu0 %v2012_v54 }
  0xfd   :  { %1781 = vmatprep.mubr.msk.bf16.mxu0 %vm534_vm0, %v2013_v55 }
 0x104   :  { %776 = vmatmul.mubr.bf16.gmra.mrb[56].mxu0 %v2015_v56 }
 0x105   :  { %1782 = vmatprep.mubr.msk.bf16.mxu0 %vm534_vm0, %v2016_v57 }
 0x10c   :  { %784 = vmatmul.mubr.bf16.gmra.mrb[60].mxu0 %v2018_v58 }
 0x10d   :  { %1783 = vmatprep.mubr.msk.bf16.mxu0 %vm534_vm0, %v2019_v59 }
 0x114   :  { %792 = vmatmul.mubr.bf16.gmra.mrb[64].mxu0 %v2021_v60 }
 0x115   :  { %1784 = vmatprep.mubr.msk.bf16.mxu0 %vm534_vm0, %v2022_v61 }
 0x11c   :  { %800 = vmatmul.mubr.bf16.gmra.mrb[68].mxu0 %v2024_v62 }
 0x11d   :  { %1785 = vmatprep.mubr.msk.bf16.mxu0 %vm534_vm0, %v2025_v63 }
 0x124   :  { %808 = vmatmul.mubr.bf16.gmra.mrb[72].mxu0 %v2027_v0 }
 0x125   :  { %1786 = vmatprep.mubr.msk.bf16.mxu0 %vm534_vm0, %v2028_v1 }
 0x12c   :  { %816 = vmatmul.mubr.bf16.gmra.mrb[76].mxu0 %v2030_v2 }
 0x12d   :  { %1787 = vmatprep.mubr.msk.bf16.mxu0 %vm534_vm0, %v2034_v3 }
 0x134   :  { %824 = vmatmul.mubr.bf16.gmra.mrb[80].mxu0 %v2036_v4 }
 0x135   :  { %1788 = vmatprep.mubr.msk.bf16.mxu0 %vm534_vm0, %v2040_v5 }
 0x13c   :  { %832 = vmatmul.mubr.bf16.gmra.mrb[84].mxu0 %v2042_v6 }
 0x13d   :  { %1789 = vmatprep.mubr.msk.bf16.mxu0 %vm534_vm0, %v2046_v7 }
 0x144   :  { %840 = vmatmul.mubr.bf16.gmra.mrb[88].mxu0 %v2048_v8 }
 0x145   :  { %1790 = vmatprep.mubr.msk.bf16.mxu0 %vm534_vm0, %v2052_v9 }
 0x14c   :  { %848 = vmatmul.mubr.bf16.gmra.mrb[92].mxu0 %v2054_v10 }
 0x167   :  { %v665_v12 = vpop.f32.mrb[0].mxu0  ;;  %v857_v47 = vpop.f32.mrb[0].mxu1 }
 0x168   :  { %v666_v13 = vadd.f32 %v2389_v11, %v665_v12  ;;  %v667_v14 = vpop.f32.mrb[1].mxu0  ;;  %v859_v48 = vpop.f32.mrb[1].mxu1  ;;  %v858_v50 = vadd.f32 %v2389_v11, %v857_v47 }
 0x169   :  { %v668_v15 = vpop.f32.mrb[2].mxu0  ;;  %v860_v51 = vpop.f32.mrb[2].mxu1 }
 0x16a   :  { %v669_v16 = vadd.f32 %v2389_v11, %v668_v15  ;;  %v670_v17 = vpop.f32.mrb[3].mxu0  ;;  %v920_v18 = vmax.f32 %v666_v13, 0.0  ;;  %v861_v53 = vadd.f32 %v2389_v11, %v860_v51  ;;  %v862_v54 = vpop.f32.mrb[3].mxu1  ;;  %v968_v57 = vmax.f32 %v858_v50, 0.0 }
 0x16c   :  { %v921_v19 = vmax.f32 %v669_v16, 0.0  ;;  %v969_v59 = vmax.f32 %v861_v53, 0.0 }
 0x16e   :  { %v984_v20 = vpack.c.bf16 %v921_v19, %v920_v18  ;;  %v2407_v62 = vpack.c.bf16 %v969_v59, %v968_v57 }
 0x16f   :  { %v673_v21 = vpop.f32.mrb[4].mxu0  ;;  %v865_v1 = vpop.f32.mrb[4].mxu1 }
 0x170   :  { %v674_v22 = vadd.f32 %v2389_v11, %v673_v21  ;;  %v675_v23 = vpop.f32.mrb[5].mxu0  ;;  %1868 = vmatprep.mubr.msk.bf16.mxu1 %vm534_vm0, %v984_v20  ;;  %v867_v2 = vpop.f32.mrb[5].mxu1  ;;  %v866_v4 = vadd.f32 %v2389_v11, %v865_v1 }
 0x171   :  { %v676_v24 = vpop.f32.mrb[6].mxu0  ;;  %v868_v5 = vpop.f32.mrb[6].mxu1 }
 0x172   :  { %v677_v25 = vadd.f32 %v2389_v11, %v676_v24  ;;  %v678_v26 = vpop.f32.mrb[7].mxu0  ;;  %v922_v27 = vmax.f32 %v674_v22, 0.0  ;;  %v869_v7 = vadd.f32 %v2389_v11, %v868_v5  ;;  %v870_v8 = vpop.f32.mrb[7].mxu1  ;;  %v970_v12 = vmax.f32 %v866_v4, 0.0 }
 0x174   :  { %v923_v28 = vmax.f32 %v677_v25, 0.0  ;;  %v971_v14 = vmax.f32 %v869_v7, 0.0 }
 0x176   :  { %v985_v29 = vpack.c.bf16 %v923_v28, %v922_v27  ;;  %v2414_v17 = vpack.c.bf16 %v971_v14, %v970_v12 }
 0x177   :  { %v681_v30 = vpop.f32.mrb[8].mxu0  ;;  %v873_v20 = vpop.f32.mrb[8].mxu1 }
 0x178   :  { %v682_v31 = vadd.f32 %v2389_v11, %v681_v30  ;;  %v683_v32 = vpop.f32.mrb[9].mxu0  ;;  %1869 = vmatmul.mubr.msk.bf16.vlgmr.msra.gmra.mrb[32].mxu1 %vm534_vm0, %v985_v29  ;;  %v875_v21 = vpop.f32.mrb[9].mxu1  ;;  %v874_v23 = vadd.f32 %v2389_v11, %v873_v20 }
 0x179   :  { %v684_v33 = vpop.f32.mrb[10].mxu0  ;;  %v876_v24 = vpop.f32.mrb[10].mxu1 }
 0x17a   :  { %v685_v34 = vadd.f32 %v2389_v11, %v684_v33  ;;  %v686_v35 = vpop.f32.mrb[11].mxu0  ;;  %v924_v36 = vmax.f32 %v682_v31, 0.0  ;;  %v877_v26 = vadd.f32 %v2389_v11, %v876_v24  ;;  %v878_v27 = vpop.f32.mrb[11].mxu1  ;;  %v972_v30 = vmax.f32 %v874_v23, 0.0 }
 0x17c   :  { %v925_v37 = vmax.f32 %v685_v34, 0.0  ;;  %v973_v32 = vmax.f32 %v877_v26, 0.0 }
 0x17e   :  { %v986_v38 = vpack.c.bf16 %v925_v37, %v924_v36  ;;  %v2421_v35 = vpack.c.bf16 %v973_v32, %v972_v30 }
 0x17f   :  { %v689_v39 = vpop.f32.mrb[12].mxu0 }
 0x180   :  { %v690_v40 = vadd.f32 %v2389_v11, %v689_v39  ;;  %v691_v41 = vpop.f32.mrb[13].mxu0  ;;  %1872 = vmatprep.mubr.msk.bf16.mxu1 %vm534_vm0, %v986_v38  ;;  %v881_v38 = vpop.f32.mrb[12].mxu1 }
 0x181   :  { %v692_v42 = vpop.f32.mrb[14].mxu0  ;;  %v883_v39 = vpop.f32.mrb[13].mxu1  ;;  %v882_v41 = vadd.f32 %v2389_v11, %v881_v38 }
 0x182   :  { %v693_v43 = vadd.f32 %v2389_v11, %v692_v42  ;;  %v694_v44 = vpop.f32.mrb[15].mxu0  ;;  %v926_v45 = vmax.f32 %v690_v40, 0.0  ;;  %v884_v42 = vpop.f32.mrb[14].mxu1 }
 0x183   :  { %v885_v44 = vadd.f32 %v2389_v11, %v884_v42  ;;  %v974_v48 = vmax.f32 %v882_v41, 0.0 }
 0x184   :  { %v927_v46 = vmax.f32 %v693_v43, 0.0 }
 0x185   :  { %v975_v50 = vmax.f32 %v885_v44, 0.0 }
 0x186   :  { %v987_v49 = vpack.c.bf16 %v927_v46, %v926_v45  ;;  %v886_v45 = vpop.f32.mrb[15].mxu1 }
 0x187   :  { %v697_v52 = vpop.f32.mrb[16].mxu0  ;;  %v2428_v53 = vpack.c.bf16 %v975_v50, %v974_v48 }
 0x188   :  { %v698_v55 = vadd.f32 %v2389_v11, %v697_v52  ;;  %v699_v56 = vpop.f32.mrb[17].mxu0  ;;  %1873 = vmatmul.mubr.msk.bf16.gmra.mrb[36].mxu1 %vm534_vm0, %v987_v49 }
 0x189   :  { %v700_v58 = vpop.f32.mrb[18].mxu0  ;;  %v889_v56 = vpop.f32.mrb[16].mxu1 }
 0x18a   :  { %v701_v60 = vadd.f32 %v2389_v11, %v700_v58  ;;  %v702_v61 = vpop.f32.mrb[19].mxu0  ;;  %v928_v63 = vmax.f32 %v698_v55, 0.0  ;;  %v891_v57 = vpop.f32.mrb[17].mxu1  ;;  %v890_v59 = vadd.f32 %v2389_v11, %v889_v56 }
 0x18c   :  { %v929_v0 = vmax.f32 %v701_v60, 0.0  ;;  %v892_v60 = vpop.f32.mrb[18].mxu1 }
 0x18e   :  { %v988_v3 = vpack.c.bf16 %v929_v0, %v928_v63  ;;  %v893_v63 = vadd.f32 %v2389_v11, %v892_v60  ;;  %v894_v0 = vpop.f32.mrb[19].mxu1 }
 0x18f   :  { %v705_v6 = vpop.f32.mrb[20].mxu0  ;;  %v897_v8 = vpop.f32.mrb[20].mxu1 }
 0x190   :  { %v706_v9 = vadd.f32 %v2389_v11, %v705_v6  ;;  %v707_v10 = vpop.f32.mrb[21].mxu0  ;;  %1876 = vmatprep.mubr.msk.bf16.mxu1 %vm534_vm0, %v988_v3  ;;  %v976_v3 = vmax.f32 %v890_v59, 0.0  ;;  %v977_v5 = vmax.f32 %v893_v63, 0.0  ;;  %v899_v12 = vpop.f32.mrb[21].mxu1 }
 0x191   :  { %v708_v13 = vpop.f32.mrb[22].mxu0  ;;  %v898_v10 = vadd.f32 %v2389_v11, %v897_v8 }
 0x192   :  { %v709_v15 = vadd.f32 %v2389_v11, %v708_v13  ;;  %v710_v16 = vpop.f32.mrb[23].mxu0  ;;  %v930_v18 = vmax.f32 %v706_v9, 0.0  ;;  %v2435_v9 = vpack.c.bf16 %v977_v5, %v976_v3 }
 0x193   :  { %v978_v16 = vmax.f32 %v898_v10, 0.0 }
 0x194   :  { %v931_v19 = vmax.f32 %v709_v15, 0.0  ;;  %v900_v15 = vpop.f32.mrb[22].mxu1 }
 0x196   :  { %v989_v22 = vpack.c.bf16 %v931_v19, %v930_v18  ;;  %v901_v18 = vadd.f32 %v2389_v11, %v900_v15  ;;  %v902_v19 = vpop.f32.mrb[23].mxu1 }
 0x197   :  { %v713_v25 = vpop.f32.mrb[24].mxu0 }
 0x198   :  { %v714_v28 = vadd.f32 %v2389_v11, %v713_v25  ;;  %v715_v29 = vpop.f32.mrb[25].mxu0  ;;  %1877 = vmatmul.mubr.msk.bf16.gmra.mrb[40].mxu1 %vm534_vm0, %v989_v22  ;;  %v979_v22 = vmax.f32 %v901_v18, 0.0 }
 0x199   :  { %v716_v31 = vpop.f32.mrb[26].mxu0  ;;  %v905_v29 = vpop.f32.mrb[24].mxu1 }
 0x19a   :  { %v717_v33 = vadd.f32 %v2389_v11, %v716_v31  ;;  %v718_v34 = vpop.f32.mrb[27].mxu0  ;;  %v932_v36 = vmax.f32 %v714_v28, 0.0  ;;  %v2441_v26 = vpack.c.bf16 %v979_v22, %v978_v16  ;;  %v906_v30 = vadd.f32 %v2389_v11, %v905_v29  ;;  %v907_v31 = vpop.f32.mrb[25].mxu1 }
 0x19b   :  { %v908_v34 = vpop.f32.mrb[26].mxu1 }
 0x19c   :  { %v933_v37 = vmax.f32 %v717_v33, 0.0  ;;  %v910_v38 = vpop.f32.mrb[27].mxu1 }
 0x19e   :  { %v990_v40 = vpack.c.bf16 %v933_v37, %v932_v36  ;;  %v980_v36 = vmax.f32 %v906_v30, 0.0  ;;  %v909_v37 = vadd.f32 %v2389_v11, %v908_v34 }
 0x19f   :  { %v721_v43 = vpop.f32.mrb[28].mxu0  ;;  %v913_v50 = vpop.f32.mrb[28].mxu1 }
 0x1a0   :  { %v722_v46 = vadd.f32 %v2389_v11, %v721_v43  ;;  %v723_v47 = vpop.f32.mrb[29].mxu0  ;;  %1880 = vmatprep.mubr.msk.bf16.mxu1 %vm534_vm0, %v990_v40  ;;  %v981_v41 = vmax.f32 %v909_v37, 0.0 }
 0x1a1   :  { %v724_v49 = vpop.f32.mrb[30].mxu0 }
 0x1a2   :  { %v725_v51 = vadd.f32 %v2389_v11, %v724_v49  ;;  %v726_v52 = vpop.f32.mrb[31].mxu0  ;;  %v934_v54 = vmax.f32 %v722_v46, 0.0  ;;  %v2448_v45 = vpack.c.bf16 %v981_v41, %v980_v36 }
 0x1a3   :  { %v915_v52 = vpop.f32.mrb[29].mxu1 }
 0x1a4   :  { %v935_v55 = vmax.f32 %v725_v51, 0.0  ;;  %v914_v51 = vadd.f32 %v2389_v11, %v913_v50 }
 0x1a6   :  { %v991_v58 = vpack.c.bf16 %v935_v55, %v934_v54  ;;  %v916_v55 = vpop.f32.mrb[30].mxu1  ;;  %v982_v57 = vmax.f32 %v914_v51, 0.0 }
 0x1a7   :  { %v729_v61 = vpop.f32.mrb[32].mxu0  ;;  %v918_v59 = vpop.f32.mrb[31].mxu1 }
 0x1a8   :  { %v730_v1 = vadd.f32 %v2389_v11, %v729_v61  ;;  %v731_v2 = vpop.f32.mrb[33].mxu0  ;;  %1881 = vmatmul.mubr.msk.bf16.gmra.mrb[44].mxu1 %vm534_vm0, %v991_v58  ;;  %v917_v58 = vadd.f32 %v2389_v11, %v916_v55 }
 0x1a9   :  { %v732_v4 = vpop.f32.mrb[34].mxu0 }
 0x1aa   :  { %v733_v6 = vadd.f32 %v2389_v11, %v732_v4  ;;  %v734_v7 = vpop.f32.mrb[35].mxu0  ;;  %v936_v13 = vmax.f32 %v730_v1, 0.0  ;;  %v983_v0 = vmax.f32 %v917_v58, 0.0 }
 0x1ac   :  { %v937_v14 = vmax.f32 %v733_v6, 0.0  ;;  %v2456_v3 = vpack.c.bf16 %v983_v0, %v982_v57 }
 0x1ae   :  { %v992_v20 = vpack.c.bf16 %v937_v14, %v936_v13 }
 0x1af   :  { %v737_v21 = vpop.f32.mrb[36].mxu0 }
 0x1b0   :  { %v738_v23 = vadd.f32 %v2389_v11, %v737_v21  ;;  %v739_v24 = vpop.f32.mrb[37].mxu0  ;;  %1884 = vmatprep.mubr.msk.bf16.mxu1 %vm534_vm0, %v992_v20 }
 0x1b1   :  { %v740_v25 = vpop.f32.mrb[38].mxu0 }
 0x1b2   :  { %v741_v27 = vadd.f32 %v2389_v11, %v740_v25  ;;  %v742_v28 = vpop.f32.mrb[39].mxu0  ;;  %v938_v32 = vmax.f32 %v738_v23, 0.0 }
 0x1b4   :  { %v939_v33 = vmax.f32 %v741_v27, 0.0 }
 0x1b6   :  { %v993_v39 = vpack.c.bf16 %v939_v33, %v938_v32 }
 0x1b7   :  { %v745_v40 = vpop.f32.mrb[40].mxu0 }
 0x1b8   :  { %v746_v42 = vadd.f32 %v2389_v11, %v745_v40  ;;  %v747_v43 = vpop.f32.mrb[41].mxu0  ;;  %1885 = vmatmul.mubr.msk.bf16.gmra.mrb[48].mxu1 %vm534_vm0, %v993_v39 }
 0x1b9   :  { %v748_v44 = vpop.f32.mrb[42].mxu0 }
 0x1ba   :  { %v749_v46 = vadd.f32 %v2389_v11, %v748_v44  ;;  %v750_v47 = vpop.f32.mrb[43].mxu0  ;;  %v940_v48 = vmax.f32 %v746_v42, 0.0 }
 0x1bc   :  { %v941_v49 = vmax.f32 %v749_v46, 0.0 }
 0x1be   :  { %v994_v54 = vpack.c.bf16 %v941_v49, %v940_v48 }
 0x1bf   :  { %v753_v56 = vpop.f32.mrb[44].mxu0 }
 0x1c0   :  { %v754_v60 = vadd.f32 %v2389_v11, %v753_v56  ;;  %v755_v61 = vpop.f32.mrb[45].mxu0  ;;  %1888 = vmatprep.mubr.msk.bf16.mxu1 %vm534_vm0, %v994_v54 }
 0x1c1   :  { %v756_v63 = vpop.f32.mrb[46].mxu0 }
 0x1c2   :  { %v757_v1 = vadd.f32 %v2389_v11, %v756_v63  ;;  %v758_v2 = vpop.f32.mrb[47].mxu0  ;;  %v942_v4 = vmax.f32 %v754_v60, 0.0 }
 0x1c4   :  { %v943_v5 = vmax.f32 %v757_v1, 0.0 }
 0x1c6   :  { %v995_v6 = vpack.c.bf16 %v943_v5, %v942_v4 }
 0x1c7   :  { %v761_v7 = vpop.f32.mrb[48].mxu0 }
 0x1c8   :  { %v762_v8 = vadd.f32 %v2389_v11, %v761_v7  ;;  %v763_v10 = vpop.f32.mrb[49].mxu0  ;;  %1889 = vmatmul.mubr.msk.bf16.gmra.mrb[52].mxu1 %vm534_vm0, %v995_v6 }
 0x1c9   :  { %v764_v12 = vpop.f32.mrb[50].mxu0 }
 0x1ca   :  { %v765_v13 = vadd.f32 %v2389_v11, %v764_v12  ;;  %v766_v14 = vpop.f32.mrb[51].mxu0  ;;  %v944_v15 = vmax.f32 %v762_v8, 0.0 }
 0x1cc   :  { %v945_v16 = vmax.f32 %v765_v13, 0.0 }
 0x1ce   :  { %v996_v18 = vpack.c.bf16 %v945_v16, %v944_v15 }
 0x1cf   :  { %v769_v19 = vpop.f32.mrb[52].mxu0 }
 0x1d0   :  { %v770_v20 = vadd.f32 %v2389_v11, %v769_v19  ;;  %v771_v21 = vpop.f32.mrb[53].mxu0  ;;  %1892 = vmatprep.mubr.msk.bf16.mxu1 %vm534_vm0, %v996_v18 }
 0x1d1   :  { %v772_v22 = vpop.f32.mrb[54].mxu0 }
 0x1d2   :  { %v773_v23 = vadd.f32 %v2389_v11, %v772_v22  ;;  %v774_v24 = vpop.f32.mrb[55].mxu0  ;;  %v946_v25 = vmax.f32 %v770_v20, 0.0 }
 0x1d4   :  { %v947_v27 = vmax.f32 %v773_v23, 0.0 }
 0x1d6   :  { %v997_v28 = vpack.c.bf16 %v947_v27, %v946_v25 }
 0x1d7   :  { %v777_v29 = vpop.f32.mrb[56].mxu0 }
 0x1d8   :  { %v778_v30 = vadd.f32 %v2389_v11, %v777_v29  ;;  %v779_v31 = vpop.f32.mrb[57].mxu0  ;;  %1893 = vmatmul.mubr.msk.bf16.gmra.mrb[56].mxu1 %vm534_vm0, %v997_v28 }
 0x1d9   :  { %v780_v32 = vpop.f32.mrb[58].mxu0 }
 0x1da   :  { %v781_v33 = vadd.f32 %v2389_v11, %v780_v32  ;;  %v782_v34 = vpop.f32.mrb[59].mxu0  ;;  %v948_v36 = vmax.f32 %v778_v30, 0.0 }
 0x1dc   :  { %v949_v37 = vmax.f32 %v781_v33, 0.0 }
 0x1de   :  { %v998_v38 = vpack.c.bf16 %v949_v37, %v948_v36 }
 0x1df   :  { %v785_v39 = vpop.f32.mrb[60].mxu0 }
 0x1e0   :  { %v786_v40 = vadd.f32 %v2389_v11, %v785_v39  ;;  %v787_v41 = vpop.f32.mrb[61].mxu0  ;;  %1896 = vmatprep.mubr.msk.bf16.mxu1 %vm534_vm0, %v998_v38 }
 0x1e1   :  { %v788_v42 = vpop.f32.mrb[62].mxu0 }
 0x1e2   :  { %v789_v43 = vadd.f32 %v2389_v11, %v788_v42  ;;  %v790_v44 = vpop.f32.mrb[63].mxu0  ;;  %v950_v46 = vmax.f32 %v786_v40, 0.0 }
 0x1e4   :  { %v951_v47 = vmax.f32 %v789_v43, 0.0 }
 0x1e6   :  { %v999_v48 = vpack.c.bf16 %v951_v47, %v950_v46 }
 0x1e7   :  { %v793_v49 = vpop.f32.mrb[64].mxu0 }
 0x1e8   :  { %v794_v50 = vadd.f32 %v2389_v11, %v793_v49  ;;  %v795_v51 = vpop.f32.mrb[65].mxu0  ;;  %1897 = vmatmul.mubr.msk.bf16.gmra.mrb[60].mxu1 %vm534_vm0, %v999_v48 }
 0x1e9   :  { %v796_v52 = vpop.f32.mrb[66].mxu0 }
 0x1ea   :  { %v797_v54 = vadd.f32 %v2389_v11, %v796_v52  ;;  %v798_v55 = vpop.f32.mrb[67].mxu0  ;;  %v952_v56 = vmax.f32 %v794_v50, 0.0 }
 0x1ec   :  { %v953_v57 = vmax.f32 %v797_v54, 0.0 }
 0x1ee   :  { %v1000_v58 = vpack.c.bf16 %v953_v57, %v952_v56 }
 0x1ef   :  { %v801_v59 = vpop.f32.mrb[68].mxu0 }
 0x1f0   :  { %v802_v60 = vadd.f32 %v2389_v11, %v801_v59  ;;  %v803_v61 = vpop.f32.mrb[69].mxu0  ;;  %1900 = vmatprep.mubr.msk.bf16.mxu1 %vm534_vm0, %v1000_v58 }
 0x1f1   :  { %v804_v63 = vpop.f32.mrb[70].mxu0 }
 0x1f2   :  { %v805_v0 = vadd.f32 %v2389_v11, %v804_v63  ;;  %v806_v1 = vpop.f32.mrb[71].mxu0  ;;  %v954_v2 = vmax.f32 %v802_v60, 0.0 }
 0x1f4   :  { %v955_v4 = vmax.f32 %v805_v0, 0.0 }
 0x1f6   :  { %v1001_v5 = vpack.c.bf16 %v955_v4, %v954_v2 }
 0x1f7   :  { %v809_v6 = vpop.f32.mrb[72].mxu0 }
 0x1f8   :  { %v810_v7 = vadd.f32 %v2389_v11, %v809_v6  ;;  %v811_v8 = vpop.f32.mrb[73].mxu0  ;;  %1901 = vmatmul.mubr.msk.bf16.gmra.mrb[64].mxu1 %vm534_vm0, %v1001_v5 }
 0x1f9   :  { %v812_v10 = vpop.f32.mrb[74].mxu0 }
 0x1fa   :  { %v813_v12 = vadd.f32 %v2389_v11, %v812_v10  ;;  %v814_v13 = vpop.f32.mrb[75].mxu0  ;;  %v956_v14 = vmax.f32 %v810_v7, 0.0  ;;  %v1419_v7 = vld [vmem:[#allocation11 + $0x18] sm:$0xff] }
 0x1fc   :  { %v957_v15 = vmax.f32 %v813_v12, 0.0 }
 0x1fe   :  { %v1002_v16 = vpack.c.bf16 %v957_v15, %v956_v14 }
 0x1ff   :  { %v817_v18 = vpop.f32.mrb[76].mxu0 }
 0x200   :  { %v818_v19 = vadd.f32 %v2389_v11, %v817_v18  ;;  %v819_v20 = vpop.f32.mrb[77].mxu0  ;;  %1904 = vmatprep.mubr.msk.bf16.mxu1 %vm534_vm0, %v1002_v16 }
 0x201   :  { %v820_v21 = vpop.f32.mrb[78].mxu0 }
 0x202   :  { %v821_v22 = vadd.f32 %v2389_v11, %v820_v21  ;;  %v822_v23 = vpop.f32.mrb[79].mxu0  ;;  %v958_v24 = vmax.f32 %v818_v19, 0.0  ;;  %v1422_v21 = vld [vmem:[#allocation11 + $0x30] sm:$0xff] }
 0x204   :  { %v959_v25 = vmax.f32 %v821_v22, 0.0 }
 0x206   :  { %v1003_v27 = vpack.c.bf16 %v959_v25, %v958_v24  ;;  %v1420_v24 = vld [vmem:[#allocation11 + $0x20] sm:$0xff] }
 0x207   :  { %v825_v28 = vpop.f32.mrb[80].mxu0 }
 0x208   :  { %v826_v29 = vadd.f32 %v2389_v11, %v825_v28  ;;  %v827_v30 = vpop.f32.mrb[81].mxu0  ;;  %1905 = vmatmul.mubr.msk.bf16.gmra.mrb[68].mxu1 %vm534_vm0, %v1003_v27  ;;  %v1423_v28 = vld [vmem:[#allocation11 + $0x38] sm:$0xff] }
 0x209   :  { %v828_v31 = vpop.f32.mrb[82].mxu0 }
 0x20a   :  { %v829_v32 = vadd.f32 %v2389_v11, %v828_v31  ;;  %v830_v33 = vpop.f32.mrb[83].mxu0  ;;  %v960_v34 = vmax.f32 %v826_v29, 0.0 }
 0x20c   :  { %v961_v36 = vmax.f32 %v829_v32, 0.0  ;;  %v1421_v32 = vld [vmem:[#allocation11 + $0x28] sm:$0xff] }
 0x20e   :  { %v1004_v37 = vpack.c.bf16 %v961_v36, %v960_v34 }
 0x20f   :  { %v833_v38 = vpop.f32.mrb[84].mxu0 }
 0x210   :  { %v834_v39 = vadd.f32 %v2389_v11, %v833_v38  ;;  %v835_v40 = vpop.f32.mrb[85].mxu0  ;;  %1908 = vmatprep.mubr.msk.bf16.mxu1 %vm534_vm0, %v1004_v37 }
 0x211   :  { %v836_v41 = vpop.f32.mrb[86].mxu0 }
 0x212   :  { %v837_v42 = vadd.f32 %v2389_v11, %v836_v41  ;;  %v838_v43 = vpop.f32.mrb[87].mxu0  ;;  %v962_v44 = vmax.f32 %v834_v39, 0.0 }
 0x213   :  { %v1426_v43 = vld [vmem:[#allocation11 + $0x50] sm:$0xff] }
 0x214   :  { %v963_v46 = vmax.f32 %v837_v42, 0.0 }
 0x216   :  { %v1005_v47 = vpack.c.bf16 %v963_v46, %v962_v44 }
 0x217   :  { %v841_v48 = vpop.f32.mrb[88].mxu0 }
 0x218   :  { %v842_v49 = vadd.f32 %v2389_v11, %v841_v48  ;;  %v843_v50 = vpop.f32.mrb[89].mxu0  ;;  %1909 = vmatmul.mubr.msk.bf16.gmra.mrb[72].mxu1 %vm534_vm0, %v1005_v47  ;;  %v1424_v47 = vld [vmem:[#allocation11 + $0x40] sm:$0xff] }
 0x219   :  { %v844_v51 = vpop.f32.mrb[90].mxu0  ;;  %v1427_v50 = vld [vmem:[#allocation11 + $0x58] sm:$0xff] }
 0x21a   :  { %v845_v52 = vadd.f32 %v2389_v11, %v844_v51  ;;  %v846_v54 = vpop.f32.mrb[91].mxu0  ;;  %v964_v55 = vmax.f32 %v842_v49, 0.0 }
 0x21c   :  { %v965_v56 = vmax.f32 %v845_v52, 0.0 }
 0x21e   :  { %v1006_v57 = vpack.c.bf16 %v965_v56, %v964_v55  ;;  %v1425_v55 = vld [vmem:[#allocation11 + $0x48] sm:$0xff] }
 0x21f   :  { %v849_v58 = vpop.f32.mrb[92].mxu0 }
 0x220   :  { %v850_v59 = vadd.f32 %v2389_v11, %v849_v58  ;;  %v851_v60 = vpop.f32.mrb[93].mxu0  ;;  %1912 = vmatprep.mubr.msk.bf16.mxu1 %vm534_vm0, %v1006_v57 }
 0x221   :  { %v852_v61 = vpop.f32.mrb[94].mxu0 }
 0x222   :  { %v853_v63 = vadd.f32 %v2389_v11, %v852_v61  ;;  %v854_v0 = vpop.f32.mrb[95].mxu0  ;;  %v966_v1 = vmax.f32 %v850_v59, 0.0  ;;  %v2511_v11 = vld [vmem:[#allocation10] ss:$0 sm:$0xff] }
 0x224   :  { %v967_v2 = vmax.f32 %v853_v63, 0.0 }
 0x226   :  { %v1007_v4 = vpack.c.bf16 %v967_v2, %v966_v1  ;;  %v1430_v2 = vld [vmem:[#allocation11 + $0x70] sm:$0xff] }
 0x228   :  { %1913 = vmatmul.mubr.msk.bf16.gmra.mrb[76].mxu1 %vm534_vm0, %v1007_v4 }
 0x229   :  { %1916 = vmatprep.mubr.msk.bf16.mxu1 %vm534_vm0, %v2407_v62 }
 0x230   :  { %1917 = vmatmul.mubr.msk.bf16.gmra.mrb[80].mxu1 %vm534_vm0, %v2414_v17  ;;  %v1418_v17 = vld [vmem:[#allocation11 + $0x10] sm:$0xff] }
 0x231   :  { %1920 = vmatprep.mubr.msk.bf16.mxu1 %vm534_vm0, %v2421_v35 }
 0x238   :  { %1921 = vmatmul.mubr.msk.bf16.gmra.mrb[84].mxu1 %vm534_vm0, %v2428_v53  ;;  %v1416_v53 = vld [vmem:[#allocation11] sm:$0xff] }
 0x239   :  { %1924 = vmatprep.mubr.msk.bf16.mxu1 %vm534_vm0, %v2435_v9 }
 0x240   :  { %1925 = vmatmul.mubr.msk.bf16.gmra.mrb[88].mxu1 %vm534_vm0, %v2441_v26 }
 0x241   :  { %1928 = vmatprep.mubr.msk.bf16.mxu1 %vm534_vm0, %v2448_v45  ;;  %v1417_v45 = vld [vmem:[#allocation11 + $0x8] sm:$0xff] }
 0x248   :  { %1929 = vmatmul.mubr.msk.bf16.gmra.mrb[92].mxu1 %vm534_vm0, %v2456_v3 }
 0x24b   :  { %v1870_v62 = vpop.f32.mrb[32].mxu1 }
 0x24c   :  { %v1170_v35 = vadd.f32 %v1870_v62, %v2511_v11  ;;  %v1161_v5 = vpop.f32.mrb[33].mxu1 }
 0x24d   :  { %v1162_v6 = vadd.f32 %v2511_v11, %v1161_v5  ;;  %v1871_v9 = vpop.f32.mrb[34].mxu1 }
 0x24e   :  { %v1482_v8 = vadd.f32 %v1418_v17, %v1170_v35  ;;  %v1173_v26 = vadd.f32 %v1871_v9, %v2511_v11  ;;  %v1164_v10 = vpop.f32.mrb[35].mxu1  ;;  %v1428_v17 = vld [vmem:[#allocation11 + $0x60] sm:$0xff] }
 0x24f   :  { %v1480_v12 = vadd.f32 %v1416_v53, %v1162_v6  ;;  %v1165_v3 = vadd.f32 %v2511_v11, %v1164_v10  ;;  %v1431_v53 = vld [vmem:[#allocation11 + $0x78] sm:$0xff] }
 0x250   :  { %v1546_v13 = vmax.f32 %v1482_v8, 0.0  ;;  %v1483_v14 = vadd.f32 %v1419_v7, %v1173_v26  ;;  %v1429_v8 = vld [vmem:[#allocation11 + $0x68] sm:$0xff] }
 0x251   :  { %v1544_v15 = vmax.f32 %v1480_v12, 0.0  ;;  %v1481_v16 = vadd.f32 %v1417_v45, %v1165_v3 }
 0x252   :  { %1611 = vst.msk [vmem:[#allocation13 + $0x10] sm:$0xff] %vm1608_vm1, %v1546_v13  ;;  %v1547_v18 = vmax.f32 %v1483_v14, 0.0 }
 0x253   :  { %1609 = vst.msk [vmem:[#allocation13] sm:$0xff] %vm1608_vm1, %v1544_v15  ;;  %v1545_v19 = vmax.f32 %v1481_v16, 0.0 }
 0x254   :  { %1612 = vst.msk [vmem:[#allocation13 + $0x18] sm:$0xff] %vm1608_vm1, %v1547_v18  ;;  %v1434_v18 = vld [vmem:[#allocation11 + $0x90] sm:$0xff] }
 0x255   :  { %1610 = vst.msk [vmem:[#allocation13 + $0x8] sm:$0xff] %vm1608_vm1, %v1545_v19 }
 0x25b   :  { %v1874_v20 = vpop.f32.mrb[36].mxu1 }
 0x25c   :  { %v1186_v22 = vadd.f32 %v1874_v20, %v2511_v11  ;;  %v1177_v23 = vpop.f32.mrb[37].mxu1 }
 0x25d   :  { %v1178_v25 = vadd.f32 %v2511_v11, %v1177_v23  ;;  %v1875_v27 = vpop.f32.mrb[38].mxu1 }
 0x25e   :  { %v1486_v29 = vadd.f32 %v1422_v21, %v1186_v22  ;;  %v1189_v30 = vadd.f32 %v1875_v27, %v2511_v11  ;;  %v1180_v31 = vpop.f32.mrb[39].mxu1  ;;  %v1432_v21 = vld [vmem:[#allocation11 + $0x80] sm:$0xff] }
 0x25f   :  { %v1484_v33 = vadd.f32 %v1420_v24, %v1178_v25  ;;  %v1181_v34 = vadd.f32 %v2511_v11, %v1180_v31  ;;  %v1435_v24 = vld [vmem:[#allocation11 + $0x98] sm:$0xff] }
 0x260   :  { %v1550_v36 = vmax.f32 %v1486_v29, 0.0  ;;  %v1487_v37 = vadd.f32 %v1423_v28, %v1189_v30  ;;  %v1433_v29 = vld [vmem:[#allocation11 + $0x88] sm:$0xff] }
 0x261   :  { %v1548_v38 = vmax.f32 %v1484_v33, 0.0  ;;  %v1485_v39 = vadd.f32 %v1421_v32, %v1181_v34 }
 0x262   :  { %1615 = vst.msk [vmem:[#allocation13 + $0x30] sm:$0xff] %vm1608_vm1, %v1550_v36  ;;  %v1551_v40 = vmax.f32 %v1487_v37, 0.0 }
 0x263   :  { %1613 = vst.msk [vmem:[#allocation13 + $0x20] sm:$0xff] %vm1608_vm1, %v1548_v38  ;;  %v1549_v41 = vmax.f32 %v1485_v39, 0.0 }
 0x264   :  { %1616 = vst.msk [vmem:[#allocation13 + $0x38] sm:$0xff] %vm1608_vm1, %v1551_v40  ;;  %v1438_v40 = vld [vmem:[#allocation11 + $0xb0] sm:$0xff] }
 0x265   :  { %1614 = vst.msk [vmem:[#allocation13 + $0x28] sm:$0xff] %vm1608_vm1, %v1549_v41 }
 0x26b   :  { %v1878_v42 = vpop.f32.mrb[40].mxu1 }
 0x26c   :  { %v1202_v44 = vadd.f32 %v1878_v42, %v2511_v11  ;;  %v1193_v46 = vpop.f32.mrb[41].mxu1 }
 0x26d   :  { %v1194_v48 = vadd.f32 %v2511_v11, %v1193_v46  ;;  %v1879_v49 = vpop.f32.mrb[42].mxu1 }
 0x26e   :  { %v1490_v51 = vadd.f32 %v1426_v43, %v1202_v44  ;;  %v1205_v52 = vadd.f32 %v1879_v49, %v2511_v11  ;;  %v1196_v54 = vpop.f32.mrb[43].mxu1  ;;  %v1436_v43 = vld [vmem:[#allocation11 + $0xa0] sm:$0xff] }
 0x26f   :  { %v1488_v56 = vadd.f32 %v1424_v47, %v1194_v48  ;;  %v1197_v57 = vadd.f32 %v2511_v11, %v1196_v54  ;;  %v1439_v47 = vld [vmem:[#allocation11 + $0xb8] sm:$0xff] }
 0x270   :  { %v1554_v58 = vmax.f32 %v1490_v51, 0.0  ;;  %v1491_v59 = vadd.f32 %v1427_v50, %v1205_v52  ;;  %v1437_v51 = vld [vmem:[#allocation11 + $0xa8] sm:$0xff] }
 0x271   :  { %v1552_v60 = vmax.f32 %v1488_v56, 0.0  ;;  %v1489_v61 = vadd.f32 %v1425_v55, %v1197_v57 }
 0x272   :  { %1619 = vst.msk [vmem:[#allocation13 + $0x50] sm:$0xff] %vm1608_vm1, %v1554_v58  ;;  %v1555_v63 = vmax.f32 %v1491_v59, 0.0 }
 0x273   :  { %1617 = vst.msk [vmem:[#allocation13 + $0x40] sm:$0xff] %vm1608_vm1, %v1552_v60  ;;  %v1553_v0 = vmax.f32 %v1489_v61, 0.0 }
 0x274   :  { %1620 = vst.msk [vmem:[#allocation13 + $0x58] sm:$0xff] %vm1608_vm1, %v1555_v63  ;;  %v1442_v63 = vld [vmem:[#allocation11 + $0xd0] sm:$0xff] }
 0x275   :  { %1618 = vst.msk [vmem:[#allocation13 + $0x48] sm:$0xff] %vm1608_vm1, %v1553_v0 }
 0x27b   :  { %v1882_v1 = vpop.f32.mrb[44].mxu1 }
 0x27c   :  { %v1218_v4 = vadd.f32 %v1882_v1, %v2511_v11  ;;  %v1209_v62 = vpop.f32.mrb[45].mxu1 }
 0x27d   :  { %v1210_v35 = vadd.f32 %v2511_v11, %v1209_v62  ;;  %v1883_v5 = vpop.f32.mrb[46].mxu1 }
 0x27e   :  { %v1494_v6 = vadd.f32 %v1430_v2, %v1218_v4  ;;  %v1221_v9 = vadd.f32 %v1883_v5, %v2511_v11  ;;  %v1212_v7 = vpop.f32.mrb[47].mxu1  ;;  %v1440_v2 = vld [vmem:[#allocation11 + $0xc0] sm:$0xff] }
 0x27f   :  { %v1492_v26 = vadd.f32 %v1428_v17, %v1210_v35  ;;  %v1213_v10 = vadd.f32 %v2511_v11, %v1212_v7  ;;  %v1443_v17 = vld [vmem:[#allocation11 + $0xd8] sm:$0xff] }
 0x280   :  { %v1558_v45 = vmax.f32 %v1494_v6, 0.0  ;;  %v1495_v12 = vadd.f32 %v1431_v53, %v1221_v9  ;;  %v1441_v6 = vld [vmem:[#allocation11 + $0xc8] sm:$0xff] }
 0x281   :  { %v1556_v3 = vmax.f32 %v1492_v26, 0.0  ;;  %v1493_v13 = vadd.f32 %v1429_v8, %v1213_v10 }
 0x282   :  { %1623 = vst.msk [vmem:[#allocation13 + $0x70] sm:$0xff] %vm1608_vm1, %v1558_v45  ;;  %v1559_v14 = vmax.f32 %v1495_v12, 0.0 }
 0x283   :  { %1621 = vst.msk [vmem:[#allocation13 + $0x60] sm:$0xff] %vm1608_vm1, %v1556_v3  ;;  %v1557_v15 = vmax.f32 %v1493_v13, 0.0 }
 0x284   :  { %1624 = vst.msk [vmem:[#allocation13 + $0x78] sm:$0xff] %vm1608_vm1, %v1559_v14  ;;  %v1446_v14 = vld [vmem:[#allocation11 + $0xf0] sm:$0xff] }
 0x285   :  { %1622 = vst.msk [vmem:[#allocation13 + $0x68] sm:$0xff] %vm1608_vm1, %v1557_v15 }
 0x28b   :  { %v1886_v16 = vpop.f32.mrb[48].mxu1 }
 0x28c   :  { %v1234_v19 = vadd.f32 %v1886_v16, %v2511_v11  ;;  %v1225_v20 = vpop.f32.mrb[49].mxu1 }
 0x28d   :  { %v1226_v22 = vadd.f32 %v2511_v11, %v1225_v20  ;;  %v1887_v23 = vpop.f32.mrb[50].mxu1 }
 0x28e   :  { %v1498_v25 = vadd.f32 %v1434_v18, %v1234_v19  ;;  %v1237_v27 = vadd.f32 %v1887_v23, %v2511_v11  ;;  %v1228_v28 = vpop.f32.mrb[51].mxu1  ;;  %v1444_v18 = vld [vmem:[#allocation11 + $0xe0] sm:$0xff] }
 0x28f   :  { %v1496_v30 = vadd.f32 %v1432_v21, %v1226_v22  ;;  %v1229_v31 = vadd.f32 %v2511_v11, %v1228_v28  ;;  %v1447_v21 = vld [vmem:[#allocation11 + $0xf8] sm:$0xff] }
 0x290   :  { %v1562_v32 = vmax.f32 %v1498_v25, 0.0  ;;  %v1499_v33 = vadd.f32 %v1435_v24, %v1237_v27  ;;  %v1445_v25 = vld [vmem:[#allocation11 + $0xe8] sm:$0xff] }
 0x291   :  { %v1560_v34 = vmax.f32 %v1496_v30, 0.0  ;;  %v1497_v36 = vadd.f32 %v1433_v29, %v1229_v31 }
 0x292   :  { %1627 = vst.msk [vmem:[#allocation13 + $0x90] sm:$0xff] %vm1608_vm1, %v1562_v32  ;;  %v1563_v37 = vmax.f32 %v1499_v33, 0.0 }
 0x293   :  { %1625 = vst.msk [vmem:[#allocation13 + $0x80] sm:$0xff] %vm1608_vm1, %v1560_v34  ;;  %v1561_v38 = vmax.f32 %v1497_v36, 0.0 }
 0x294   :  { %1628 = vst.msk [vmem:[#allocation13 + $0x98] sm:$0xff] %vm1608_vm1, %v1563_v37  ;;  %v1450_v37 = vld [vmem:[#allocation11 + $0x110] sm:$0xff] }
 0x295   :  { %1626 = vst.msk [vmem:[#allocation13 + $0x88] sm:$0xff] %vm1608_vm1, %v1561_v38 }
 0x29b   :  { %v1890_v39 = vpop.f32.mrb[52].mxu1 }
 0x29c   :  { %v1250_v41 = vadd.f32 %v1890_v39, %v2511_v11  ;;  %v1241_v42 = vpop.f32.mrb[53].mxu1 }
 0x29d   :  { %v1242_v44 = vadd.f32 %v2511_v11, %v1241_v42  ;;  %v1891_v46 = vpop.f32.mrb[54].mxu1 }
 0x29e   :  { %v1502_v48 = vadd.f32 %v1438_v40, %v1250_v41  ;;  %v1253_v49 = vadd.f32 %v1891_v46, %v2511_v11  ;;  %v1244_v50 = vpop.f32.mrb[55].mxu1  ;;  %v1448_v40 = vld [vmem:[#allocation11 + $0x100] sm:$0xff] }
 0x29f   :  { %v1500_v52 = vadd.f32 %v1436_v43, %v1242_v44  ;;  %v1245_v54 = vadd.f32 %v2511_v11, %v1244_v50  ;;  %v1451_v43 = vld [vmem:[#allocation11 + $0x118] sm:$0xff] }
 0x2a0   :  { %v1566_v55 = vmax.f32 %v1502_v48, 0.0  ;;  %v1503_v56 = vadd.f32 %v1439_v47, %v1253_v49  ;;  %v1449_v48 = vld [vmem:[#allocation11 + $0x108] sm:$0xff] }
 0x2a1   :  { %v1564_v57 = vmax.f32 %v1500_v52, 0.0  ;;  %v1501_v58 = vadd.f32 %v1437_v51, %v1245_v54 }
 0x2a2   :  { %1631 = vst.msk [vmem:[#allocation13 + $0xb0] sm:$0xff] %vm1608_vm1, %v1566_v55  ;;  %v1567_v59 = vmax.f32 %v1503_v56, 0.0 }
 0x2a3   :  { %1629 = vst.msk [vmem:[#allocation13 + $0xa0] sm:$0xff] %vm1608_vm1, %v1564_v57  ;;  %v1565_v60 = vmax.f32 %v1501_v58, 0.0 }
 0x2a4   :  { %1632 = vst.msk [vmem:[#allocation13 + $0xb8] sm:$0xff] %vm1608_vm1, %v1567_v59  ;;  %v1454_v59 = vld [vmem:[#allocation11 + $0x130] sm:$0xff] }
 0x2a5   :  { %1630 = vst.msk [vmem:[#allocation13 + $0xa8] sm:$0xff] %vm1608_vm1, %v1565_v60 }
 0x2ab   :  { %v1894_v61 = vpop.f32.mrb[56].mxu1 }
 0x2ac   :  { %v1266_v0 = vadd.f32 %v1894_v61, %v2511_v11  ;;  %v1257_v1 = vpop.f32.mrb[57].mxu1 }
 0x2ad   :  { %v1258_v4 = vadd.f32 %v2511_v11, %v1257_v1  ;;  %v1895_v62 = vpop.f32.mrb[58].mxu1 }
 0x2ae   :  { %v1506_v35 = vadd.f32 %v1442_v63, %v1266_v0  ;;  %v1269_v5 = vadd.f32 %v1895_v62, %v2511_v11  ;;  %v1260_v53 = vpop.f32.mrb[59].mxu1  ;;  %v1452_v63 = vld [vmem:[#allocation11 + $0x120] sm:$0xff] }
 0x2af   :  { %v1504_v9 = vadd.f32 %v1440_v2, %v1258_v4  ;;  %v1261_v7 = vadd.f32 %v2511_v11, %v1260_v53  ;;  %v1455_v2 = vld [vmem:[#allocation11 + $0x138] sm:$0xff] }
 0x2b0   :  { %v1570_v8 = vmax.f32 %v1506_v35, 0.0  ;;  %v1507_v26 = vadd.f32 %v1443_v17, %v1269_v5  ;;  %v1453_v35 = vld [vmem:[#allocation11 + $0x128] sm:$0xff] }
 0x2b1   :  { %v1568_v10 = vmax.f32 %v1504_v9, 0.0  ;;  %v1505_v45 = vadd.f32 %v1441_v6, %v1261_v7 }
 0x2b2   :  { %1635 = vst.msk [vmem:[#allocation13 + $0xd0] sm:$0xff] %vm1608_vm1, %v1570_v8  ;;  %v1571_v12 = vmax.f32 %v1507_v26, 0.0 }
 0x2b3   :  { %1633 = vst.msk [vmem:[#allocation13 + $0xc0] sm:$0xff] %vm1608_vm1, %v1568_v10  ;;  %v1569_v3 = vmax.f32 %v1505_v45, 0.0 }
 0x2b4   :  { %1636 = vst.msk [vmem:[#allocation13 + $0xd8] sm:$0xff] %vm1608_vm1, %v1571_v12  ;;  %v1458_v12 = vld [vmem:[#allocation11 + $0x150] sm:$0xff] }
 0x2b5   :  { %1634 = vst.msk [vmem:[#allocation13 + $0xc8] sm:$0xff] %vm1608_vm1, %v1569_v3 }
 0x2bb   :  { %v1898_v13 = vpop.f32.mrb[60].mxu1 }
 0x2bc   :  { %v1282_v15 = vadd.f32 %v1898_v13, %v2511_v11  ;;  %v1273_v16 = vpop.f32.mrb[61].mxu1 }
 0x2bd   :  { %v1274_v19 = vadd.f32 %v2511_v11, %v1273_v16  ;;  %v1899_v20 = vpop.f32.mrb[62].mxu1 }
 0x2be   :  { %v1510_v22 = vadd.f32 %v1446_v14, %v1282_v15  ;;  %v1285_v23 = vadd.f32 %v1899_v20, %v2511_v11  ;;  %v1276_v24 = vpop.f32.mrb[63].mxu1  ;;  %v1456_v14 = vld [vmem:[#allocation11 + $0x140] sm:$0xff] }
 0x2bf   :  { %v1508_v27 = vadd.f32 %v1444_v18, %v1274_v19  ;;  %v1277_v28 = vadd.f32 %v2511_v11, %v1276_v24  ;;  %v1459_v18 = vld [vmem:[#allocation11 + $0x158] sm:$0xff] }
 0x2c0   :  { %v1574_v29 = vmax.f32 %v1510_v22, 0.0  ;;  %v1511_v30 = vadd.f32 %v1447_v21, %v1285_v23  ;;  %v1457_v22 = vld [vmem:[#allocation11 + $0x148] sm:$0xff] }
 0x2c1   :  { %v1572_v31 = vmax.f32 %v1508_v27, 0.0  ;;  %v1509_v32 = vadd.f32 %v1445_v25, %v1277_v28 }
 0x2c2   :  { %1639 = vst.msk [vmem:[#allocation13 + $0xf0] sm:$0xff] %vm1608_vm1, %v1574_v29  ;;  %v1575_v33 = vmax.f32 %v1511_v30, 0.0 }
 0x2c3   :  { %1637 = vst.msk [vmem:[#allocation13 + $0xe0] sm:$0xff] %vm1608_vm1, %v1572_v31  ;;  %v1573_v34 = vmax.f32 %v1509_v32, 0.0 }
 0x2c4   :  { %1640 = vst.msk [vmem:[#allocation13 + $0xf8] sm:$0xff] %vm1608_vm1, %v1575_v33  ;;  %v1462_v33 = vld [vmem:[#allocation11 + $0x170] sm:$0xff] }
 0x2c5   :  { %1638 = vst.msk [vmem:[#allocation13 + $0xe8] sm:$0xff] %vm1608_vm1, %v1573_v34 }
 0x2cb   :  { %v1902_v36 = vpop.f32.mrb[64].mxu1 }
 0x2cc   :  { %v1298_v38 = vadd.f32 %v1902_v36, %v2511_v11  ;;  %v1289_v39 = vpop.f32.mrb[65].mxu1 }
 0x2cd   :  { %v1290_v41 = vadd.f32 %v2511_v11, %v1289_v39  ;;  %v1903_v42 = vpop.f32.mrb[66].mxu1 }
 0x2ce   :  { %v1514_v44 = vadd.f32 %v1450_v37, %v1298_v38  ;;  %v1301_v46 = vadd.f32 %v1903_v42, %v2511_v11  ;;  %v1292_v47 = vpop.f32.mrb[67].mxu1  ;;  %v1460_v37 = vld [vmem:[#allocation11 + $0x160] sm:$0xff] }
 0x2cf   :  { %v1512_v49 = vadd.f32 %v1448_v40, %v1290_v41  ;;  %v1293_v50 = vadd.f32 %v2511_v11, %v1292_v47  ;;  %v1463_v40 = vld [vmem:[#allocation11 + $0x178] sm:$0xff] }
 0x2d0   :  { %v1578_v51 = vmax.f32 %v1514_v44, 0.0  ;;  %v1515_v52 = vadd.f32 %v1451_v43, %v1301_v46  ;;  %v1461_v44 = vld [vmem:[#allocation11 + $0x168] sm:$0xff] }
 0x2d1   :  { %v1576_v54 = vmax.f32 %v1512_v49, 0.0  ;;  %v1513_v55 = vadd.f32 %v1449_v48, %v1293_v50 }
 0x2d2   :  { %1643 = vst.msk [vmem:[#allocation13 + $0x110] sm:$0xff] %vm1608_vm1, %v1578_v51  ;;  %v1579_v56 = vmax.f32 %v1515_v52, 0.0 }
 0x2d3   :  { %1641 = vst.msk [vmem:[#allocation13 + $0x100] sm:$0xff] %vm1608_vm1, %v1576_v54  ;;  %v1577_v57 = vmax.f32 %v1513_v55, 0.0 }
 0x2d4   :  { %1644 = vst.msk [vmem:[#allocation13 + $0x118] sm:$0xff] %vm1608_vm1, %v1579_v56  ;;  %v1466_v56 = vld [vmem:[#allocation11 + $0x190] sm:$0xff] }
 0x2d5   :  { %1642 = vst.msk [vmem:[#allocation13 + $0x108] sm:$0xff] %vm1608_vm1, %v1577_v57 }
 0x2db   :  { %v1906_v58 = vpop.f32.mrb[68].mxu1 }
 0x2dc   :  { %v1314_v60 = vadd.f32 %v1906_v58, %v2511_v11  ;;  %v1305_v61 = vpop.f32.mrb[69].mxu1 }
 0x2dd   :  { %v1306_v0 = vadd.f32 %v2511_v11, %v1305_v61  ;;  %v1907_v1 = vpop.f32.mrb[70].mxu1 }
 0x2de   :  { %v1518_v4 = vadd.f32 %v1454_v59, %v1314_v60  ;;  %v1317_v62 = vadd.f32 %v1907_v1, %v2511_v11  ;;  %v1308_v17 = vpop.f32.mrb[71].mxu1  ;;  %v1464_v59 = vld [vmem:[#allocation11 + $0x180] sm:$0xff] }
 0x2df   :  { %v1516_v5 = vadd.f32 %v1452_v63, %v1306_v0  ;;  %v1309_v53 = vadd.f32 %v2511_v11, %v1308_v17  ;;  %v1467_v63 = vld [vmem:[#allocation11 + $0x198] sm:$0xff] }
 0x2e0   :  { %v1582_v6 = vmax.f32 %v1518_v4, 0.0  ;;  %v1519_v9 = vadd.f32 %v1455_v2, %v1317_v62  ;;  %v1465_v4 = vld [vmem:[#allocation11 + $0x188] sm:$0xff] }
 0x2e1   :  { %v1580_v7 = vmax.f32 %v1516_v5, 0.0  ;;  %v1517_v8 = vadd.f32 %v1453_v35, %v1309_v53 }
 0x2e2   :  { %1647 = vst.msk [vmem:[#allocation13 + $0x130] sm:$0xff] %vm1608_vm1, %v1582_v6  ;;  %v1583_v26 = vmax.f32 %v1519_v9, 0.0 }
 0x2e3   :  { %1645 = vst.msk [vmem:[#allocation13 + $0x120] sm:$0xff] %vm1608_vm1, %v1580_v7  ;;  %v1581_v10 = vmax.f32 %v1517_v8, 0.0 }
 0x2e4   :  { %1648 = vst.msk [vmem:[#allocation13 + $0x138] sm:$0xff] %vm1608_vm1, %v1583_v26  ;;  %v1470_v26 = vld [vmem:[#allocation11 + $0x1b0] sm:$0xff] }
 0x2e5   :  { %1646 = vst.msk [vmem:[#allocation13 + $0x128] sm:$0xff] %vm1608_vm1, %v1581_v10 }
 0x2eb   :  { %v1910_v45 = vpop.f32.mrb[72].mxu1 }
 0x2ec   :  { %v1330_v3 = vadd.f32 %v1910_v45, %v2511_v11  ;;  %v1321_v13 = vpop.f32.mrb[73].mxu1 }
 0x2ed   :  { %v1322_v15 = vadd.f32 %v2511_v11, %v1321_v13  ;;  %v1911_v16 = vpop.f32.mrb[74].mxu1 }
 0x2ee   :  { %v1522_v19 = vadd.f32 %v1458_v12, %v1330_v3  ;;  %v1333_v20 = vadd.f32 %v1911_v16, %v2511_v11  ;;  %v1324_v21 = vpop.f32.mrb[75].mxu1  ;;  %v1468_v12 = vld [vmem:[#allocation11 + $0x1a0] sm:$0xff] }
 0x2ef   :  { %v1520_v23 = vadd.f32 %v1456_v14, %v1322_v15  ;;  %v1325_v24 = vadd.f32 %v2511_v11, %v1324_v21  ;;  %v1471_v14 = vld [vmem:[#allocation11 + $0x1b8] sm:$0xff] }
 0x2f0   :  { %v1586_v25 = vmax.f32 %v1522_v19, 0.0  ;;  %v1523_v27 = vadd.f32 %v1459_v18, %v1333_v20  ;;  %v1469_v19 = vld [vmem:[#allocation11 + $0x1a8] sm:$0xff] }
 0x2f1   :  { %v1584_v28 = vmax.f32 %v1520_v23, 0.0  ;;  %v1521_v29 = vadd.f32 %v1457_v22, %v1325_v24 }
 0x2f2   :  { %1651 = vst.msk [vmem:[#allocation13 + $0x150] sm:$0xff] %vm1608_vm1, %v1586_v25  ;;  %v1587_v30 = vmax.f32 %v1523_v27, 0.0 }
 0x2f3   :  { %1649 = vst.msk [vmem:[#allocation13 + $0x140] sm:$0xff] %vm1608_vm1, %v1584_v28  ;;  %v1585_v31 = vmax.f32 %v1521_v29, 0.0 }
 0x2f4   :  { %1652 = vst.msk [vmem:[#allocation13 + $0x158] sm:$0xff] %vm1608_vm1, %v1587_v30  ;;  %v1474_v30 = vld [vmem:[#allocation11 + $0x1d0] sm:$0xff] }
 0x2f5   :  { %1650 = vst.msk [vmem:[#allocation13 + $0x148] sm:$0xff] %vm1608_vm1, %v1585_v31 }
 0x2fb   :  { %v1914_v32 = vpop.f32.mrb[76].mxu1 }
 0x2fc   :  { %v1346_v34 = vadd.f32 %v1914_v32, %v2511_v11  ;;  %v1337_v36 = vpop.f32.mrb[77].mxu1 }
 0x2fd   :  { %v1338_v38 = vadd.f32 %v2511_v11, %v1337_v36  ;;  %v1915_v39 = vpop.f32.mrb[78].mxu1 }
 0x2fe   :  { %v1526_v41 = vadd.f32 %v1462_v33, %v1346_v34  ;;  %v1349_v42 = vadd.f32 %v1915_v39, %v2511_v11  ;;  %v1340_v43 = vpop.f32.mrb[79].mxu1  ;;  %v1472_v33 = vld [vmem:[#allocation11 + $0x1c0] sm:$0xff] }
 0x2ff   :  { %v1524_v46 = vadd.f32 %v1460_v37, %v1338_v38  ;;  %v1341_v47 = vadd.f32 %v2511_v11, %v1340_v43  ;;  %v1475_v37 = vld [vmem:[#allocation11 + $0x1d8] sm:$0xff] }
 0x300   :  { %v1590_v48 = vmax.f32 %v1526_v41, 0.0  ;;  %v1527_v49 = vadd.f32 %v1463_v40, %v1349_v42  ;;  %v1473_v41 = vld [vmem:[#allocation11 + $0x1c8] sm:$0xff] }
 0x301   :  { %v1588_v50 = vmax.f32 %v1524_v46, 0.0  ;;  %v1525_v51 = vadd.f32 %v1461_v44, %v1341_v47 }
 0x302   :  { %1655 = vst.msk [vmem:[#allocation13 + $0x170] sm:$0xff] %vm1608_vm1, %v1590_v48  ;;  %v1591_v52 = vmax.f32 %v1527_v49, 0.0 }
 0x303   :  { %1653 = vst.msk [vmem:[#allocation13 + $0x160] sm:$0xff] %vm1608_vm1, %v1588_v50  ;;  %v1589_v54 = vmax.f32 %v1525_v51, 0.0  ;;  %v1918_v55 = vpop.f32.mrb[80].mxu1 }
 0x304   :  { %1656 = vst.msk [vmem:[#allocation13 + $0x178] sm:$0xff] %vm1608_vm1, %v1591_v52  ;;  %v1362_v57 = vadd.f32 %v1918_v55, %v2511_v11  ;;  %v1353_v58 = vpop.f32.mrb[81].mxu1  ;;  %v1478_v52 = vld [vmem:[#allocation11 + $0x1f0] sm:$0xff] }
 0x305   :  { %1654 = vst.msk [vmem:[#allocation13 + $0x168] sm:$0xff] %vm1608_vm1, %v1589_v54  ;;  %v1354_v60 = vadd.f32 %v2511_v11, %v1353_v58  ;;  %v1919_v61 = vpop.f32.mrb[82].mxu1 }
 0x306   :  { %v1530_v0 = vadd.f32 %v1466_v56, %v1362_v57  ;;  %v1365_v1 = vadd.f32 %v1919_v61, %v2511_v11  ;;  %v1356_v2 = vpop.f32.mrb[83].mxu1  ;;  %v1476_v56 = vld [vmem:[#allocation11 + $0x1e0] sm:$0xff] }
 0x307   :  { %v1528_v62 = vadd.f32 %v1464_v59, %v1354_v60  ;;  %v1357_v17 = vadd.f32 %v2511_v11, %v1356_v2  ;;  %v1479_v59 = vld [vmem:[#allocation11 + $0x1f8] sm:$0xff] }
 0x308   :  { %v1594_v35 = vmax.f32 %v1530_v0, 0.0  ;;  %v1531_v5 = vadd.f32 %v1467_v63, %v1365_v1  ;;  %v1477_v0 = vld [vmem:[#allocation11 + $0x1e8] sm:$0xff] }
 0x309   :  { %v1592_v53 = vmax.f32 %v1528_v62, 0.0  ;;  %v1529_v6 = vadd.f32 %v1465_v4, %v1357_v17 }
 0x30a   :  { %1659 = vst.msk [vmem:[#allocation13 + $0x190] sm:$0xff] %vm1608_vm1, %v1594_v35  ;;  %v1595_v9 = vmax.f32 %v1531_v5, 0.0 }
 0x30b   :  { %1657 = vst.msk [vmem:[#allocation13 + $0x180] sm:$0xff] %vm1608_vm1, %v1592_v53  ;;  %v1593_v7 = vmax.f32 %v1529_v6, 0.0  ;;  %v1922_v8 = vpop.f32.mrb[84].mxu1 }
 0x30c   :  { %1660 = vst.msk [vmem:[#allocation13 + $0x198] sm:$0xff] %vm1608_vm1, %v1595_v9  ;;  %v1378_v10 = vadd.f32 %v1922_v8, %v2511_v11  ;;  %v1369_v45 = vpop.f32.mrb[85].mxu1 }
 0x30d   :  { %1658 = vst.msk [vmem:[#allocation13 + $0x188] sm:$0xff] %vm1608_vm1, %v1593_v7  ;;  %v1370_v3 = vadd.f32 %v2511_v11, %v1369_v45  ;;  %v1923_v13 = vpop.f32.mrb[86].mxu1 }
 0x30e   :  { %v1534_v15 = vadd.f32 %v1470_v26, %v1378_v10  ;;  %v1381_v16 = vadd.f32 %v1923_v13, %v2511_v11  ;;  %v1372_v18 = vpop.f32.mrb[87].mxu1 }
 0x30f   :  { %v1532_v20 = vadd.f32 %v1468_v12, %v1370_v3  ;;  %v1373_v21 = vadd.f32 %v2511_v11, %v1372_v18 }
 0x310   :  { %v1598_v22 = vmax.f32 %v1534_v15, 0.0  ;;  %v1535_v23 = vadd.f32 %v1471_v14, %v1381_v16 }
 0x311   :  { %v1596_v24 = vmax.f32 %v1532_v20, 0.0  ;;  %v1533_v25 = vadd.f32 %v1469_v19, %v1373_v21 }
 0x312   :  { %1663 = vst.msk [vmem:[#allocation13 + $0x1b0] sm:$0xff] %vm1608_vm1, %v1598_v22  ;;  %v1599_v27 = vmax.f32 %v1535_v23, 0.0 }
 0x313   :  { %1661 = vst.msk [vmem:[#allocation13 + $0x1a0] sm:$0xff] %vm1608_vm1, %v1596_v24  ;;  %v1597_v28 = vmax.f32 %v1533_v25, 0.0  ;;  %v1926_v29 = vpop.f32.mrb[88].mxu1 }
 0x314   :  { %1664 = vst.msk [vmem:[#allocation13 + $0x1b8] sm:$0xff] %vm1608_vm1, %v1599_v27  ;;  %v1394_v31 = vadd.f32 %v1926_v29, %v2511_v11  ;;  %v1385_v32 = vpop.f32.mrb[89].mxu1 }
 0x315   :  { %1662 = vst.msk [vmem:[#allocation13 + $0x1a8] sm:$0xff] %vm1608_vm1, %v1597_v28  ;;  %v1386_v34 = vadd.f32 %v2511_v11, %v1385_v32  ;;  %v1927_v36 = vpop.f32.mrb[90].mxu1 }
 0x316   :  { %v1538_v38 = vadd.f32 %v1474_v30, %v1394_v31  ;;  %v1397_v39 = vadd.f32 %v1927_v36, %v2511_v11  ;;  %v1388_v40 = vpop.f32.mrb[91].mxu1 }
 0x317   :  { %v1536_v42 = vadd.f32 %v1472_v33, %v1386_v34  ;;  %v1389_v43 = vadd.f32 %v2511_v11, %v1388_v40 }
 0x318   :  { %v1602_v44 = vmax.f32 %v1538_v38, 0.0  ;;  %v1539_v46 = vadd.f32 %v1475_v37, %v1397_v39 }
 0x319   :  { %v1600_v47 = vmax.f32 %v1536_v42, 0.0  ;;  %v1537_v48 = vadd.f32 %v1473_v41, %v1389_v43 }
 0x31a   :  { %1667 = vst.msk [vmem:[#allocation13 + $0x1d0] sm:$0xff] %vm1608_vm1, %v1602_v44  ;;  %v1603_v49 = vmax.f32 %v1539_v46, 0.0 }
 0x31b   :  { %1665 = vst.msk [vmem:[#allocation13 + $0x1c0] sm:$0xff] %vm1608_vm1, %v1600_v47  ;;  %v1601_v50 = vmax.f32 %v1537_v48, 0.0  ;;  %v1930_v51 = vpop.f32.mrb[92].mxu1 }
 0x31c   :  { %1668 = vst.msk [vmem:[#allocation13 + $0x1d8] sm:$0xff] %vm1608_vm1, %v1603_v49  ;;  %v1410_v54 = vadd.f32 %v1930_v51, %v2511_v11  ;;  %v1401_v55 = vpop.f32.mrb[93].mxu1 }
 0x31d   :  { %1666 = vst.msk [vmem:[#allocation13 + $0x1c8] sm:$0xff] %vm1608_vm1, %v1601_v50  ;;  %v1402_v57 = vadd.f32 %v2511_v11, %v1401_v55  ;;  %v1931_v58 = vpop.f32.mrb[94].mxu1 }
 0x31e   :  { %v1542_v60 = vadd.f32 %v1478_v52, %v1410_v54  ;;  %v1413_v61 = vadd.f32 %v1931_v58, %v2511_v11  ;;  %v1404_v63 = vpop.f32.mrb[95].mxu1 }
 0x31f   :  { %v1540_v1 = vadd.f32 %v1476_v56, %v1402_v57  ;;  %v1405_v2 = vadd.f32 %v2511_v11, %v1404_v63 }
 0x320   :  { %v1606_v4 = vmax.f32 %v1542_v60, 0.0  ;;  %v1543_v62 = vadd.f32 %v1479_v59, %v1413_v61 }
 0x321   :  { %v1604_v17 = vmax.f32 %v1540_v1, 0.0  ;;  %v1541_v35 = vadd.f32 %v1477_v0, %v1405_v2 }
 0x322   :  { %1671 = vst.msk [vmem:[#allocation13 + $0x1f0] sm:$0xff] %vm1608_vm1, %v1606_v4  ;;  %v1607_v5 = vmax.f32 %v1543_v62, 0.0 }
 0x323   :  { %1669 = vst.msk [vmem:[#allocation13 + $0x1e0] sm:$0xff] %vm1608_vm1, %v1604_v17  ;;  %v1605_v53 = vmax.f32 %v1541_v35, 0.0 }
 0x324   :  { %1672 = vst.msk [vmem:[#allocation13 + $0x1f8] sm:$0xff] %vm1608_vm1, %v1607_v5 }
 0x325   :  { %1670 = vst.msk [vmem:[#allocation13 + $0x1e8] sm:$0xff] %vm1608_vm1, %v1605_v53 }
 0x326   :  { %2211 = shalt.err (!%p2208_p10)
}
 0x327   :  { %s2212_s24 = scalar_lea.hbm %s2662_s6, 8192 }
 0x328   :  { %p2213_p11 = scmp.ne.s32.totalorder %s2662_s6, %s2212_s24  ;;  %p2216_p12 = scmp.lt.u32.totalorder %s2212_s24, %s2662_s6 }
 0x32a   :  { %p2218_p13 = pnand %p2216_p12, %p2213_p11 }
 0x32c   :  { %2221 = shalt.err (!%p2218_p13)
}
 0x32d   :  { %1684 = dma.vmem_to_hbm [thread:$0]  %s1679_s0, 8192, %s2662_s6, [#allocation4], %s2237_s3, %s2237_s3, %s2238_s7  }
 0x32e   :  { %2230 = dma.done.wait [#allocation4], 8192  }
 0x32f   :  { %2231 = vsyncadd [#allocation4], 4294959104 }
 0x330   :  { %1688 = vsyncpa [#allocation3], 1 }
 0x331   :  { %1689 = vsyncpa [#allocation6], 1 }
 0x332   :  { %1690 = vsyncpa [#allocation9], 1 }
 0x333   :  { %1691 = vsyncpa [#allocation12], 1 }
 0x334   :  { %1692 = vsyncpa [#allocation4], 1 }

</bundles_post_ra>
